<compile_context>
chip_gen: v7x
topology: tpu7x:2x2x1
jax: 0.10.0
libtpu: 0.0.40
codegen_flags: <defaults>
</compile_context>

<pallas_src>
import functools

import jax
import jax.numpy as jnp
import numpy as np
from jax.experimental import pallas as pl
from jax.experimental.pallas import tpu as pltpu


def _graph_pool_kernel(atoms_ref, edges_ref, out_ref, *,
                       chunk, n_chunks, max_atoms, num_degrees):
    """One grid step = (BT, A, F) block of graphs, processed in CH-graph sub-chunks."""
    neg = jnp.float32(-jnp.inf)          # lookup_neighbors maskvalue

    @pl.loop(0, n_chunks)
    def _(c):
        base = pl.multiple_of(c * chunk, chunk)

        # Neighbour table for this sub-chunk; hoist the D per-slot lane slices once
        # (D is tiny and static) so the j-loop below is pure compare/or on (CH, A, 1).
        edges_c = edges_ref[pl.ds(base, chunk), :, :]                  # (CH, A, D) int32
        e_slots = [edges_c[:, :, d:d + 1] for d in range(num_degrees)]

        # degree mask, exactly the reference test (edges != -1)
        has_nb = e_slots[0] != -1
        for e_d in e_slots[1:]:
            has_nb = jnp.logical_or(has_nb, e_d != -1)                 # (CH, A, 1)

        # include_self=True: the running max starts from the atom's own features.
        maxf = atoms_ref[pl.ds(base, chunk), :, :]                     # (CH, A, F)

        # Sweep candidate atoms j (A small & static -> unrolled).  mask_j[g, i] is
        # "atom j appears among atom i's neighbour slots"; the candidate row is
        # re-read from the ref (cheap vld) rather than sliced out of registers.
        for j in range(max_atoms):
            mask_j = e_slots[0] == j
            for e_d in e_slots[1:]:
                mask_j = jnp.logical_or(mask_j, e_d == j)              # (CH, A, 1)
            row_j = atoms_ref[pl.ds(base, chunk), pl.ds(j, 1), :]      # (CH, 1, F)
            maxf = jnp.maximum(maxf, jnp.where(mask_j, row_j, neg))

        # degree-0 atoms are zeroed (general_atom_mask); lane-dense unmasked store.
        out_ref[pl.ds(base, chunk), :, :] = jnp.where(
            has_nb, maxf, 0.0).astype(out_ref.dtype)


def graph_pool(atoms, edges, *, block_graphs=128, chunk_graphs=8):
    """Pallas GraphPool. atoms: (B, A, F) f32, edges: (B, A, D) int (-1 = none)."""
    B, A, F = atoms.shape
    D = edges.shape[-1]
    edges = edges.astype(jnp.int32)

    # ---- choose per-step tile size BT (graphs per grid step) ----------------
    # Double-buffered VMEM per graph: atoms + out tiles (f32) plus the edges tile,
    # whose last dim is lane-padded (D -> 128) in VMEM.  Budget leaves headroom
    # below the 32 MiB scoped default (v7x only has 64 MiB VMEM total).
    bytes_per_graph = (2 * A * F + A * max(D, 128)) * 4
    max_bt_vmem = max(1, (24 << 20) // (2 * bytes_per_graph))
    # Keep the grid >= 2 steps whenever B allows (2 TensorCores on v7x); for large
    # B the grid naturally has many steps per core, so pipelining still overlaps.
    target = max(1, min(block_graphs, max_bt_vmem, B if B == 1 else B // 2))

    # Prefer a tile that divides B exactly: avoids a host-side padding copy of
    # atoms/edges (an extra HBM pass that can cost as much as the kernel itself).
    BT = target
    while BT > 1 and B % BT != 0:
        BT -= 1
    pad = 0
    if BT < max(1, target // 2):
        BT = target                      # awkward B (e.g. large prime): pad the tail
        pad = (-B) % BT

    if pad:
        atoms_p = jnp.concatenate([atoms, jnp.zeros((pad, A, F), atoms.dtype)], axis=0)
        edges_p = jnp.concatenate([edges, jnp.full((pad, A, D), -1, edges.dtype)], axis=0)
    else:
        atoms_p, edges_p = atoms, edges
    Bp = B + pad

    # In-kernel sub-chunking: bounded vreg pressure while the DMA tile stays big.
    CH = max(1, min(chunk_graphs, BT))
    while BT % CH != 0:
        CH -= 1
    n_chunks = BT // CH

    kernel = functools.partial(_graph_pool_kernel,
                               chunk=CH, n_chunks=n_chunks,
                               max_atoms=A, num_degrees=D)

    out = pl.pallas_call(
        kernel,
        out_shape=jax.ShapeDtypeStruct((Bp, A, F), atoms.dtype),
        grid=(Bp // BT,),
        in_specs=[
            pl.BlockSpec((BT, A, F), lambda g: (g, 0, 0)),   # atoms
            pl.BlockSpec((BT, A, D), lambda g: (g, 0, 0)),   # edges (lane-padded tile)
        ],
        out_specs=pl.BlockSpec((BT, A, F), lambda g: (g, 0, 0)),
        compiler_params=pltpu.CompilerParams(
            dimension_semantics=("parallel",)),
    )(atoms_p, edges_p)
    return out[:B]


def reference(atoms, edges):
    """Pure-JAX re-implementation of the PyTorch forward (for verification)."""
    B, A, F = atoms.shape
    # lookup_neighbors(maskvalue=-inf, include_self=True): index -1 -> mask row.
    mask_row = jnp.full((B, 1, F), -jnp.inf, atoms.dtype)
    padded = jnp.concatenate([mask_row, atoms], axis=1)          # (B, A+1, F)
    idx = edges + 1                                              # (B, A, D)
    neigh = jax.vmap(lambda p, i: p[i])(padded, idx)             # (B, A, D, F)
    all_feats = jnp.concatenate([atoms[:, :, None, :], neigh], axis=2)
    max_features = jnp.max(all_feats, axis=2)                    # (B, A, F)
    degree = jnp.sum((edges != -1).astype(jnp.int32), axis=-1, keepdims=True)
    general_atom_mask = (degree != 0).astype(atoms.dtype)
    return max_features * general_atom_mask


if __name__ == "__main__":
    key = jax.random.PRNGKey(0)
    B, A, D, F = 8, 16, 4, 128    # samples, max_atoms, max_degrees, atom_features

    k1, k2 = jax.random.split(key)
    atoms = jax.random.normal(k1, (B, A, F), dtype=jnp.float32)
    edges = jax.random.randint(k2, (B, A, D), minval=-1, maxval=A, dtype=jnp.int32)
    edges = edges.at[:, 0, :].set(-1)   # force some degree-0 atoms to exercise the mask

    out = graph_pool(atoms, edges)
    out = jax.block_until_ready(out)

    ref = reference(atoms, edges)
    np.testing.assert_allclose(np.asarray(out), np.asarray(ref),
                               rtol=1e-6, atol=1e-6)
    print("KERNEL_OK")
</pallas_src>

<mosaic_0001>
module attributes {stable_mosaic.version = 11 : i64} {
  func.func @_graph_pool_kernel(%arg0: i32, %arg1: memref<4x16x128xf32, #tpu.memory_space<vmem>>, %arg2: memref<4x16x4xi32, #tpu.memory_space<vmem>>, %arg3: memref<4x16x128xf32, #tpu.memory_space<vmem>>) attributes {dimension_semantics = [#tpu.dimension_semantics<parallel>], iteration_bounds = array<i64: 2>, scalar_prefetch = 0 : i64, scratch_operands = 0 : i64, tpu.core_type = #tpu.core_type<tc>, window_params = [{transform_indices = @transform_0, window_bounds = array<i64: 4, 16, 128>}, {transform_indices = @transform_1, window_bounds = array<i64: 4, 16, 4>}, {transform_indices = @transform_2, window_bounds = array<i64: 4, 16, 128>}]} {
    %cst = arith.constant 0xFF800000 : f32
    %c0_i32 = arith.constant 0 : i32
    %c1_i32 = arith.constant 1 : i32
    %0 = arith.muli %c0_i32, %c1_i32 : i32
    %c0_i32_0 = arith.constant 0 : i32
    %1 = arith.addi %c0_i32_0, %0 : i32
    %c4_i32 = arith.constant 4 : i32
    %2 = arith.muli %1, %c4_i32 : i32
    %3 = tpu.assume_multiple %2, 4 : i32
    %4 = arith.index_cast %3 : i32 to index
    %c0 = arith.constant 0 : index
    %c0_1 = arith.constant 0 : index
    %5 = vector.load %arg2[%4, %c0, %c0_1] : memref<4x16x4xi32, #tpu.memory_space<vmem>>, vector<4x16x4xi32>
    %6 = vector.extract_strided_slice %5 {offsets = [0, 0, 0], sizes = [4, 16, 1], strides = [1, 1, 1]} : vector<4x16x4xi32> to vector<4x16x1xi32>
    %7 = vector.extract_strided_slice %5 {offsets = [0, 0, 1], sizes = [4, 16, 1], strides = [1, 1, 1]} : vector<4x16x4xi32> to vector<4x16x1xi32>
    %8 = vector.extract_strided_slice %5 {offsets = [0, 0, 2], sizes = [4, 16, 1], strides = [1, 1, 1]} : vector<4x16x4xi32> to vector<4x16x1xi32>
    %9 = vector.extract_strided_slice %5 {offsets = [0, 0, 3], sizes = [4, 16, 1], strides = [1, 1, 1]} : vector<4x16x4xi32> to vector<4x16x1xi32>
    %c-1_i32 = arith.constant -1 : i32
    %10 = vector.broadcast %c-1_i32 : i32 to vector<4x16x1xi32>
    %11 = arith.cmpi ne, %6, %10 : vector<4x16x1xi32>
    %c-1_i32_2 = arith.constant -1 : i32
    %12 = vector.broadcast %c-1_i32_2 : i32 to vector<4x16x1xi32>
    %13 = arith.cmpi ne, %7, %12 : vector<4x16x1xi32>
    %14 = arith.ori %11, %13 : vector<4x16x1xi1>
    %c-1_i32_3 = arith.constant -1 : i32
    %15 = vector.broadcast %c-1_i32_3 : i32 to vector<4x16x1xi32>
    %16 = arith.cmpi ne, %8, %15 : vector<4x16x1xi32>
    %17 = arith.ori %14, %16 : vector<4x16x1xi1>
    %c-1_i32_4 = arith.constant -1 : i32
    %18 = vector.broadcast %c-1_i32_4 : i32 to vector<4x16x1xi32>
    %19 = arith.cmpi ne, %9, %18 : vector<4x16x1xi32>
    %20 = arith.ori %17, %19 : vector<4x16x1xi1>
    %21 = arith.index_cast %3 : i32 to index
    %c0_5 = arith.constant 0 : index
    %c0_6 = arith.constant 0 : index
    %22 = vector.load %arg1[%21, %c0_5, %c0_6] : memref<4x16x128xf32, #tpu.memory_space<vmem>>, vector<4x16x128xf32>
    %c0_i32_7 = arith.constant 0 : i32
    %23 = vector.broadcast %c0_i32_7 : i32 to vector<4x16x1xi32>
    %24 = arith.cmpi eq, %6, %23 : vector<4x16x1xi32>
    %c0_i32_8 = arith.constant 0 : i32
    %25 = vector.broadcast %c0_i32_8 : i32 to vector<4x16x1xi32>
    %26 = arith.cmpi eq, %7, %25 : vector<4x16x1xi32>
    %27 = arith.ori %24, %26 : vector<4x16x1xi1>
    %c0_i32_9 = arith.constant 0 : i32
    %28 = vector.broadcast %c0_i32_9 : i32 to vector<4x16x1xi32>
    %29 = arith.cmpi eq, %8, %28 : vector<4x16x1xi32>
    %30 = arith.ori %27, %29 : vector<4x16x1xi1>
    %c0_i32_10 = arith.constant 0 : i32
    %31 = vector.broadcast %c0_i32_10 : i32 to vector<4x16x1xi32>
    %32 = arith.cmpi eq, %9, %31 : vector<4x16x1xi32>
    %33 = arith.ori %30, %32 : vector<4x16x1xi1>
    %34 = arith.index_cast %3 : i32 to index
    %c0_11 = arith.constant 0 : index
    %c0_12 = arith.constant 0 : index
    %35 = vector.load %arg1[%34, %c0_11, %c0_12] : memref<4x16x128xf32, #tpu.memory_space<vmem>>, vector<4x1x128xf32>
    %36 = vector.shape_cast %33 : vector<4x16x1xi1> to vector<4x16x1xi1>
    %37 = vector.broadcast %36 : vector<4x16x1xi1> to vector<4x16x128xi1>
    %38 = vector.shape_cast %35 : vector<4x1x128xf32> to vector<4x1x128xf32>
    %39 = vector.broadcast %38 : vector<4x1x128xf32> to vector<4x16x128xf32>
    %40 = vector.broadcast %cst : f32 to vector<4x16x128xf32>
    %41 = arith.select %37, %39, %40 : vector<4x16x128xi1>, vector<4x16x128xf32>
    %42 = arith.maximumf %22, %41 : vector<4x16x128xf32>
    %c1_i32_13 = arith.constant 1 : i32
    %43 = vector.broadcast %c1_i32_13 : i32 to vector<4x16x1xi32>
    %44 = arith.cmpi eq, %6, %43 : vector<4x16x1xi32>
    %c1_i32_14 = arith.constant 1 : i32
    %45 = vector.broadcast %c1_i32_14 : i32 to vector<4x16x1xi32>
    %46 = arith.cmpi eq, %7, %45 : vector<4x16x1xi32>
    %47 = arith.ori %44, %46 : vector<4x16x1xi1>
    %c1_i32_15 = arith.constant 1 : i32
    %48 = vector.broadcast %c1_i32_15 : i32 to vector<4x16x1xi32>
    %49 = arith.cmpi eq, %8, %48 : vector<4x16x1xi32>
    %50 = arith.ori %47, %49 : vector<4x16x1xi1>
    %c1_i32_16 = arith.constant 1 : i32
    %51 = vector.broadcast %c1_i32_16 : i32 to vector<4x16x1xi32>
    %52 = arith.cmpi eq, %9, %51 : vector<4x16x1xi32>
    %53 = arith.ori %50, %52 : vector<4x16x1xi1>
    %54 = arith.index_cast %3 : i32 to index
    %c1 = arith.constant 1 : index
    %c0_17 = arith.constant 0 : index
    %55 = vector.load %arg1[%54, %c1, %c0_17] : memref<4x16x128xf32, #tpu.memory_space<vmem>>, vector<4x1x128xf32>
    %56 = vector.shape_cast %53 : vector<4x16x1xi1> to vector<4x16x1xi1>
    %57 = vector.broadcast %56 : vector<4x16x1xi1> to vector<4x16x128xi1>
    %58 = vector.shape_cast %55 : vector<4x1x128xf32> to vector<4x1x128xf32>
    %59 = vector.broadcast %58 : vector<4x1x128xf32> to vector<4x16x128xf32>
    %60 = vector.broadcast %cst : f32 to vector<4x16x128xf32>
    %61 = arith.select %57, %59, %60 : vector<4x16x128xi1>, vector<4x16x128xf32>
    %62 = arith.maximumf %42, %61 : vector<4x16x128xf32>
    %c2_i32 = arith.constant 2 : i32
    %63 = vector.broadcast %c2_i32 : i32 to vector<4x16x1xi32>
    %64 = arith.cmpi eq, %6, %63 : vector<4x16x1xi32>
    %c2_i32_18 = arith.constant 2 : i32
    %65 = vector.broadcast %c2_i32_18 : i32 to vector<4x16x1xi32>
    %66 = arith.cmpi eq, %7, %65 : vector<4x16x1xi32>
    %67 = arith.ori %64, %66 : vector<4x16x1xi1>
    %c2_i32_19 = arith.constant 2 : i32
    %68 = vector.broadcast %c2_i32_19 : i32 to vector<4x16x1xi32>
    %69 = arith.cmpi eq, %8, %68 : vector<4x16x1xi32>
    %70 = arith.ori %67, %69 : vector<4x16x1xi1>
    %c2_i32_20 = arith.constant 2 : i32
    %71 = vector.broadcast %c2_i32_20 : i32 to vector<4x16x1xi32>
    %72 = arith.cmpi eq, %9, %71 : vector<4x16x1xi32>
    %73 = arith.ori %70, %72 : vector<4x16x1xi1>
    %74 = arith.index_cast %3 : i32 to index
    %c2 = arith.constant 2 : index
    %c0_21 = arith.constant 0 : index
    %75 = vector.load %arg1[%74, %c2, %c0_21] : memref<4x16x128xf32, #tpu.memory_space<vmem>>, vector<4x1x128xf32>
    %76 = vector.shape_cast %73 : vector<4x16x1xi1> to vector<4x16x1xi1>
    %77 = vector.broadcast %76 : vector<4x16x1xi1> to vector<4x16x128xi1>
    %78 = vector.shape_cast %75 : vector<4x1x128xf32> to vector<4x1x128xf32>
    %79 = vector.broadcast %78 : vector<4x1x128xf32> to vector<4x16x128xf32>
    %80 = vector.broadcast %cst : f32 to vector<4x16x128xf32>
    %81 = arith.select %77, %79, %80 : vector<4x16x128xi1>, vector<4x16x128xf32>
    %82 = arith.maximumf %62, %81 : vector<4x16x128xf32>
    %c3_i32 = arith.constant 3 : i32
    %83 = vector.broadcast %c3_i32 : i32 to vector<4x16x1xi32>
    %84 = arith.cmpi eq, %6, %83 : vector<4x16x1xi32>
    %c3_i32_22 = arith.constant 3 : i32
    %85 = vector.broadcast %c3_i32_22 : i32 to vector<4x16x1xi32>
    %86 = arith.cmpi eq, %7, %85 : vector<4x16x1xi32>
    %87 = arith.ori %84, %86 : vector<4x16x1xi1>
    %c3_i32_23 = arith.constant 3 : i32
    %88 = vector.broadcast %c3_i32_23 : i32 to vector<4x16x1xi32>
    %89 = arith.cmpi eq, %8, %88 : vector<4x16x1xi32>
    %90 = arith.ori %87, %89 : vector<4x16x1xi1>
    %c3_i32_24 = arith.constant 3 : i32
    %91 = vector.broadcast %c3_i32_24 : i32 to vector<4x16x1xi32>
    %92 = arith.cmpi eq, %9, %91 : vector<4x16x1xi32>
    %93 = arith.ori %90, %92 : vector<4x16x1xi1>
    %94 = arith.index_cast %3 : i32 to index
    %c3 = arith.constant 3 : index
    %c0_25 = arith.constant 0 : index
    %95 = vector.load %arg1[%94, %c3, %c0_25] : memref<4x16x128xf32, #tpu.memory_space<vmem>>, vector<4x1x128xf32>
    %96 = vector.shape_cast %93 : vector<4x16x1xi1> to vector<4x16x1xi1>
    %97 = vector.broadcast %96 : vector<4x16x1xi1> to vector<4x16x128xi1>
    %98 = vector.shape_cast %95 : vector<4x1x128xf32> to vector<4x1x128xf32>
    %99 = vector.broadcast %98 : vector<4x1x128xf32> to vector<4x16x128xf32>
    %100 = vector.broadcast %cst : f32 to vector<4x16x128xf32>
    %101 = arith.select %97, %99, %100 : vector<4x16x128xi1>, vector<4x16x128xf32>
    %102 = arith.maximumf %82, %101 : vector<4x16x128xf32>
    %c4_i32_26 = arith.constant 4 : i32
    %103 = vector.broadcast %c4_i32_26 : i32 to vector<4x16x1xi32>
    %104 = arith.cmpi eq, %6, %103 : vector<4x16x1xi32>
    %c4_i32_27 = arith.constant 4 : i32
    %105 = vector.broadcast %c4_i32_27 : i32 to vector<4x16x1xi32>
    %106 = arith.cmpi eq, %7, %105 : vector<4x16x1xi32>
    %107 = arith.ori %104, %106 : vector<4x16x1xi1>
    %c4_i32_28 = arith.constant 4 : i32
    %108 = vector.broadcast %c4_i32_28 : i32 to vector<4x16x1xi32>
    %109 = arith.cmpi eq, %8, %108 : vector<4x16x1xi32>
    %110 = arith.ori %107, %109 : vector<4x16x1xi1>
    %c4_i32_29 = arith.constant 4 : i32
    %111 = vector.broadcast %c4_i32_29 : i32 to vector<4x16x1xi32>
    %112 = arith.cmpi eq, %9, %111 : vector<4x16x1xi32>
    %113 = arith.ori %110, %112 : vector<4x16x1xi1>
    %114 = arith.index_cast %3 : i32 to index
    %c4 = arith.constant 4 : index
    %c0_30 = arith.constant 0 : index
    %115 = vector.load %arg1[%114, %c4, %c0_30] : memref<4x16x128xf32, #tpu.memory_space<vmem>>, vector<4x1x128xf32>
    %116 = vector.shape_cast %113 : vector<4x16x1xi1> to vector<4x16x1xi1>
    %117 = vector.broadcast %116 : vector<4x16x1xi1> to vector<4x16x128xi1>
    %118 = vector.shape_cast %115 : vector<4x1x128xf32> to vector<4x1x128xf32>
    %119 = vector.broadcast %118 : vector<4x1x128xf32> to vector<4x16x128xf32>
    %120 = vector.broadcast %cst : f32 to vector<4x16x128xf32>
    %121 = arith.select %117, %119, %120 : vector<4x16x128xi1>, vector<4x16x128xf32>
    %122 = arith.maximumf %102, %121 : vector<4x16x128xf32>
    %c5_i32 = arith.constant 5 : i32
    %123 = vector.broadcast %c5_i32 : i32 to vector<4x16x1xi32>
    %124 = arith.cmpi eq, %6, %123 : vector<4x16x1xi32>
    %c5_i32_31 = arith.constant 5 : i32
    %125 = vector.broadcast %c5_i32_31 : i32 to vector<4x16x1xi32>
    %126 = arith.cmpi eq, %7, %125 : vector<4x16x1xi32>
    %127 = arith.ori %124, %126 : vector<4x16x1xi1>
    %c5_i32_32 = arith.constant 5 : i32
    %128 = vector.broadcast %c5_i32_32 : i32 to vector<4x16x1xi32>
    %129 = arith.cmpi eq, %8, %128 : vector<4x16x1xi32>
    %130 = arith.ori %127, %129 : vector<4x16x1xi1>
    %c5_i32_33 = arith.constant 5 : i32
    %131 = vector.broadcast %c5_i32_33 : i32 to vector<4x16x1xi32>
    %132 = arith.cmpi eq, %9, %131 : vector<4x16x1xi32>
    %133 = arith.ori %130, %132 : vector<4x16x1xi1>
    %134 = arith.index_cast %3 : i32 to index
    %c5 = arith.constant 5 : index
    %c0_34 = arith.constant 0 : index
    %135 = vector.load %arg1[%134, %c5, %c0_34] : memref<4x16x128xf32, #tpu.memory_space<vmem>>, vector<4x1x128xf32>
    %136 = vector.shape_cast %133 : vector<4x16x1xi1> to vector<4x16x1xi1>
    %137 = vector.broadcast %136 : vector<4x16x1xi1> to vector<4x16x128xi1>
    %138 = vector.shape_cast %135 : vector<4x1x128xf32> to vector<4x1x128xf32>
    %139 = vector.broadcast %138 : vector<4x1x128xf32> to vector<4x16x128xf32>
    %140 = vector.broadcast %cst : f32 to vector<4x16x128xf32>
    %141 = arith.select %137, %139, %140 : vector<4x16x128xi1>, vector<4x16x128xf32>
    %142 = arith.maximumf %122, %141 : vector<4x16x128xf32>
    %c6_i32 = arith.constant 6 : i32
    %143 = vector.broadcast %c6_i32 : i32 to vector<4x16x1xi32>
    %144 = arith.cmpi eq, %6, %143 : vector<4x16x1xi32>
    %c6_i32_35 = arith.constant 6 : i32
    %145 = vector.broadcast %c6_i32_35 : i32 to vector<4x16x1xi32>
    %146 = arith.cmpi eq, %7, %145 : vector<4x16x1xi32>
    %147 = arith.ori %144, %146 : vector<4x16x1xi1>
    %c6_i32_36 = arith.constant 6 : i32
    %148 = vector.broadcast %c6_i32_36 : i32 to vector<4x16x1xi32>
    %149 = arith.cmpi eq, %8, %148 : vector<4x16x1xi32>
    %150 = arith.ori %147, %149 : vector<4x16x1xi1>
    %c6_i32_37 = arith.constant 6 : i32
    %151 = vector.broadcast %c6_i32_37 : i32 to vector<4x16x1xi32>
    %152 = arith.cmpi eq, %9, %151 : vector<4x16x1xi32>
    %153 = arith.ori %150, %152 : vector<4x16x1xi1>
    %154 = arith.index_cast %3 : i32 to index
    %c6 = arith.constant 6 : index
    %c0_38 = arith.constant 0 : index
    %155 = vector.load %arg1[%154, %c6, %c0_38] : memref<4x16x128xf32, #tpu.memory_space<vmem>>, vector<4x1x128xf32>
    %156 = vector.shape_cast %153 : vector<4x16x1xi1> to vector<4x16x1xi1>
    %157 = vector.broadcast %156 : vector<4x16x1xi1> to vector<4x16x128xi1>
    %158 = vector.shape_cast %155 : vector<4x1x128xf32> to vector<4x1x128xf32>
    %159 = vector.broadcast %158 : vector<4x1x128xf32> to vector<4x16x128xf32>
    %160 = vector.broadcast %cst : f32 to vector<4x16x128xf32>
    %161 = arith.select %157, %159, %160 : vector<4x16x128xi1>, vector<4x16x128xf32>
    %162 = arith.maximumf %142, %161 : vector<4x16x128xf32>
    %c7_i32 = arith.constant 7 : i32
    %163 = vector.broadcast %c7_i32 : i32 to vector<4x16x1xi32>
    %164 = arith.cmpi eq, %6, %163 : vector<4x16x1xi32>
    %c7_i32_39 = arith.constant 7 : i32
    %165 = vector.broadcast %c7_i32_39 : i32 to vector<4x16x1xi32>
    %166 = arith.cmpi eq, %7, %165 : vector<4x16x1xi32>
    %167 = arith.ori %164, %166 : vector<4x16x1xi1>
    %c7_i32_40 = arith.constant 7 : i32
    %168 = vector.broadcast %c7_i32_40 : i32 to vector<4x16x1xi32>
    %169 = arith.cmpi eq, %8, %168 : vector<4x16x1xi32>
    %170 = arith.ori %167, %169 : vector<4x16x1xi1>
    %c7_i32_41 = arith.constant 7 : i32
    %171 = vector.broadcast %c7_i32_41 : i32 to vector<4x16x1xi32>
    %172 = arith.cmpi eq, %9, %171 : vector<4x16x1xi32>
    %173 = arith.ori %170, %172 : vector<4x16x1xi1>
    %174 = arith.index_cast %3 : i32 to index
    %c7 = arith.constant 7 : index
    %c0_42 = arith.constant 0 : index
    %175 = vector.load %arg1[%174, %c7, %c0_42] : memref<4x16x128xf32, #tpu.memory_space<vmem>>, vector<4x1x128xf32>
    %176 = vector.shape_cast %173 : vector<4x16x1xi1> to vector<4x16x1xi1>
    %177 = vector.broadcast %176 : vector<4x16x1xi1> to vector<4x16x128xi1>
    %178 = vector.shape_cast %175 : vector<4x1x128xf32> to vector<4x1x128xf32>
    %179 = vector.broadcast %178 : vector<4x1x128xf32> to vector<4x16x128xf32>
    %180 = vector.broadcast %cst : f32 to vector<4x16x128xf32>
    %181 = arith.select %177, %179, %180 : vector<4x16x128xi1>, vector<4x16x128xf32>
    %182 = arith.maximumf %162, %181 : vector<4x16x128xf32>
    %c8_i32 = arith.constant 8 : i32
    %183 = vector.broadcast %c8_i32 : i32 to vector<4x16x1xi32>
    %184 = arith.cmpi eq, %6, %183 : vector<4x16x1xi32>
    %c8_i32_43 = arith.constant 8 : i32
    %185 = vector.broadcast %c8_i32_43 : i32 to vector<4x16x1xi32>
    %186 = arith.cmpi eq, %7, %185 : vector<4x16x1xi32>
    %187 = arith.ori %184, %186 : vector<4x16x1xi1>
    %c8_i32_44 = arith.constant 8 : i32
    %188 = vector.broadcast %c8_i32_44 : i32 to vector<4x16x1xi32>
    %189 = arith.cmpi eq, %8, %188 : vector<4x16x1xi32>
    %190 = arith.ori %187, %189 : vector<4x16x1xi1>
    %c8_i32_45 = arith.constant 8 : i32
    %191 = vector.broadcast %c8_i32_45 : i32 to vector<4x16x1xi32>
    %192 = arith.cmpi eq, %9, %191 : vector<4x16x1xi32>
    %193 = arith.ori %190, %192 : vector<4x16x1xi1>
    %194 = arith.index_cast %3 : i32 to index
    %c8 = arith.constant 8 : index
    %c0_46 = arith.constant 0 : index
    %195 = vector.load %arg1[%194, %c8, %c0_46] : memref<4x16x128xf32, #tpu.memory_space<vmem>>, vector<4x1x128xf32>
    %196 = vector.shape_cast %193 : vector<4x16x1xi1> to vector<4x16x1xi1>
    %197 = vector.broadcast %196 : vector<4x16x1xi1> to vector<4x16x128xi1>
    %198 = vector.shape_cast %195 : vector<4x1x128xf32> to vector<4x1x128xf32>
    %199 = vector.broadcast %198 : vector<4x1x128xf32> to vector<4x16x128xf32>
    %200 = vector.broadcast %cst : f32 to vector<4x16x128xf32>
    %201 = arith.select %197, %199, %200 : vector<4x16x128xi1>, vector<4x16x128xf32>
    %202 = arith.maximumf %182, %201 : vector<4x16x128xf32>
    %c9_i32 = arith.constant 9 : i32
    %203 = vector.broadcast %c9_i32 : i32 to vector<4x16x1xi32>
    %204 = arith.cmpi eq, %6, %203 : vector<4x16x1xi32>
    %c9_i32_47 = arith.constant 9 : i32
    %205 = vector.broadcast %c9_i32_47 : i32 to vector<4x16x1xi32>
    %206 = arith.cmpi eq, %7, %205 : vector<4x16x1xi32>
    %207 = arith.ori %204, %206 : vector<4x16x1xi1>
    %c9_i32_48 = arith.constant 9 : i32
    %208 = vector.broadcast %c9_i32_48 : i32 to vector<4x16x1xi32>
    %209 = arith.cmpi eq, %8, %208 : vector<4x16x1xi32>
    %210 = arith.ori %207, %209 : vector<4x16x1xi1>
    %c9_i32_49 = arith.constant 9 : i32
    %211 = vector.broadcast %c9_i32_49 : i32 to vector<4x16x1xi32>
    %212 = arith.cmpi eq, %9, %211 : vector<4x16x1xi32>
    %213 = arith.ori %210, %212 : vector<4x16x1xi1>
    %214 = arith.index_cast %3 : i32 to index
    %c9 = arith.constant 9 : index
    %c0_50 = arith.constant 0 : index
    %215 = vector.load %arg1[%214, %c9, %c0_50] : memref<4x16x128xf32, #tpu.memory_space<vmem>>, vector<4x1x128xf32>
    %216 = vector.shape_cast %213 : vector<4x16x1xi1> to vector<4x16x1xi1>
    %217 = vector.broadcast %216 : vector<4x16x1xi1> to vector<4x16x128xi1>
    %218 = vector.shape_cast %215 : vector<4x1x128xf32> to vector<4x1x128xf32>
    %219 = vector.broadcast %218 : vector<4x1x128xf32> to vector<4x16x128xf32>
    %220 = vector.broadcast %cst : f32 to vector<4x16x128xf32>
    %221 = arith.select %217, %219, %220 : vector<4x16x128xi1>, vector<4x16x128xf32>
    %222 = arith.maximumf %202, %221 : vector<4x16x128xf32>
    %c10_i32 = arith.constant 10 : i32
    %223 = vector.broadcast %c10_i32 : i32 to vector<4x16x1xi32>
    %224 = arith.cmpi eq, %6, %223 : vector<4x16x1xi32>
    %c10_i32_51 = arith.constant 10 : i32
    %225 = vector.broadcast %c10_i32_51 : i32 to vector<4x16x1xi32>
    %226 = arith.cmpi eq, %7, %225 : vector<4x16x1xi32>
    %227 = arith.ori %224, %226 : vector<4x16x1xi1>
    %c10_i32_52 = arith.constant 10 : i32
    %228 = vector.broadcast %c10_i32_52 : i32 to vector<4x16x1xi32>
    %229 = arith.cmpi eq, %8, %228 : vector<4x16x1xi32>
    %230 = arith.ori %227, %229 : vector<4x16x1xi1>
    %c10_i32_53 = arith.constant 10 : i32
    %231 = vector.broadcast %c10_i32_53 : i32 to vector<4x16x1xi32>
    %232 = arith.cmpi eq, %9, %231 : vector<4x16x1xi32>
    %233 = arith.ori %230, %232 : vector<4x16x1xi1>
    %234 = arith.index_cast %3 : i32 to index
    %c10 = arith.constant 10 : index
    %c0_54 = arith.constant 0 : index
    %235 = vector.load %arg1[%234, %c10, %c0_54] : memref<4x16x128xf32, #tpu.memory_space<vmem>>, vector<4x1x128xf32>
    %236 = vector.shape_cast %233 : vector<4x16x1xi1> to vector<4x16x1xi1>
    %237 = vector.broadcast %236 : vector<4x16x1xi1> to vector<4x16x128xi1>
    %238 = vector.shape_cast %235 : vector<4x1x128xf32> to vector<4x1x128xf32>
    %239 = vector.broadcast %238 : vector<4x1x128xf32> to vector<4x16x128xf32>
    %240 = vector.broadcast %cst : f32 to vector<4x16x128xf32>
    %241 = arith.select %237, %239, %240 : vector<4x16x128xi1>, vector<4x16x128xf32>
    %242 = arith.maximumf %222, %241 : vector<4x16x128xf32>
    %c11_i32 = arith.constant 11 : i32
    %243 = vector.broadcast %c11_i32 : i32 to vector<4x16x1xi32>
    %244 = arith.cmpi eq, %6, %243 : vector<4x16x1xi32>
    %c11_i32_55 = arith.constant 11 : i32
    %245 = vector.broadcast %c11_i32_55 : i32 to vector<4x16x1xi32>
    %246 = arith.cmpi eq, %7, %245 : vector<4x16x1xi32>
    %247 = arith.ori %244, %246 : vector<4x16x1xi1>
    %c11_i32_56 = arith.constant 11 : i32
    %248 = vector.broadcast %c11_i32_56 : i32 to vector<4x16x1xi32>
    %249 = arith.cmpi eq, %8, %248 : vector<4x16x1xi32>
    %250 = arith.ori %247, %249 : vector<4x16x1xi1>
    %c11_i32_57 = arith.constant 11 : i32
    %251 = vector.broadcast %c11_i32_57 : i32 to vector<4x16x1xi32>
    %252 = arith.cmpi eq, %9, %251 : vector<4x16x1xi32>
    %253 = arith.ori %250, %252 : vector<4x16x1xi1>
    %254 = arith.index_cast %3 : i32 to index
    %c11 = arith.constant 11 : index
    %c0_58 = arith.constant 0 : index
    %255 = vector.load %arg1[%254, %c11, %c0_58] : memref<4x16x128xf32, #tpu.memory_space<vmem>>, vector<4x1x128xf32>
    %256 = vector.shape_cast %253 : vector<4x16x1xi1> to vector<4x16x1xi1>
    %257 = vector.broadcast %256 : vector<4x16x1xi1> to vector<4x16x128xi1>
    %258 = vector.shape_cast %255 : vector<4x1x128xf32> to vector<4x1x128xf32>
    %259 = vector.broadcast %258 : vector<4x1x128xf32> to vector<4x16x128xf32>
    %260 = vector.broadcast %cst : f32 to vector<4x16x128xf32>
    %261 = arith.select %257, %259, %260 : vector<4x16x128xi1>, vector<4x16x128xf32>
    %262 = arith.maximumf %242, %261 : vector<4x16x128xf32>
    %c12_i32 = arith.constant 12 : i32
    %263 = vector.broadcast %c12_i32 : i32 to vector<4x16x1xi32>
    %264 = arith.cmpi eq, %6, %263 : vector<4x16x1xi32>
    %c12_i32_59 = arith.constant 12 : i32
    %265 = vector.broadcast %c12_i32_59 : i32 to vector<4x16x1xi32>
    %266 = arith.cmpi eq, %7, %265 : vector<4x16x1xi32>
    %267 = arith.ori %264, %266 : vector<4x16x1xi1>
    %c12_i32_60 = arith.constant 12 : i32
    %268 = vector.broadcast %c12_i32_60 : i32 to vector<4x16x1xi32>
    %269 = arith.cmpi eq, %8, %268 : vector<4x16x1xi32>
    %270 = arith.ori %267, %269 : vector<4x16x1xi1>
    %c12_i32_61 = arith.constant 12 : i32
    %271 = vector.broadcast %c12_i32_61 : i32 to vector<4x16x1xi32>
    %272 = arith.cmpi eq, %9, %271 : vector<4x16x1xi32>
    %273 = arith.ori %270, %272 : vector<4x16x1xi1>
    %274 = arith.index_cast %3 : i32 to index
    %c12 = arith.constant 12 : index
    %c0_62 = arith.constant 0 : index
    %275 = vector.load %arg1[%274, %c12, %c0_62] : memref<4x16x128xf32, #tpu.memory_space<vmem>>, vector<4x1x128xf32>
    %276 = vector.shape_cast %273 : vector<4x16x1xi1> to vector<4x16x1xi1>
    %277 = vector.broadcast %276 : vector<4x16x1xi1> to vector<4x16x128xi1>
    %278 = vector.shape_cast %275 : vector<4x1x128xf32> to vector<4x1x128xf32>
    %279 = vector.broadcast %278 : vector<4x1x128xf32> to vector<4x16x128xf32>
    %280 = vector.broadcast %cst : f32 to vector<4x16x128xf32>
    %281 = arith.select %277, %279, %280 : vector<4x16x128xi1>, vector<4x16x128xf32>
    %282 = arith.maximumf %262, %281 : vector<4x16x128xf32>
    %c13_i32 = arith.constant 13 : i32
    %283 = vector.broadcast %c13_i32 : i32 to vector<4x16x1xi32>
    %284 = arith.cmpi eq, %6, %283 : vector<4x16x1xi32>
    %c13_i32_63 = arith.constant 13 : i32
    %285 = vector.broadcast %c13_i32_63 : i32 to vector<4x16x1xi32>
    %286 = arith.cmpi eq, %7, %285 : vector<4x16x1xi32>
    %287 = arith.ori %284, %286 : vector<4x16x1xi1>
    %c13_i32_64 = arith.constant 13 : i32
    %288 = vector.broadcast %c13_i32_64 : i32 to vector<4x16x1xi32>
    %289 = arith.cmpi eq, %8, %288 : vector<4x16x1xi32>
    %290 = arith.ori %287, %289 : vector<4x16x1xi1>
    %c13_i32_65 = arith.constant 13 : i32
    %291 = vector.broadcast %c13_i32_65 : i32 to vector<4x16x1xi32>
    %292 = arith.cmpi eq, %9, %291 : vector<4x16x1xi32>
    %293 = arith.ori %290, %292 : vector<4x16x1xi1>
    %294 = arith.index_cast %3 : i32 to index
    %c13 = arith.constant 13 : index
    %c0_66 = arith.constant 0 : index
    %295 = vector.load %arg1[%294, %c13, %c0_66] : memref<4x16x128xf32, #tpu.memory_space<vmem>>, vector<4x1x128xf32>
    %296 = vector.shape_cast %293 : vector<4x16x1xi1> to vector<4x16x1xi1>
    %297 = vector.broadcast %296 : vector<4x16x1xi1> to vector<4x16x128xi1>
    %298 = vector.shape_cast %295 : vector<4x1x128xf32> to vector<4x1x128xf32>
    %299 = vector.broadcast %298 : vector<4x1x128xf32> to vector<4x16x128xf32>
    %300 = vector.broadcast %cst : f32 to vector<4x16x128xf32>
    %301 = arith.select %297, %299, %300 : vector<4x16x128xi1>, vector<4x16x128xf32>
    %302 = arith.maximumf %282, %301 : vector<4x16x128xf32>
    %c14_i32 = arith.constant 14 : i32
    %303 = vector.broadcast %c14_i32 : i32 to vector<4x16x1xi32>
    %304 = arith.cmpi eq, %6, %303 : vector<4x16x1xi32>
    %c14_i32_67 = arith.constant 14 : i32
    %305 = vector.broadcast %c14_i32_67 : i32 to vector<4x16x1xi32>
    %306 = arith.cmpi eq, %7, %305 : vector<4x16x1xi32>
    %307 = arith.ori %304, %306 : vector<4x16x1xi1>
    %c14_i32_68 = arith.constant 14 : i32
    %308 = vector.broadcast %c14_i32_68 : i32 to vector<4x16x1xi32>
    %309 = arith.cmpi eq, %8, %308 : vector<4x16x1xi32>
    %310 = arith.ori %307, %309 : vector<4x16x1xi1>
    %c14_i32_69 = arith.constant 14 : i32
    %311 = vector.broadcast %c14_i32_69 : i32 to vector<4x16x1xi32>
    %312 = arith.cmpi eq, %9, %311 : vector<4x16x1xi32>
    %313 = arith.ori %310, %312 : vector<4x16x1xi1>
    %314 = arith.index_cast %3 : i32 to index
    %c14 = arith.constant 14 : index
    %c0_70 = arith.constant 0 : index
    %315 = vector.load %arg1[%314, %c14, %c0_70] : memref<4x16x128xf32, #tpu.memory_space<vmem>>, vector<4x1x128xf32>
    %316 = vector.shape_cast %313 : vector<4x16x1xi1> to vector<4x16x1xi1>
    %317 = vector.broadcast %316 : vector<4x16x1xi1> to vector<4x16x128xi1>
    %318 = vector.shape_cast %315 : vector<4x1x128xf32> to vector<4x1x128xf32>
    %319 = vector.broadcast %318 : vector<4x1x128xf32> to vector<4x16x128xf32>
    %320 = vector.broadcast %cst : f32 to vector<4x16x128xf32>
    %321 = arith.select %317, %319, %320 : vector<4x16x128xi1>, vector<4x16x128xf32>
    %322 = arith.maximumf %302, %321 : vector<4x16x128xf32>
    %c15_i32 = arith.constant 15 : i32
    %323 = vector.broadcast %c15_i32 : i32 to vector<4x16x1xi32>
    %324 = arith.cmpi eq, %6, %323 : vector<4x16x1xi32>
    %c15_i32_71 = arith.constant 15 : i32
    %325 = vector.broadcast %c15_i32_71 : i32 to vector<4x16x1xi32>
    %326 = arith.cmpi eq, %7, %325 : vector<4x16x1xi32>
    %327 = arith.ori %324, %326 : vector<4x16x1xi1>
    %c15_i32_72 = arith.constant 15 : i32
    %328 = vector.broadcast %c15_i32_72 : i32 to vector<4x16x1xi32>
    %329 = arith.cmpi eq, %8, %328 : vector<4x16x1xi32>
    %330 = arith.ori %327, %329 : vector<4x16x1xi1>
    %c15_i32_73 = arith.constant 15 : i32
    %331 = vector.broadcast %c15_i32_73 : i32 to vector<4x16x1xi32>
    %332 = arith.cmpi eq, %9, %331 : vector<4x16x1xi32>
    %333 = arith.ori %330, %332 : vector<4x16x1xi1>
    %334 = arith.index_cast %3 : i32 to index
    %c15 = arith.constant 15 : index
    %c0_74 = arith.constant 0 : index
    %335 = vector.load %arg1[%334, %c15, %c0_74] : memref<4x16x128xf32, #tpu.memory_space<vmem>>, vector<4x1x128xf32>
    %336 = vector.shape_cast %333 : vector<4x16x1xi1> to vector<4x16x1xi1>
    %337 = vector.broadcast %336 : vector<4x16x1xi1> to vector<4x16x128xi1>
    %338 = vector.shape_cast %335 : vector<4x1x128xf32> to vector<4x1x128xf32>
    %339 = vector.broadcast %338 : vector<4x1x128xf32> to vector<4x16x128xf32>
    %340 = vector.broadcast %cst : f32 to vector<4x16x128xf32>
    %341 = arith.select %337, %339, %340 : vector<4x16x128xi1>, vector<4x16x128xf32>
    %342 = arith.maximumf %322, %341 : vector<4x16x128xf32>
    %cst_75 = arith.constant 0.000000e+00 : f32
    %343 = vector.shape_cast %20 : vector<4x16x1xi1> to vector<4x16x1xi1>
    %344 = vector.broadcast %343 : vector<4x16x1xi1> to vector<4x16x128xi1>
    %345 = vector.broadcast %cst_75 : f32 to vector<4x16x128xf32>
    %346 = arith.select %344, %342, %345 : vector<4x16x128xi1>, vector<4x16x128xf32>
    %347 = arith.index_cast %3 : i32 to index
    %c0_76 = arith.constant 0 : index
    %c0_77 = arith.constant 0 : index
    %348 = vector.load %arg3[%347, %c0_76, %c0_77] : memref<4x16x128xf32, #tpu.memory_space<vmem>>, vector<4x16x128xf32>
    tpu.vector_store %arg3[%347, %c0_76, %c0_77], %346 {strides = array<i32>} : memref<4x16x128xf32, #tpu.memory_space<vmem>>, vector<4x16x128xf32>,
    %c1_i32_78 = arith.constant 1 : i32
    return
  }
  func.func @transform_0(%arg0: i32) -> (i32, i32, i32) {
    %c0_i32 = arith.constant 0 : i32
    %c0_i32_0 = arith.constant 0 : i32
    %c0_i32_1 = arith.constant 0 : i32
    return %arg0, %c0_i32, %c0_i32_0 : i32, i32, i32
  }
  func.func @transform_1(%arg0: i32) -> (i32, i32, i32) {
    %c0_i32 = arith.constant 0 : i32
    %c0_i32_0 = arith.constant 0 : i32
    %c0_i32_1 = arith.constant 0 : i32
    return %arg0, %c0_i32, %c0_i32_0 : i32, i32, i32
  }
  func.func @transform_2(%arg0: i32) -> (i32, i32, i32) {
    %c0_i32 = arith.constant 0 : i32
    %c0_i32_0 = arith.constant 0 : i32
    %c0_i32_1 = arith.constant 0 : i32
    return %arg0, %c0_i32, %c0_i32_0 : i32, i32, i32
  }
}

</mosaic_0001>

<bundles_post_ra>
// kernel: tpu_custom_call.1
= control target key start
LH: loop header
LB: loop body
LE: loop exit
PB: predicated region body
PF: predicated region fallthrough
CT: control target
= control target key end

     0   :  { %7 = vsyncpa [#allocation3], 0  ;;  %s6666_s0 = inlined_call_operand.vmem [shape: f32[8,16,128], index: 0, kind: input, shape index: {}]   ;;  %s6667_s1 = inlined_call_operand.vmem [shape: s32[8,16,4], index: 1, kind: input, shape index: {}]   ;;  %s6668_s2 = inlined_call_operand.hbm [shape: f32[8,16,128], index: 2, kind: output, shape index: {}]  }
   0x1   :  { %9 = vsyncpa [#allocation3 + $0x1], 0  ;;  %s3708_s9 = smov 0   ;;  %s3710_s10 = smov 0  }
   0x2   :  { %s3712_s11 = smov 0   ;;  %s3714_s12 = smov 0  }
   0x3 LB: > { %s3729_s13 = sadd.s32 4294967295, %s3684_s12   ;;  %s3458_s14 = sadd.s32 4294967294, %s3684_s12   ;;  %s3684_s12 = sphi %s3714_s12, %s7315_s12   ;;  %s3680_s11 = sphi %s3712_s11, %s7314_s11   ;;  %s3676_s10 = sphi %s3710_s10, %s7313_s10   ;;  %s3672_s9 = sphi %s3708_s9, %s7312_s9  }
   0x4   : > { %s3733_s15 = sadd.s32 1, %s3684_s12   ;;  %s74_s16 = sadd.s32 1, %s3680_s11 }
   0x5   : > { %s71_s17 = ssub.s32 %s3684_s12, %s3733_s15  ;;  %p84_p0 = scmp.ne.s32.totalorder %s3680_s11, %s3676_s10 }
   0x6   : > { %p72_p1 = scmp.eq.s32.totalorder %s71_s17, 0  ;;  %p85_p2 = scmp.eq.s32.totalorder %s3729_s13, 1 }
   0x7   : > { %p90_p3 = scmp.ne.s32.totalorder %s3676_s10, %s3672_s9  ;;  %p91_p4 = scmp.eq.s32.totalorder %s3458_s14, 1 }
   0x8   : > { %s3744_s18 = scalar_select %p72_p1, %s3680_s11, %s74_s16  }
   0x9   : > { %p3746_p5 = por %p85_p2, %p84_p0  ;;  %p3750_p6 = por %p91_p4, %p90_p3 }
   0xa   : > { %p3461_p7 = scmp.ge.s32.totalorder %s3684_s12, 1  ;;  %p129_p8 = scmp.lt.s32.totalorder %s3684_s12, 3 }
   0xc   : > { %p130_p9 = pnand %p3461_p7, %p129_p8 }
   0xe   : > { %133 = sbr.rel (%p130_p9) target bundleno = 3066 (0xbfa), region = 28 }
  0x15   : > { %s3463_s21 = sshll.u32 %s3729_s13, 2  ;;  %v6687_v0 = vmov 0   ;;  %s3687_s26 = smov 127  }
  0x16   : > { %p159_p10 = scmp.lt.s32.totalorder %s3463_s21, 7  ;;  %3589 = vset.pattern.permute.xlu1 %v6687_v0  ;;  %3588 = vset.pattern.permute.xlu0 %v6687_v0  ;;  %s3688_s27 = smov 126  }
  0x17   : > { %s3689_s28 = smov 125   ;;  %s155_s4 = sand.u32 1, %s3676_s10  }
  0x18   : > { %s7317_s21 = smov (!%p159_p10, %s3463_s21), 7  ;;  %s3462_s5 = sshll.u32 %s155_s4, 6 }
  0x19   : > { %s3539_s22 = sshll.u32 %s7317_s21, 4  ;;  %s157_s6 = scalar_lea.vmem [#allocation2], %s3462_s5 }
  0x1a   : > { %s3767_s25 = scalar_lea.vmem %s6667_s1, %s3539_s22  ;;  %s5942_s3 = scalar_lea.vmem %s6666_s0, %s3539_s22 }
  0x1b   : > { %v3770_v1 = vld [vmem:[%s3767_s25 + $0x10] sm:$0xff]  ;;  %v3773_v2 = vld [vmem:[%s3767_s25] sm:$0xff]  ;;  %v3776_v3 = vld [vmem:[%s3767_s25 + $0x18] sm:$0xff]  ;;  %s3542_s7 = sshll.u32 %s3729_s13, 10  ;;  %s3384_s8 = sshll.u32 %s157_s6, 4  ;;  %s6621_s8 = int_to_ptr.vmem [resolvable:$true] %s3384_s8 }
  0x1c   : > { %6763 = vst [vmem:[#allocation5_spill] sm:$0xff] %v3770_v1  ;;  %6764 = vst [vmem:[#allocation6_spill] sm:$0xff] %v3773_v2  ;;  %vm6673_vm0 = vcmp.ne.s32.totalorder %v3770_v1, 4294967295  ;;  %vm6675_vm1 = vcmp.ne.s32.totalorder %v3773_v2, 4294967295  ;;  %vm6674_vm2 = vcmp.ne.s32.totalorder %v3776_v3, 4294967295  ;;  %v3782_v4 = vld [vmem:[%s3767_s25 + $0x8] sm:$0xff]  ;;  %s6619_s17 = scalar_lea.hbm %s6668_s2, %s3542_s7 }
  0x1d   : > { %6765 = vst [vmem:[#allocation7_spill] sm:$0xff] %v3776_v3  ;;  %6766 = vst [vmem:[#allocation8_spill] sm:$0xff] %v3782_v4  ;;  %v193_v5 = vsel %vm6673_vm0, 1, %v6687_v0  ;;  %v191_v6 = vsel %vm6675_vm1, 1, %v6687_v0  ;;  %vm6676_vm3 = vcmp.ne.s32.totalorder %v3782_v4, 4294967295  ;;  %v3792_v7 = vld [vmem:[%s3767_s25 + $0x28] sm:$0xff] }
  0x1e   : > { %6767 = vst [vmem:[#allocation9_spill] sm:$0xff] %v3792_v7  ;;  %v3795_v8 = vld [vmem:[%s3767_s25 + $0x20] sm:$0xff]  ;;  %203 = vrot.lane.b32.xlu1 %v193_v5, %s3687_s26  ;;  %199 = vrot.lane.b32.xlu0 %v191_v6, %s3687_s26  ;;  %v194_v9 = vsel %vm6674_vm2, 1, %v6687_v0  ;;  %v192_v10 = vsel %vm6676_vm3, 1, %v6687_v0  ;;  %vm6672_vm4 = vcmp.ne.s32.totalorder %v3792_v7, 4294967295  ;;  %v3808_v11 = vld [vmem:[%s3767_s25 + $0x38] sm:$0xff] }
  0x1f   : > { %6768 = vst [vmem:[#allocation10_spill] sm:$0xff] %v3795_v8  ;;  %vm6671_vm5 = vcmp.ne.s32.totalorder %v3795_v8, 4294967295  ;;  %6769 = vst [vmem:[#allocation11_spill] sm:$0xff] %v3808_v11  ;;  %v3811_v12 = vld [vmem:[%s3767_s25 + $0x30] sm:$0xff]  ;;  %v196_v13 = vsel %vm6672_vm4, 1, %v6687_v0  ;;  %vm6670_vm6 = vcmp.ne.s32.totalorder %v3808_v11, 4294967295 }
  0x20   : > { %6770 = vst [vmem:[#allocation12_spill] sm:$0xff] %v3811_v12  ;;  %v195_v14 = vsel %vm6671_vm5, 1, %v6687_v0  ;;  %vm6669_vm7 = vcmp.ne.s32.totalorder %v3811_v12, 4294967295  ;;  %v198_v15 = vsel %vm6670_vm6, 1, %v6687_v0  ;;  %vm305_vm8 = vcmp.eq.s32.totalorder %v3782_v4, 0  ;;  %s6625_s13 = scalar_lea.sflag [#allocation3], %s155_s4 }
  0x21   : > { %v197_v16 = vsel %vm6669_vm7, 1, %v6687_v0  ;;  %vm304_vm9 = vcmp.eq.s32.totalorder %v3773_v2, 0  ;;  %v313_v17 = vsel %vm305_vm8, 1, %v6687_v0  ;;  %vm307_vm10 = vcmp.eq.s32.totalorder %v3776_v3, 0  ;;  %s3622_s21 = scalar_lea.vmem %s6621_s8, 1024  ;;  %s3690_s22 = smov [#allocation2]  }
  0x22   : > { %205 = vrot.lane.b32.xlu1 %v194_v9, %s3687_s26  ;;  %201 = vrot.lane.b32.xlu0 %v192_v10, %s3687_s26  ;;  %v312_v18 = vsel %vm304_vm9, 1, %v6687_v0  ;;  %vm306_vm11 = vcmp.eq.s32.totalorder %v3770_v1, 0  ;;  %v315_v19 = vsel %vm307_vm10, 1, %v6687_v0  ;;  %vm309_vm12 = vcmp.eq.s32.totalorder %v3792_v7, 0  ;;  %p3623_p11 = scmp.ne.s32.totalorder %s6621_s8, %s3622_s21  ;;  %s3626_s23 = sshll.u32 %s3690_s22, 4  ;;  %s3627_s23 = int_to_ptr.vmem [resolvable:$false] %s3626_s23 }
  0x23   : > { %v314_v20 = vsel %vm306_vm11, 1, %v6687_v0  ;;  %vm308_vm13 = vcmp.eq.s32.totalorder %v3795_v8, 0  ;;  %v317_v21 = vsel %vm309_vm12, 1, %v6687_v0  ;;  %vm6686_vm14 = vcmp.eq.s32.totalorder %v3808_v11, 0  ;;  %s3628_s24 = scalar_lea.vmem %s3627_s23, 2048  ;;  %p3629_p0 = scmp.lt.s32.totalorder %s6621_s8, %s3627_s23 }
  0x24   : > { %v316_v22 = vsel %vm308_vm13, 1, %v6687_v0  ;;  %vm6685_vm15 = vcmp.eq.s32.totalorder %v3811_v12, 0  ;;  %v319_v23 = vsel %vm6686_vm14, 1, %v6687_v0  ;;  %vm6684_vm7 = vcmp.eq.s32.totalorder %v3773_v2, 1  ;;  %p3624_p12 = pnand %p3623_p11, %p3746_p5  ;;  %p3630_p1 = scmp.lt.s32.totalorder %s3628_s24, %s3622_s21 }
  0x25   : > { %v318_v24 = vsel %vm6685_vm15, 1, %v6687_v0  ;;  %vm6683_vm6 = vcmp.eq.s32.totalorder %v3782_v4, 1  ;;  %v3910_v25 = vsel %vm6684_vm7, 1, %v6687_v0  ;;  %vm6682_vm5 = vcmp.eq.s32.totalorder %v3770_v1, 1 }
  0x26   : > { %209 = vrot.lane.b32.xlu1 %v196_v13, %s3687_s26  ;;  %207 = vrot.lane.b32.xlu0 %v195_v14, %s3687_s26  ;;  %v3915_v26 = vsel %vm6683_vm6, 1, %v6687_v0  ;;  %vm6681_vm4 = vcmp.eq.s32.totalorder %v3776_v3, 1  ;;  %v3926_v27 = vsel %vm6682_vm5, 1, %v6687_v0  ;;  %vm6680_vm0 = vcmp.eq.s32.totalorder %v3795_v8, 1  ;;  %p3625_p13 = pneg %p3624_p12  ;;  %p3631_p2 = por %p3630_p1, %p3629_p0 }
  0x27   : > { %v3931_v28 = vsel %vm6681_vm4, 1, %v6687_v0  ;;  %vm6678_vm2 = vcmp.eq.s32.totalorder %v3792_v7, 1  ;;  %v3942_v29 = vsel %vm6680_vm0, 1, %v6687_v0  ;;  %vm6679_vm1 = vcmp.eq.s32.totalorder %v3811_v12, 1 }
  0x28   : > { %v3947_v30 = vsel %vm6678_vm2, 1, %v6687_v0  ;;  %vm6677_vm3 = vcmp.eq.s32.totalorder %v3808_v11, 1  ;;  %v3958_v31 = vsel %vm6679_vm1, 1, %v6687_v0  ;;  %p3632_p3 = pnand %p3631_p2, %p3625_p13 }
  0x29   : > { %v3963_v32 = vsel %vm6677_vm3, 1, %v6687_v0 }
  0x2a   : > { %213 = vrot.lane.b32.xlu1 %v198_v15, %s3687_s26  ;;  %211 = vrot.lane.b32.xlu0 %v197_v16, %s3687_s26 }
  0x2e   : > { %233 = vrot.lane.b32.xlu1 %v192_v10, %s3688_s27  ;;  %231 = vrot.lane.b32.xlu0 %v191_v6, %s3688_s27 }
  0x32   : > { %237 = vrot.lane.b32.xlu1 %v194_v9, %s3688_s27  ;;  %235 = vrot.lane.b32.xlu0 %v193_v5, %s3688_s27 }
  0x36   : > { %241 = vrot.lane.b32.xlu1 %v196_v13, %s3688_s27  ;;  %239 = vrot.lane.b32.xlu0 %v195_v14, %s3688_s27 }
  0x3a   : > { %245 = vrot.lane.b32.xlu1 %v198_v15, %s3688_s27  ;;  %243 = vrot.lane.b32.xlu0 %v197_v16, %s3688_s27 }
  0x3e   : > { %265 = vrot.lane.b32.xlu1 %v192_v10, %s3689_s28  ;;  %263 = vrot.lane.b32.xlu0 %v191_v6, %s3689_s28 }
  0x42   : > { %269 = vrot.lane.b32.xlu1 %v194_v9, %s3689_s28  ;;  %267 = vrot.lane.b32.xlu0 %v193_v5, %s3689_s28 }
  0x46   : > { %273 = vrot.lane.b32.xlu1 %v196_v13, %s3689_s28  ;;  %271 = vrot.lane.b32.xlu0 %v195_v14, %s3689_s28 }
  0x4a   : > { %277 = vrot.lane.b32.xlu1 %v198_v15, %s3689_s28  ;;  %275 = vrot.lane.b32.xlu0 %v197_v16, %s3689_s28 }
  0x4e   : > { %322 = vrot.lane.b32.xlu1 %v313_v17, %s3687_s26  ;;  %320 = vrot.lane.b32.xlu0 %v312_v18, %s3687_s26 }
  0x52   : > { %326 = vrot.lane.b32.xlu1 %v315_v19, %s3687_s26  ;;  %324 = vrot.lane.b32.xlu0 %v314_v20, %s3687_s26 }
  0x56   : > { %330 = vrot.lane.b32.xlu1 %v317_v21, %s3687_s26  ;;  %328 = vrot.lane.b32.xlu0 %v316_v22, %s3687_s26 }
  0x5a   : > { %334 = vrot.lane.b32.xlu1 %v319_v23, %s3687_s26  ;;  %332 = vrot.lane.b32.xlu0 %v318_v24, %s3687_s26 }
  0x5e   : > { %354 = vrot.lane.b32.xlu1 %v313_v17, %s3688_s27  ;;  %352 = vrot.lane.b32.xlu0 %v312_v18, %s3688_s27 }
  0x62   : > { %358 = vrot.lane.b32.xlu1 %v315_v19, %s3688_s27  ;;  %356 = vrot.lane.b32.xlu0 %v314_v20, %s3688_s27 }
  0x66   : > { %362 = vrot.lane.b32.xlu1 %v317_v21, %s3688_s27  ;;  %360 = vrot.lane.b32.xlu0 %v316_v22, %s3688_s27 }
  0x6a   : > { %366 = vrot.lane.b32.xlu1 %v319_v23, %s3688_s27  ;;  %364 = vrot.lane.b32.xlu0 %v318_v24, %s3688_s27 }
  0x6e   : > { %386 = vrot.lane.b32.xlu1 %v313_v17, %s3689_s28  ;;  %384 = vrot.lane.b32.xlu0 %v312_v18, %s3689_s28 }
  0x72   : > { %390 = vrot.lane.b32.xlu1 %v315_v19, %s3689_s28  ;;  %388 = vrot.lane.b32.xlu0 %v314_v20, %s3689_s28  ;;  %v6797_v19 = vmov 0  ;;  %v6799_v20 = vmov 0 }
  0x76   : > { %394 = vrot.lane.b32.xlu1 %v317_v21, %s3689_s28  ;;  %392 = vrot.lane.b32.xlu0 %v316_v22, %s3689_s28  ;;  %v6801_v21 = vmov 0  ;;  %v6803_v22 = vmov 0 }
  0x7a   : > { %398 = vrot.lane.b32.xlu1 %v319_v23, %s3689_s28  ;;  %396 = vrot.lane.b32.xlu0 %v318_v24, %s3689_s28 }
  0x7e   : > { %508 = vrot.lane.b32.xlu1 %v3910_v25, %s3687_s26  ;;  %510 = vrot.lane.b32.xlu0 %v3915_v26, %s3687_s26 }
  0x82   : > { %512 = vrot.lane.b32.xlu1 %v3926_v27, %s3687_s26  ;;  %514 = vrot.lane.b32.xlu0 %v3931_v28, %s3687_s26 }
  0x86   : > { %516 = vrot.lane.b32.xlu1 %v3942_v29, %s3687_s26  ;;  %518 = vrot.lane.b32.xlu0 %v3947_v30, %s3687_s26 }
  0x8a   : > { %520 = vrot.lane.b32.xlu1 %v3958_v31, %s3687_s26  ;;  %522 = vrot.lane.b32.xlu0 %v3963_v32, %s3687_s26 }
  0x8e   : > { %540 = vrot.lane.b32.xlu1 %v3910_v25, %s3688_s27 }
  0x90   : > { %v3971_v33 = vpop.permute.xlu1 %203  ;;  %v3973_v34 = vpop.permute.xlu0 %199 }
  0x91   : > { %6771 = vst [vmem:[#allocation13_spill] sm:$0xff] %v3971_v33  ;;  %6772 = vst [vmem:[#allocation14_spill] sm:$0xff] %v3973_v34 }
  0x94   : > { %v3975_v35 = vpop.permute.xlu1 %205  ;;  %v3977_v36 = vpop.permute.xlu0 %201 }
  0x95   : > { %6773 = vst [vmem:[#allocation15_spill] sm:$0xff] %v3975_v35  ;;  %6774 = vst [vmem:[#allocation16_spill] sm:$0xff] %v3977_v36 }
  0x98   : > { %v3979_v37 = vpop.permute.xlu1 %209  ;;  %v3981_v38 = vpop.permute.xlu0 %207 }
  0x99   : > { %6775 = vst [vmem:[#allocation17_spill] sm:$0xff] %v3979_v37  ;;  %6776 = vst [vmem:[#allocation18_spill] sm:$0xff] %v3981_v38 }
  0x9c   : > { %v3983_v39 = vpop.permute.xlu1 %213  ;;  %v3985_v40 = vpop.permute.xlu0 %211 }
  0x9d   : > { %6777 = vst [vmem:[#allocation19_spill] sm:$0xff] %v3983_v39  ;;  %6778 = vst [vmem:[#allocation20_spill] sm:$0xff] %v3985_v40 }
  0xa0   : > { %v3987_v41 = vpop.permute.xlu1 %233  ;;  %v3989_v42 = vpop.permute.xlu0 %231 }
  0xa1   : > { %6779 = vst [vmem:[#allocation21_spill] sm:$0xff] %v3987_v41  ;;  %6780 = vst [vmem:[#allocation22_spill] sm:$0xff] %v3989_v42 }
  0xa4   : > { %v3991_v43 = vpop.permute.xlu1 %237  ;;  %v3993_v44 = vpop.permute.xlu0 %235 }
  0xa5   : > { %6781 = vst [vmem:[#allocation23_spill] sm:$0xff] %v3991_v43  ;;  %6782 = vst [vmem:[#allocation24_spill] sm:$0xff] %v3993_v44 }
  0xa8   : > { %v3995_v45 = vpop.permute.xlu1 %241  ;;  %v3997_v46 = vpop.permute.xlu0 %239 }
  0xa9   : > { %6783 = vst [vmem:[#allocation25_spill] sm:$0xff] %v3995_v45  ;;  %6784 = vst [vmem:[#allocation26_spill] sm:$0xff] %v3997_v46 }
  0xac   : > { %v3999_v47 = vpop.permute.xlu1 %245  ;;  %v4001_v48 = vpop.permute.xlu0 %243 }
  0xad   : > { %6785 = vst [vmem:[#allocation27_spill] sm:$0xff] %v3999_v47  ;;  %6786 = vst [vmem:[#allocation28_spill] sm:$0xff] %v4001_v48 }
  0xb0   : > { %v4003_v49 = vpop.permute.xlu1 %265  ;;  %v4005_v50 = vpop.permute.xlu0 %263 }
  0xb1   : > { %6787 = vst [vmem:[#allocation29_spill] sm:$0xff] %v4003_v49  ;;  %6788 = vst [vmem:[#allocation30_spill] sm:$0xff] %v4005_v50 }
  0xb4   : > { %v4007_v51 = vpop.permute.xlu1 %269  ;;  %v4009_v52 = vpop.permute.xlu0 %267 }
  0xb5   : > { %6789 = vst [vmem:[#allocation31_spill] sm:$0xff] %v4007_v51  ;;  %6790 = vst [vmem:[#allocation32_spill] sm:$0xff] %v4009_v52 }
  0xb8   : > { %v4011_v53 = vpop.permute.xlu1 %273  ;;  %v4013_v54 = vpop.permute.xlu0 %271 }
  0xb9   : > { %6791 = vst [vmem:[#allocation33_spill] sm:$0xff] %v4011_v53  ;;  %6792 = vst [vmem:[#allocation34_spill] sm:$0xff] %v4013_v54 }
  0xbc   : > { %v4015_v55 = vpop.permute.xlu1 %277  ;;  %v4017_v56 = vpop.permute.xlu0 %275 }
  0xbd   : > { %6793 = vst [vmem:[#allocation35_spill] sm:$0xff] %v4015_v55  ;;  %6794 = vst [vmem:[#allocation36_spill] sm:$0xff] %v4017_v56  ;;  %v6844_v56 = vmov 0 }
  0xc0   : > { %v323_v57 = vpop.permute.xlu1 %322  ;;  %v321_v58 = vpop.permute.xlu0 %320 }
  0xc1   : > { %vm337_vm3 = vcmp.ne.s32.totalorder %v323_v57, 0  ;;  %vm336_vm2 = vcmp.ne.s32.totalorder %v321_v58, 0  ;;  %v6806_v57 = vmov 0 }
  0xc2   : > { %vm345_vm0 = vmor %vm305_vm8, %vm337_vm3 }
  0xc3   : > { %vm4023_vm5 = vmor %vm304_vm9, %vm336_vm2 }
  0xc4   : > { %v327_v59 = vpop.permute.xlu1 %326  ;;  %v325_v60 = vpop.permute.xlu0 %324 }
  0xc5   : > { %vm339_vm1 = vcmp.ne.s32.totalorder %v327_v59, 0  ;;  %vm338_vm4 = vcmp.ne.s32.totalorder %v325_v60, 0  ;;  %v6809_v59 = vmov 0 }
  0xc6   : > { %vm4029_vm7 = vmor %vm307_vm10, %vm339_vm1 }
  0xc7   : > { %v6798_v19 = vsel %vm4029_vm7, 4294967295, %v6797_v19  ;;  %vm4035_vm3 = vmor %vm306_vm11, %vm338_vm4 }
  0xc8   : > { %v331_v61 = vpop.permute.xlu1 %330  ;;  %v329_v62 = vpop.permute.xlu0 %328  ;;  %v6800_v20 = vsel %vm4035_vm3, 4294967295, %v6799_v20 }
  0xc9   : > { %vm341_vm6 = vcmp.ne.s32.totalorder %v331_v61, 0  ;;  %vm340_vm15 = vcmp.ne.s32.totalorder %v329_v62, 0 }
  0xca   : > { %vm4041_vm8 = vmor %vm309_vm12, %vm341_vm6 }
  0xcb   : > { %v6802_v21 = vsel %vm4041_vm8, 4294967295, %v6801_v21  ;;  %vm4047_vm1 = vmor %vm308_vm13, %vm340_vm15  ;;  %vm6805_vm13 = vcmp.eq.s32.totalorder %v3808_v11, 0 }
  0xcc   : > { %v335_v63 = vpop.permute.xlu1 %334  ;;  %v333_v5 = vpop.permute.xlu0 %332  ;;  %v6804_v22 = vsel %vm4047_vm1, 4294967295, %v6803_v22 }
  0xcd   : > { %vm343_vm9 = vcmp.ne.s32.totalorder %v335_v63, 0  ;;  %vm342_vm4 = vcmp.ne.s32.totalorder %v333_v5, 0 }
  0xce   : > { %vm4055_vm15 = vmor %vm6805_vm13, %vm343_vm9 }
  0xcf   : > { %v6807_v57 = vsel %vm4055_vm15, 4294967295, %v6806_v57 }
  0xd0   : > { %v355_v6 = vpop.permute.xlu1 %354  ;;  %v353_v9 = vpop.permute.xlu0 %352 }
  0xd1   : > { %vm369_vm14 = vcmp.ne.s32.totalorder %v355_v6, 0  ;;  %vm368_vm2 = vcmp.ne.s32.totalorder %v353_v9, 0 }
  0xd2   : > { %vm377_vm10 = vmor %vm345_vm0, %vm369_vm14  ;;  %vm6808_vm14 = vcmp.eq.s32.totalorder %v3811_v12, 0 }
  0xd3   : > { %vm376_vm11 = vmor %vm4023_vm5, %vm368_vm2  ;;  %vm6811_vm5 = vnez %v6798_v19 }
  0xd4   : > { %v359_v10 = vpop.permute.xlu1 %358  ;;  %v357_v13 = vpop.permute.xlu0 %356  ;;  %vm4062_vm1 = vmor %vm6808_vm14, %vm342_vm4  ;;  %vm6813_vm14 = vnez %v6802_v21 }
  0xd5   : > { %vm371_vm3 = vcmp.ne.s32.totalorder %v359_v10, 0  ;;  %vm370_vm12 = vcmp.ne.s32.totalorder %v357_v13, 0  ;;  %v6810_v59 = vsel %vm4062_vm1, 4294967295, %v6809_v59 }
  0xd6   : > { %vm379_vm2 = vmor %vm6811_vm5, %vm371_vm3 }
  0xd8   : > { %v363_v14 = vpop.permute.xlu1 %362  ;;  %v361_v15 = vpop.permute.xlu0 %360 }
  0xdc   : > { %v367_v17 = vpop.permute.xlu1 %366  ;;  %v365_v18 = vpop.permute.xlu0 %364 }
  0xdd   : > { %vm374_vm15 = vcmp.ne.s32.totalorder %v365_v18, 0 }
  0xe0   : > { %v387_v23 = vpop.permute.xlu1 %386  ;;  %v385_v24 = vpop.permute.xlu0 %384 }
  0xe1   : > { %vm401_vm7 = vcmp.ne.s32.totalorder %v387_v23, 0  ;;  %vm400_vm6 = vcmp.ne.s32.totalorder %v385_v24, 0 }
  0xe2   : > { %vm409_vm8 = vmor %vm377_vm10, %vm401_vm7  ;;  %vm6812_vm7 = vnez %v6800_v20  ;;  %vm373_vm10 = vcmp.ne.s32.totalorder %v363_v14, 0 }
  0xe3   : > { %v421_v58 = vsel %vm409_vm8, 1, %v6687_v0  ;;  %vm408_vm0 = vmor %vm376_vm11, %vm400_vm6  ;;  %vm372_vm6 = vcmp.ne.s32.totalorder %v361_v15, 0 }
  0xe4   : > { %v391_v60 = vpop.permute.xlu1 %390  ;;  %432 = vperm.xlu1 %3589, %v421_v58   ;;  %v420_v61 = vsel %vm408_vm0, 1, %v6687_v0  ;;  %v389_v62 = vpop.permute.xlu0 %388  ;;  %vm378_vm9 = vmor %vm6812_vm7, %vm370_vm12  ;;  %vm6814_vm0 = vnez %v6804_v22  ;;  %vm375_vm12 = vcmp.ne.s32.totalorder %v367_v17, 0 }
  0xe5   : > { %vm403_vm8 = vcmp.ne.s32.totalorder %v391_v60, 0  ;;  %429 = vperm.xlu0 %3588, %v420_v61   ;;  %vm402_vm11 = vcmp.ne.s32.totalorder %v389_v62, 0  ;;  %vm381_vm3 = vmor %vm6813_vm14, %vm373_vm10 }
  0xe6   : > { %vm411_vm4 = vmor %vm379_vm2, %vm403_vm8  ;;  %vm6815_vm8 = vnez %v6807_v57 }
  0xe7   : > { %v423_v63 = vsel %vm411_vm4, 1, %v6687_v0  ;;  %vm410_vm13 = vmor %vm378_vm9, %vm402_vm11  ;;  %vm6816_vm11 = vnez %v6810_v59 }
  0xe8   : > { %v395_v5 = vpop.permute.xlu1 %394  ;;  %v422_v6 = vsel %vm410_vm13, 1, %v6687_v0  ;;  %v393_v9 = vpop.permute.xlu0 %392  ;;  %vm380_vm5 = vmor %vm6814_vm0, %vm372_vm6 }
  0xe9   : > { %vm405_vm7 = vcmp.ne.s32.totalorder %v395_v5, 0  ;;  %438 = vperm.xlu0 %3588, %v423_v63   ;;  %435 = vperm.xlu1 %3589, %v422_v6   ;;  %vm404_vm1 = vcmp.ne.s32.totalorder %v393_v9, 0  ;;  %vm383_vm10 = vmor %vm6815_vm8, %vm375_vm12  ;;  %v6819_v6 = vmov 0  ;;  %v6822_v9 = vmov 0 }
  0xea   : > { %vm413_vm2 = vmor %vm381_vm3, %vm405_vm7 }
  0xeb   : > { %v425_v10 = vsel %vm413_vm2, 1, %v6687_v0  ;;  %vm412_vm9 = vmor %vm380_vm5, %vm404_vm1  ;;  %vm6817_vm5 = vcmp.eq.s32.totalorder %v3773_v2, 1 }
  0xec   : > { %v399_v13 = vpop.permute.xlu1 %398  ;;  %v424_v14 = vsel %vm412_vm9, 1, %v6687_v0  ;;  %v397_v15 = vpop.permute.xlu0 %396  ;;  %vm382_vm6 = vmor %vm6816_vm11, %vm374_vm15  ;;  %vm6818_vm9 = vcmp.eq.s32.totalorder %v3782_v4, 1 }
  0xed   : > { %vm407_vm4 = vcmp.ne.s32.totalorder %v399_v13, 0  ;;  %444 = vperm.xlu0 %3588, %v425_v10   ;;  %441 = vperm.xlu1 %3589, %v424_v14   ;;  %vm406_vm13 = vcmp.ne.s32.totalorder %v397_v15, 0  ;;  %v6825_v10 = vmov 0 }
  0xee   : > { %vm415_vm14 = vmor %vm383_vm10, %vm407_vm4  ;;  %vm6821_vm10 = vcmp.eq.s32.totalorder %v3770_v1, 1 }
  0xef   : > { %v427_v16 = vsel %vm415_vm14, 1, %v6687_v0  ;;  %vm414_vm3 = vmor %vm382_vm6, %vm406_vm13  ;;  %vm6824_vm13 = vcmp.eq.s32.totalorder %v3776_v3, 1 }
  0xf0   : > { %v426_v17 = vsel %vm414_vm3, 1, %v6687_v0  ;;  %v511_v18 = vpop.permute.xlu0 %510  ;;  %vm6827_vm3 = vcmp.eq.s32.totalorder %v3795_v8, 1 }
  0xf1   : > { %450 = vperm.xlu0 %3588, %v427_v16   ;;  %447 = vperm.xlu1 %3589, %v426_v17   ;;  %vm525_vm15 = vcmp.ne.s32.totalorder %v511_v18, 0  ;;  %v6831_v16 = vmov 0  ;;  %v6834_v17 = vmov 0 }
  0xf2   : > { %vm4137_vm8 = vmor %vm6818_vm9, %vm525_vm15 }
  0xf3   : > { %v6820_v6 = vsel %vm4137_vm8, 4294967295, %v6819_v6  ;;  %vm6830_vm8 = vcmp.eq.s32.totalorder %v3811_v12, 1 }
  0xf5   : > { %542 = vrot.lane.b32.xlu0 %v3915_v26, %s3688_s27  ;;  %544 = vrot.lane.b32.xlu1 %v3926_v27, %s3688_s27 }
  0xf9   : > { %546 = vrot.lane.b32.xlu0 %v3931_v28, %s3688_s27  ;;  %548 = vrot.lane.b32.xlu1 %v3942_v29, %s3688_s27 }
  0xfd   : > { %550 = vrot.lane.b32.xlu0 %v3947_v30, %s3688_s27  ;;  %552 = vrot.lane.b32.xlu1 %v3958_v31, %s3688_s27 }
 0x101   : > { %554 = vrot.lane.b32.xlu0 %v3963_v32, %s3688_s27  ;;  %572 = vrot.lane.b32.xlu1 %v3910_v25, %s3689_s28  ;;  %v509_v25 = vpop.permute.xlu1 %508 }
 0x102   : > { %vm524_vm1 = vcmp.ne.s32.totalorder %v509_v25, 0 }
 0x103   : > { %vm532_vm12 = vmor %vm6817_vm5, %vm524_vm1 }
 0x105   : > { %574 = vrot.lane.b32.xlu0 %v3915_v26, %s3689_s28  ;;  %576 = vrot.lane.b32.xlu1 %v3926_v27, %s3689_s28  ;;  %v513_v26 = vpop.permute.xlu1 %512  ;;  %v515_v27 = vpop.permute.xlu0 %514 }
 0x106   : > { %vm526_vm0 = vcmp.ne.s32.totalorder %v513_v26, 0  ;;  %vm527_vm7 = vcmp.ne.s32.totalorder %v515_v27, 0 }
 0x107   : > { %vm4143_vm11 = vmor %vm6821_vm10, %vm526_vm0 }
 0x108   : > { %v6823_v9 = vsel %vm4143_vm11, 4294967295, %v6822_v9  ;;  %vm4149_vm14 = vmor %vm6824_vm13, %vm527_vm7  ;;  %vm6833_vm13 = vcmp.eq.s32.totalorder %v3792_v7, 1 }
 0x109   : > { %578 = vrot.lane.b32.xlu0 %v3931_v28, %s3689_s28  ;;  %580 = vrot.lane.b32.xlu1 %v3942_v29, %s3689_s28  ;;  %v517_v19 = vpop.permute.xlu1 %516  ;;  %v519_v21 = vpop.permute.xlu0 %518  ;;  %v6826_v10 = vsel %vm4149_vm14, 4294967295, %v6825_v10 }
 0x10a   : > { %vm528_vm2 = vcmp.ne.s32.totalorder %v517_v19, 0  ;;  %vm529_vm15 = vcmp.ne.s32.totalorder %v519_v21, 0 }
 0x10b   : > { %vm4155_vm1 = vmor %vm6827_vm3, %vm528_vm2  ;;  %vm6836_vm2 = vnez %v6823_v9 }
 0x10c   : > { %vm4167_vm14 = vmor %vm6833_vm13, %vm529_vm15 }
 0x10d   : > { %582 = vrot.lane.b32.xlu0 %v3947_v30, %s3689_s28  ;;  %584 = vrot.lane.b32.xlu1 %v3958_v31, %s3689_s28  ;;  %v521_v20 = vpop.permute.xlu1 %520  ;;  %v4115_v22 = vpop.permute.xlu0 %522  ;;  %v6835_v17 = vsel %vm4167_vm14, 4294967295, %v6834_v17 }
 0x10e   : > { %vm530_vm4 = vcmp.ne.s32.totalorder %v521_v20, 0 }
 0x10f   : > { %vm4161_vm11 = vmor %vm6830_vm8, %vm530_vm4 }
 0x110   : > { %v6832_v16 = vsel %vm4161_vm11, 4294967295, %v6831_v16 }
 0x111   : > { %586 = vrot.lane.b32.xlu0 %v3963_v32, %s3689_s28  ;;  %v541_v28 = vpop.permute.xlu1 %540 }
 0x112   : > { %vm556_vm6 = vcmp.ne.s32.totalorder %v541_v28, 0 }
 0x113   : > { %vm564_vm9 = vmor %vm532_vm12, %vm556_vm6  ;;  %vm6837_vm12 = vnez %v6820_v6 }
 0x163   : > { %v4117_v29 = vpop.permute.xlu1 %432 }
 0x164   : > { %v4119_v23 = vpop.permute.xlu0 %429 }
 0x168   : > { %v4121_v30 = vpop.permute.xlu1 %435  ;;  %v4123_v31 = vpop.permute.xlu0 %438 }
 0x16c   : > { %v4125_v24 = vpop.permute.xlu1 %441  ;;  %v4127_v32 = vpop.permute.xlu0 %444 }
 0x170   : > { %v4129_v57 = vpop.permute.xlu1 %447  ;;  %v4131_v58 = vpop.permute.xlu0 %450 }
 0x174   : > { %v545_v59 = vpop.permute.xlu1 %544  ;;  %v543_v60 = vpop.permute.xlu0 %542 }
 0x175   : > { %vm558_vm0 = vcmp.ne.s32.totalorder %v545_v59, 0  ;;  %vm557_vm10 = vcmp.ne.s32.totalorder %v543_v60, 0 }
 0x176   : > { %vm566_vm3 = vmor %vm6836_vm2, %vm558_vm0  ;;  %vm6838_vm0 = vnez %v6826_v10 }
 0x177   : > { %vm565_vm8 = vmor %vm6837_vm12, %vm557_vm10 }
 0x178   : > { %v549_v61 = vpop.permute.xlu1 %548  ;;  %v547_v62 = vpop.permute.xlu0 %546 }
 0x179   : > { %vm560_vm6 = vcmp.ne.s32.totalorder %v549_v61, 0 }
 0x17a   : > { %vm568_vm13 = vmor %vm4155_vm1, %vm560_vm6  ;;  %vm531_vm6 = vcmp.ne.s32.totalorder %v4115_v22, 0 }
 0x17c   : > { %v553_v63 = vpop.permute.xlu1 %552  ;;  %v551_v5 = vpop.permute.xlu0 %550 }
 0x17d   : > { %vm562_vm10 = vcmp.ne.s32.totalorder %v553_v63, 0  ;;  %vm561_vm14 = vcmp.ne.s32.totalorder %v551_v5, 0 }
 0x180   : > { %v573_v13 = vpop.permute.xlu1 %572  ;;  %v555_v14 = vpop.permute.xlu0 %554 }
 0x181   : > { %vm588_vm5 = vcmp.ne.s32.totalorder %v573_v13, 0 }
 0x182   : > { %vm596_vm7 = vmor %vm564_vm9, %vm588_vm5  ;;  %vm559_vm9 = vcmp.ne.s32.totalorder %v547_v62, 0 }
 0x183   : > { %v608_v25 = vsel %vm596_vm7, 1, %v6687_v0  ;;  %vm567_vm7 = vmor %vm6838_vm0, %vm559_vm9 }
 0x184   : > { %v577_v26 = vpop.permute.xlu1 %576  ;;  %v575_v18 = vpop.permute.xlu0 %574  ;;  %617 = vperm.xlu1 %3589, %v608_v25  }
 0x185   : > { %vm590_vm4 = vcmp.ne.s32.totalorder %v577_v26, 0  ;;  %vm589_vm5 = vcmp.ne.s32.totalorder %v575_v18, 0 }
 0x186   : > { %vm598_vm11 = vmor %vm566_vm3, %vm590_vm4  ;;  %vm6840_vm4 = vnez %v6835_v17 }
 0x187   : > { %v610_v19 = vsel %vm598_vm11, 1, %v6687_v0  ;;  %vm597_vm15 = vmor %vm565_vm8, %vm589_vm5  ;;  %vm6839_vm8 = vnez %v6832_v16 }
 0x188   : > { %v581_v27 = vpop.permute.xlu1 %580  ;;  %v609_v20 = vsel %vm597_vm15, 1, %v6687_v0  ;;  %v579_v21 = vpop.permute.xlu0 %578  ;;  %623 = vperm.xlu1 %3589, %v610_v19   ;;  %vm570_vm1 = vmor %vm6839_vm8, %vm562_vm10  ;;  %vm680_vm10 = vcmp.eq.s32.totalorder %v3773_v2, 2  ;;  %vm682_vm8 = vcmp.eq.s32.totalorder %v3770_v1, 2 }
 0x189   : > { %vm592_vm2 = vcmp.ne.s32.totalorder %v581_v27, 0  ;;  %620 = vperm.xlu0 %3588, %v609_v20   ;;  %vm591_vm12 = vcmp.ne.s32.totalorder %v579_v21, 0  ;;  %vm569_vm5 = vmor %vm6840_vm4, %vm561_vm14  ;;  %v688_v5 = vsel %vm680_vm10, 1, %v6687_v0  ;;  %v690_v9 = vsel %vm682_vm8, 1, %v6687_v0 }
 0x18a   : > { %vm600_vm3 = vmor %vm568_vm13, %vm592_vm2  ;;  %vm563_vm13 = vcmp.ne.s32.totalorder %v555_v14, 0  ;;  %vm6841_vm2 = vcmp.eq.s32.totalorder %v3808_v11, 1  ;;  %vm683_vm4 = vcmp.eq.s32.totalorder %v3776_v3, 2 }
 0x18b   : > { %v612_v28 = vsel %vm600_vm3, 1, %v6687_v0  ;;  %vm599_vm11 = vmor %vm567_vm7, %vm591_vm12  ;;  %v691_v14 = vsel %vm683_vm4, 1, %v6687_v0 }
 0x18c   : > { %v585_v59 = vpop.permute.xlu1 %584  ;;  %v611_v60 = vsel %vm599_vm11, 1, %v6687_v0  ;;  %v583_v61 = vpop.permute.xlu0 %582  ;;  %629 = vperm.xlu1 %3589, %v612_v28   ;;  %vm539_vm12 = vmor %vm6841_vm2, %vm531_vm6  ;;  %vm684_vm6 = vcmp.eq.s32.totalorder %v3795_v8, 2 }
 0x18d   : > { %vm594_vm9 = vcmp.ne.s32.totalorder %v585_v59, 0  ;;  %626 = vperm.xlu0 %3588, %v611_v60   ;;  %vm593_vm15 = vcmp.ne.s32.totalorder %v583_v61, 0  ;;  %vm571_vm3 = vmor %vm539_vm12, %vm563_vm13  ;;  %v692_v13 = vsel %vm684_vm6, 1, %v6687_v0 }
 0x18e   : > { %vm602_vm0 = vmor %vm570_vm1, %vm594_vm9  ;;  %vm681_vm1 = vcmp.eq.s32.totalorder %v3782_v4, 2  ;;  %vm6690_vm9 = vcmp.eq.s32.totalorder %v3792_v7, 2 }
 0x18f   : > { %v614_v62 = vsel %vm602_vm0, 1, %v6687_v0  ;;  %vm601_vm7 = vmor %vm569_vm5, %vm593_vm15  ;;  %v689_v10 = vsel %vm681_vm1, 1, %v6687_v0  ;;  %vm6691_vm5 = vcmp.eq.s32.totalorder %v3811_v12, 2  ;;  %v693_v16 = vsel %vm6690_vm9, 1, %v6687_v0 }
 0x190   : > { %v613_v63 = vsel %vm601_vm7, 1, %v6687_v0  ;;  %v587_v22 = vpop.permute.xlu0 %586  ;;  %635 = vperm.xlu1 %3589, %v614_v62   ;;  %v694_v15 = vsel %vm6691_vm5, 1, %v6687_v0  ;;  %vm6689_vm15 = vcmp.eq.s32.totalorder %v3808_v11, 2 }
 0x191   : > { %632 = vperm.xlu0 %3588, %v613_v63   ;;  %vm595_vm14 = vcmp.ne.s32.totalorder %v587_v22, 0  ;;  %v695_v17 = vsel %vm6689_vm15, 1, %v6687_v0 }
 0x192   : > { %vm603_vm11 = vmor %vm571_vm3, %vm595_vm14 }
 0x193   : > { %v615_v6 = vsel %vm603_vm11, 1, %v6687_v0 }
 0x194   : > { %696 = vrot.lane.b32.xlu1 %v688_v5, %s3687_s26 }
 0x195   : > { %638 = vperm.xlu0 %3588, %v615_v6  }
 0x198   : > { %700 = vrot.lane.b32.xlu1 %v690_v9, %s3687_s26 }
 0x199   : > { %698 = vrot.lane.b32.xlu0 %v689_v10, %s3687_s26 }
 0x19c   : > { %704 = vrot.lane.b32.xlu1 %v692_v13, %s3687_s26 }
 0x19d   : > { %702 = vrot.lane.b32.xlu0 %v691_v14, %s3687_s26 }
 0x1a0   : > { %708 = vrot.lane.b32.xlu1 %v694_v15, %s3687_s26 }
 0x1a1   : > { %706 = vrot.lane.b32.xlu0 %v693_v16, %s3687_s26 }
 0x1a4   : > { %728 = vrot.lane.b32.xlu1 %v688_v5, %s3688_s27 }
 0x1a5   : > { %710 = vrot.lane.b32.xlu0 %v695_v17, %s3687_s26 }
 0x1a8   : > { %732 = vrot.lane.b32.xlu1 %v690_v9, %s3688_s27 }
 0x1a9   : > { %730 = vrot.lane.b32.xlu0 %v689_v10, %s3688_s27 }
 0x1ac   : > { %736 = vrot.lane.b32.xlu1 %v692_v13, %s3688_s27 }
 0x1ad   : > { %734 = vrot.lane.b32.xlu0 %v691_v14, %s3688_s27 }
 0x1b0   : > { %740 = vrot.lane.b32.xlu1 %v694_v15, %s3688_s27 }
 0x1b1   : > { %738 = vrot.lane.b32.xlu0 %v693_v16, %s3688_s27 }
 0x1b4   : > { %760 = vrot.lane.b32.xlu1 %v688_v5, %s3689_s28 }
 0x1b5   : > { %742 = vrot.lane.b32.xlu0 %v695_v17, %s3688_s27 }
 0x1b8   : > { %764 = vrot.lane.b32.xlu1 %v690_v9, %s3689_s28 }
 0x1b9   : > { %762 = vrot.lane.b32.xlu0 %v689_v10, %s3689_s28 }
 0x1bc   : > { %768 = vrot.lane.b32.xlu1 %v692_v13, %s3689_s28 }
 0x1bd   : > { %766 = vrot.lane.b32.xlu0 %v691_v14, %s3689_s28 }
 0x1c0   : > { %772 = vrot.lane.b32.xlu1 %v694_v15, %s3689_s28 }
 0x1c1   : > { %770 = vrot.lane.b32.xlu0 %v693_v16, %s3689_s28 }
 0x1c5   : > { %774 = vrot.lane.b32.xlu0 %v695_v17, %s3689_s28 }
 0x203   : > { %v4250_v25 = vpop.permute.xlu1 %617 }
 0x207   : > { %v4252_v26 = vpop.permute.xlu1 %623 }
 0x208   : > { %v4254_v18 = vpop.permute.xlu0 %620 }
 0x20b   : > { %v4256_v19 = vpop.permute.xlu1 %629 }
 0x20c   : > { %v4258_v27 = vpop.permute.xlu0 %626 }
 0x20f   : > { %v4260_v20 = vpop.permute.xlu1 %635 }
 0x210   : > { %v4262_v21 = vpop.permute.xlu0 %632 }
 0x213   : > { %v697_v28 = vpop.permute.xlu1 %696 }
 0x214   : > { %v4264_v59 = vpop.permute.xlu0 %638  ;;  %vm712_vm13 = vcmp.ne.s32.totalorder %v697_v28, 0 }
 0x215   : > { %vm720_vm2 = vmor %vm680_vm10, %vm712_vm13 }
 0x217   : > { %v701_v60 = vpop.permute.xlu1 %700 }
 0x218   : > { %v699_v61 = vpop.permute.xlu0 %698  ;;  %vm714_vm0 = vcmp.ne.s32.totalorder %v701_v60, 0  ;;  %v6848_v60 = vmov 0 }
 0x219   : > { %vm713_vm7 = vcmp.ne.s32.totalorder %v699_v61, 0  ;;  %vm4272_vm3 = vmor %vm682_vm8, %vm714_vm0 }
 0x21a   : > { %vm4278_vm11 = vmor %vm681_vm1, %vm713_vm7 }
 0x21b   : > { %v705_v62 = vpop.permute.xlu1 %704  ;;  %v6845_v56 = vsel %vm4278_vm11, 4294967295, %v6844_v56 }
 0x21c   : > { %v703_v63 = vpop.permute.xlu0 %702  ;;  %vm716_vm12 = vcmp.ne.s32.totalorder %v705_v62, 0 }
 0x21d   : > { %vm715_vm14 = vcmp.ne.s32.totalorder %v703_v63, 0  ;;  %vm4284_vm10 = vmor %vm684_vm6, %vm716_vm12  ;;  %vm6850_vm6 = vcmp.eq.s32.totalorder %v3811_v12, 2  ;;  %v6851_v63 = vmov 0 }
 0x21e   : > { %vm4290_vm8 = vmor %vm683_vm4, %vm715_vm14  ;;  %vm6854_vm4 = vcmp.eq.s32.totalorder %v3792_v7, 2 }
 0x21f   : > { %v709_v22 = vpop.permute.xlu1 %708  ;;  %v6849_v60 = vsel %vm4290_vm8, 4294967295, %v6848_v60 }
 0x220   : > { %v707_v5 = vpop.permute.xlu0 %706  ;;  %vm718_vm13 = vcmp.ne.s32.totalorder %v709_v22, 0  ;;  %v6855_v22 = vmov 0 }
 0x221   : > { %vm717_vm1 = vcmp.ne.s32.totalorder %v707_v5, 0  ;;  %vm4296_vm12 = vmor %vm6850_vm6, %vm718_vm13 }
 0x222   : > { %v6852_v63 = vsel %vm4296_vm12, 4294967295, %v6851_v63  ;;  %vm4303_vm14 = vmor %vm6854_vm4, %vm717_vm1 }
 0x223   : > { %v729_v6 = vpop.permute.xlu1 %728  ;;  %v6856_v22 = vsel %vm4303_vm14, 4294967295, %v6855_v22 }
 0x224   : > { %v4266_v9 = vpop.permute.xlu0 %710  ;;  %vm744_vm15 = vcmp.ne.s32.totalorder %v729_v6, 0  ;;  %v6853_v6 = vmov 0  }
 0x225   : > { %vm752_vm0 = vmor %vm720_vm2, %vm744_vm15 }
 0x227   : > { %v733_v10 = vpop.permute.xlu1 %732 }
 0x228   : > { %v731_v13 = vpop.permute.xlu0 %730  ;;  %vm746_vm7 = vcmp.ne.s32.totalorder %v733_v10, 0 }
 0x229   : > { %vm745_vm5 = vcmp.ne.s32.totalorder %v731_v13, 0  ;;  %vm754_vm15 = vmor %vm4272_vm3, %vm746_vm7  ;;  %vm6858_vm3 = vnez %v6849_v60 }
 0x22b   : > { %v737_v14 = vpop.permute.xlu1 %736 }
 0x22c   : > { %v735_v15 = vpop.permute.xlu0 %734  ;;  %vm748_vm13 = vcmp.ne.s32.totalorder %v737_v14, 0 }
 0x22d   : > { %vm747_vm12 = vcmp.ne.s32.totalorder %v735_v15, 0  ;;  %vm756_vm1 = vmor %vm4284_vm10, %vm748_vm13 }
 0x22e   : > { %vm755_vm7 = vmor %vm6858_vm3, %vm747_vm12  ;;  %vm6860_vm12 = vnez %v6856_v22 }
 0x22f   : > { %v741_v16 = vpop.permute.xlu1 %740 }
 0x230   : > { %v739_v17 = vpop.permute.xlu0 %738 }
 0x231   : > { %vm749_vm14 = vcmp.ne.s32.totalorder %v739_v17, 0 }
 0x232   : > { %vm757_vm13 = vmor %vm6860_vm12, %vm749_vm14  ;;  %vm871_vm12 = vcmp.eq.s32.totalorder %v3776_v3, 3 }
 0x233   : > { %v761_v61 = vpop.permute.xlu1 %760 }
 0x234   : > { %v743_v62 = vpop.permute.xlu0 %742  ;;  %vm776_vm9 = vcmp.ne.s32.totalorder %v761_v61, 0 }
 0x235   : > { %vm784_vm11 = vmor %vm752_vm0, %vm776_vm9  ;;  %vm6857_vm9 = vnez %v6845_v56 }
 0x236   : > { %v796_v55 = vsel %vm784_vm11, 1, %v6853_v6  ;;  %vm753_vm2 = vmor %vm6857_vm9, %vm745_vm5  ;;  %vm750_vm5 = vcmp.ne.s32.totalorder %v741_v16, 0 }
 0x237   : > { %805 = vperm.xlu1 %3589, %v796_v55   ;;  %v765_v5 = vpop.permute.xlu1 %764 }
 0x238   : > { %v763_v10 = vpop.permute.xlu0 %762  ;;  %vm778_vm0 = vcmp.ne.s32.totalorder %v765_v5, 0 }
 0x239   : > { %vm777_vm6 = vcmp.ne.s32.totalorder %v763_v10, 0  ;;  %vm786_vm11 = vmor %vm754_vm15, %vm778_vm0  ;;  %vm6859_vm0 = vnez %v6852_v63  ;;  %v879_v10 = vsel %vm871_vm12, 1, %v6853_v6 }
 0x23a   : > { %vm785_vm8 = vmor %vm753_vm2, %vm777_vm6  ;;  %v798_v13 = vsel %vm786_vm11, 1, %v6853_v6 }
 0x23b   : > { %811 = vperm.xlu1 %3589, %v798_v13   ;;  %v769_v0 = vpop.permute.xlu1 %768  ;;  %v797_v55 = vsel %vm785_vm8, 1, %v6853_v6  ;;  %vm758_vm10 = vmor %vm6859_vm0, %vm750_vm5  ;;  %vm719_vm8 = vcmp.ne.s32.totalorder %v4266_v9, 0  ;;  %vm6861_vm5 = vcmp.eq.s32.totalorder %v3808_v11, 2  ;;  %vm870_vm0 = vcmp.eq.s32.totalorder %v3770_v1, 3 }
 0x23c   : > { %v767_v61 = vpop.permute.xlu0 %766  ;;  %vm780_vm4 = vcmp.ne.s32.totalorder %v769_v0, 0  ;;  %808 = vperm.xlu0 %3588, %v797_v55   ;;  %v878_v63 = vsel %vm870_vm0, 1, %v6853_v6 }
 0x23d   : > { %vm779_vm9 = vcmp.ne.s32.totalorder %v767_v61, 0  ;;  %vm788_vm15 = vmor %vm756_vm1, %vm780_vm4  ;;  %vm751_vm1 = vcmp.ne.s32.totalorder %v743_v62, 0 }
 0x23e   : > { %vm787_vm2 = vmor %vm755_vm7, %vm779_vm9  ;;  %v800_v56 = vsel %vm788_vm15, 1, %v6853_v6  ;;  %vm868_vm7 = vcmp.eq.s32.totalorder %v3773_v2, 3 }
 0x23f   : > { %817 = vperm.xlu1 %3589, %v800_v56   ;;  %v773_v14 = vpop.permute.xlu1 %772  ;;  %v799_v15 = vsel %vm787_vm2, 1, %v6853_v6  ;;  %vm727_vm9 = vmor %vm6861_vm5, %vm719_vm8  ;;  %v876_v60 = vsel %vm868_vm7, 1, %v6853_v6  ;;  %vm872_vm8 = vcmp.eq.s32.totalorder %v3795_v8, 3 }
 0x240   : > { %v771_v28 = vpop.permute.xlu0 %770  ;;  %vm782_vm6 = vcmp.ne.s32.totalorder %v773_v14, 0  ;;  %814 = vperm.xlu0 %3588, %v799_v15   ;;  %vm759_vm15 = vmor %vm727_vm9, %vm751_vm1  ;;  %v880_v5 = vsel %vm872_vm8, 1, %v6853_v6 }
 0x241   : > { %vm781_vm11 = vcmp.ne.s32.totalorder %v771_v28, 0  ;;  %vm790_vm3 = vmor %vm758_vm10, %vm782_vm6  ;;  %vm869_vm10 = vcmp.eq.s32.totalorder %v3782_v4, 3  ;;  %vm6696_vm6 = vcmp.eq.s32.totalorder %v3792_v7, 3 }
 0x242   : > { %vm789_vm4 = vmor %vm757_vm13, %vm781_vm11  ;;  %v802_v16 = vsel %vm790_vm3, 1, %v6853_v6  ;;  %v877_v22 = vsel %vm869_vm10, 1, %v6853_v6  ;;  %vm6697_vm13 = vcmp.eq.s32.totalorder %v3811_v12, 3  ;;  %v881_v0 = vsel %vm6696_vm6, 1, %v6853_v6 }
 0x243   : > { %823 = vperm.xlu1 %3589, %v802_v16   ;;  %v801_v17 = vsel %vm789_vm4, 1, %v6853_v6  ;;  %v882_v13 = vsel %vm6697_vm13, 1, %v6853_v6  ;;  %vm6695_vm11 = vcmp.eq.s32.totalorder %v3808_v11, 3 }
 0x244   : > { %v775_v9 = vpop.permute.xlu0 %774  ;;  %820 = vperm.xlu0 %3588, %v801_v17   ;;  %v883_v55 = vsel %vm6695_vm11, 1, %v6853_v6 }
 0x245   : > { %vm783_vm14 = vcmp.ne.s32.totalorder %v775_v9, 0 }
 0x246   : > { %vm791_vm2 = vmor %vm759_vm15, %vm783_vm14 }
 0x247   : > { %v803_v62 = vsel %vm791_vm2, 1, %v6853_v6  ;;  %884 = vrot.lane.b32.xlu1 %v876_v60, %s3687_s26 }
 0x248   : > { %826 = vperm.xlu0 %3588, %v803_v62  }
 0x24b   : > { %888 = vrot.lane.b32.xlu1 %v878_v63, %s3687_s26 }
 0x24c   : > { %886 = vrot.lane.b32.xlu0 %v877_v22, %s3687_s26 }
 0x24f   : > { %892 = vrot.lane.b32.xlu1 %v880_v5, %s3687_s26 }
 0x250   : > { %890 = vrot.lane.b32.xlu0 %v879_v10, %s3687_s26 }
 0x253   : > { %896 = vrot.lane.b32.xlu1 %v882_v13, %s3687_s26 }
 0x254   : > { %894 = vrot.lane.b32.xlu0 %v881_v0, %s3687_s26 }
 0x257   : > { %916 = vrot.lane.b32.xlu1 %v876_v60, %s3688_s27 }
 0x258   : > { %898 = vrot.lane.b32.xlu0 %v883_v55, %s3687_s26 }
 0x25b   : > { %920 = vrot.lane.b32.xlu1 %v878_v63, %s3688_s27 }
 0x25c   : > { %918 = vrot.lane.b32.xlu0 %v877_v22, %s3688_s27 }
 0x25f   : > { %924 = vrot.lane.b32.xlu1 %v880_v5, %s3688_s27 }
 0x260   : > { %922 = vrot.lane.b32.xlu0 %v879_v10, %s3688_s27 }
 0x263   : > { %928 = vrot.lane.b32.xlu1 %v882_v13, %s3688_s27 }
 0x264   : > { %926 = vrot.lane.b32.xlu0 %v881_v0, %s3688_s27 }
 0x267   : > { %948 = vrot.lane.b32.xlu1 %v876_v60, %s3689_s28 }
 0x268   : > { %930 = vrot.lane.b32.xlu0 %v883_v55, %s3688_s27 }
 0x26b   : > { %952 = vrot.lane.b32.xlu1 %v878_v63, %s3689_s28 }
 0x26c   : > { %950 = vrot.lane.b32.xlu0 %v877_v22, %s3689_s28 }
 0x26f   : > { %956 = vrot.lane.b32.xlu1 %v880_v5, %s3689_s28 }
 0x270   : > { %954 = vrot.lane.b32.xlu0 %v879_v10, %s3689_s28 }
 0x273   : > { %960 = vrot.lane.b32.xlu1 %v882_v13, %s3689_s28 }
 0x274   : > { %958 = vrot.lane.b32.xlu0 %v881_v0, %s3689_s28 }
 0x278   : > { %962 = vrot.lane.b32.xlu0 %v883_v55, %s3689_s28 }
 0x2b6   : > { %v4385_v61 = vpop.permute.xlu1 %805 }
 0x2ba   : > { %v4387_v56 = vpop.permute.xlu1 %811 }
 0x2bb   : > { %v4389_v14 = vpop.permute.xlu0 %808 }
 0x2be   : > { %v4391_v15 = vpop.permute.xlu1 %817 }
 0x2bf   : > { %v4393_v28 = vpop.permute.xlu0 %814 }
 0x2c2   : > { %v4395_v16 = vpop.permute.xlu1 %823 }
 0x2c3   : > { %v4397_v17 = vpop.permute.xlu0 %820 }
 0x2c6   : > { %v885_v9 = vpop.permute.xlu1 %884 }
 0x2c7   : > { %v4399_v60 = vpop.permute.xlu0 %826  ;;  %vm900_vm1 = vcmp.ne.s32.totalorder %v885_v9, 0  ;;  %v6864_v9 = vmov 0 }
 0x2c8   : > { %vm908_vm5 = vmor %vm868_vm7, %vm900_vm1 }
 0x2ca   : > { %v889_v62 = vpop.permute.xlu1 %888 }
 0x2cb   : > { %v887_v63 = vpop.permute.xlu0 %886  ;;  %vm902_vm3 = vcmp.ne.s32.totalorder %v889_v62, 0 }
 0x2cc   : > { %vm901_vm4 = vcmp.ne.s32.totalorder %v887_v63, 0  ;;  %vm4407_vm15 = vmor %vm870_vm0, %vm902_vm3  ;;  %v6868_v63 = vmov 0 }
 0x2cd   : > { %vm4413_vm2 = vmor %vm869_vm10, %vm901_vm4 }
 0x2ce   : > { %v893_v22 = vpop.permute.xlu1 %892  ;;  %v6865_v9 = vsel %vm4413_vm2, 4294967295, %v6864_v9 }
 0x2cf   : > { %v891_v5 = vpop.permute.xlu0 %890  ;;  %vm904_vm9 = vcmp.ne.s32.totalorder %v893_v22, 0 }
 0x2d0   : > { %vm903_vm14 = vcmp.ne.s32.totalorder %v891_v5, 0  ;;  %vm4419_vm7 = vmor %vm872_vm8, %vm904_vm9  ;;  %vm6870_vm8 = vcmp.eq.s32.totalorder %v3811_v12, 3 }
 0x2d1   : > { %vm4425_vm0 = vmor %vm871_vm12, %vm903_vm14  ;;  %vm6873_vm12 = vcmp.eq.s32.totalorder %v3792_v7, 3 }
 0x2d2   : > { %v897_v10 = vpop.permute.xlu1 %896  ;;  %v6869_v63 = vsel %vm4425_vm0, 4294967295, %v6868_v63 }
 0x2d3   : > { %v895_v13 = vpop.permute.xlu0 %894  ;;  %vm906_vm1 = vcmp.ne.s32.totalorder %v897_v10, 0  ;;  %v4475_v10 = vld [vmem:[%s3767_s25 + $0x8] sm:$0xff] }
 0x2d4   : > { %vm905_vm3 = vcmp.ne.s32.totalorder %v895_v13, 0  ;;  %vm4431_vm9 = vmor %vm6870_vm8, %vm906_vm1 }
 0x2d5   : > { %vm4438_vm14 = vmor %vm6873_vm12, %vm905_vm3 }
 0x2d6   : > { %v917_v0 = vpop.permute.xlu1 %916 }
 0x2d7   : > { %v4401_v55 = vpop.permute.xlu0 %898  ;;  %vm932_vm11 = vcmp.ne.s32.totalorder %v917_v0, 0  ;;  %v6871_v0 = vmov 0 }
 0x2d8   : > { %vm940_vm10 = vmor %vm908_vm5, %vm932_vm11  ;;  %v6872_v0 = vsel %vm4431_vm9, 4294967295, %v6871_v0 }
 0x2da   : > { %v921_v48 = vpop.permute.xlu1 %920 }
 0x2db   : > { %v919_v47 = vpop.permute.xlu0 %918  ;;  %vm934_vm4 = vcmp.ne.s32.totalorder %v921_v48, 0 }
 0x2dc   : > { %vm933_vm13 = vcmp.ne.s32.totalorder %v919_v47, 0  ;;  %vm942_vm11 = vmor %vm4407_vm15, %vm934_vm4  ;;  %vm6877_vm15 = vnez %v6869_v63 }
 0x2de   : > { %v925_v54 = vpop.permute.xlu1 %924 }
 0x2df   : > { %v923_v53 = vpop.permute.xlu0 %922  ;;  %vm936_vm1 = vcmp.ne.s32.totalorder %v925_v54, 0 }
 0x2e0   : > { %vm935_vm8 = vcmp.ne.s32.totalorder %v923_v53, 0  ;;  %vm944_vm3 = vmor %vm4419_vm7, %vm936_vm1  ;;  %vm6878_vm7 = vnez %v6872_v0 }
 0x2e1   : > { %vm943_vm4 = vmor %vm6877_vm15, %vm935_vm8  ;;  %vm907_vm8 = vcmp.ne.s32.totalorder %v4401_v55, 0 }
 0x2e2   : > { %v929_v46 = vpop.permute.xlu1 %928 }
 0x2e3   : > { %v927_v52 = vpop.permute.xlu0 %926 }
 0x2e6   : > { %v949_v22 = vpop.permute.xlu1 %948 }
 0x2e7   : > { %vm964_vm6 = vcmp.ne.s32.totalorder %v949_v22, 0  ;;  %v931_v5 = vpop.permute.xlu0 %930 }
 0x2e8   : > { %vm972_vm2 = vmor %vm940_vm10, %vm964_vm6  ;;  %vm6876_vm6 = vnez %v6865_v9 }
 0x2e9   : > { %v984_v51 = vsel %vm972_vm2, 1, %v6853_v6  ;;  %vm941_vm5 = vmor %vm6876_vm6, %vm933_vm13  ;;  %vm938_vm13 = vcmp.ne.s32.totalorder %v929_v46, 0  ;;  %vm937_vm6 = vcmp.ne.s32.totalorder %v927_v52, 0  ;;  %v4460_v52 = vld [vmem:[%s3767_s25] sm:$0xff] }
 0x2ea   : > { %993 = vperm.xlu1 %3589, %v984_v51   ;;  %v953_v47 = vpop.permute.xlu1 %952  ;;  %vm1056_vm15 = vcmp.eq.s32.totalorder %v4460_v52, 4 }
 0x2eb   : > { %vm966_vm10 = vcmp.ne.s32.totalorder %v953_v47, 0  ;;  %v951_v48 = vpop.permute.xlu0 %950  ;;  %v1064_v0 = vsel %vm1056_vm15, 1, %v6853_v6 }
 0x2ec   : > { %vm974_vm9 = vmor %vm942_vm11, %vm966_vm10  ;;  %vm965_vm2 = vcmp.ne.s32.totalorder %v951_v48, 0 }
 0x2ed   : > { %vm973_vm0 = vmor %vm941_vm5, %vm965_vm2  ;;  %v986_v13 = vsel %vm974_vm9, 1, %v6853_v6 }
 0x2ee   : > { %999 = vperm.xlu1 %3589, %v986_v13   ;;  %v957_v45 = vpop.permute.xlu1 %956  ;;  %v985_v51 = vsel %vm973_vm0, 1, %v6853_v6  ;;  %vm946_vm9 = vmor %vm6878_vm7, %vm938_vm13  ;;  %vm1057_vm7 = vcmp.eq.s32.totalorder %v4475_v10, 4 }
 0x2ef   : > { %vm968_vm12 = vcmp.ne.s32.totalorder %v957_v45, 0  ;;  %996 = vperm.xlu0 %3588, %v985_v51   ;;  %v955_v54 = vpop.permute.xlu0 %954  ;;  %vm945_vm0 = vmor %vm4438_vm14, %vm937_vm6  ;;  %vm6879_vm14 = vcmp.eq.s32.totalorder %v3808_v11, 3  ;;  %v1065_v13 = vsel %vm1057_vm7, 1, %v6853_v6  ;;  %v4487_v45 = vld [vmem:[%s3767_s25 + $0x20] sm:$0xff]  ;;  %v4491_v51 = vld [vmem:[%s3767_s25 + $0x18] sm:$0xff] }
 0x2f0   : > { %vm976_vm11 = vmor %vm944_vm3, %vm968_vm12  ;;  %vm967_vm5 = vcmp.ne.s32.totalorder %v955_v54, 0 }
 0x2f1   : > { %vm975_vm10 = vmor %vm943_vm4, %vm967_vm5  ;;  %v988_v53 = vsel %vm976_vm11, 1, %v6853_v6  ;;  %vm939_vm4 = vcmp.ne.s32.totalorder %v931_v5, 0  ;;  %v4471_v5 = vld [vmem:[%s3767_s25 + $0x10] sm:$0xff] }
 0x2f2   : > { %1005 = vperm.xlu1 %3589, %v988_v53   ;;  %v961_v9 = vpop.permute.xlu1 %960  ;;  %v987_v62 = vsel %vm975_vm10, 1, %v6853_v6  ;;  %vm915_vm12 = vmor %vm6879_vm14, %vm907_vm8  ;;  %vm1058_vm5 = vcmp.eq.s32.totalorder %v4471_v5, 4 }
 0x2f3   : > { %vm970_vm1 = vcmp.ne.s32.totalorder %v961_v9, 0  ;;  %1002 = vperm.xlu0 %3588, %v987_v62   ;;  %v959_v46 = vpop.permute.xlu0 %958  ;;  %vm947_vm6 = vmor %vm915_vm12, %vm939_vm4  ;;  %v1066_v48 = vsel %vm1058_vm5, 1, %v6853_v6  ;;  %v4503_v9 = vld [vmem:[%s3767_s25 + $0x30] sm:$0xff]  ;;  %v4507_v62 = vld [vmem:[%s3767_s25 + $0x28] sm:$0xff] }
 0x2f4   : > { %vm978_vm2 = vmor %vm946_vm9, %vm970_vm1  ;;  %vm969_vm3 = vcmp.ne.s32.totalorder %v959_v46, 0  ;;  %vm1060_vm9 = vcmp.eq.s32.totalorder %v4487_v45, 4  ;;  %vm6712_vm1 = vcmp.eq.s32.totalorder %v4503_v9, 4  ;;  %vm6711_vm8 = vcmp.eq.s32.totalorder %v4507_v62, 4 }
 0x2f5   : > { %vm977_vm13 = vmor %vm945_vm0, %vm969_vm3  ;;  %v990_v63 = vsel %vm978_vm2, 1, %v6853_v6  ;;  %vm1059_vm0 = vcmp.eq.s32.totalorder %v4491_v51, 4  ;;  %v1068_v54 = vsel %vm1060_vm9, 1, %v6853_v6  ;;  %v1070_v46 = vsel %vm6712_vm1, 1, %v6853_v6 }
 0x2f6   : > { %1011 = vperm.xlu1 %3589, %v990_v63   ;;  %v989_v22 = vsel %vm977_vm13, 1, %v6853_v6  ;;  %v1067_v53 = vsel %vm1059_vm0, 1, %v6853_v6  ;;  %v1069_v63 = vsel %vm6711_vm8, 1, %v6853_v6 }
 0x2f7   : > { %1008 = vperm.xlu0 %3588, %v989_v22   ;;  %v963_v55 = vpop.permute.xlu0 %962  ;;  %v4519_v22 = vld [vmem:[%s3767_s25 + $0x38] sm:$0xff] }
 0x2f8   : > { %vm971_vm11 = vcmp.ne.s32.totalorder %v963_v55, 0  ;;  %vm6710_vm2 = vcmp.eq.s32.totalorder %v4519_v22, 4 }
 0x2f9   : > { %vm979_vm10 = vmor %vm947_vm6, %vm971_vm11  ;;  %v1071_v55 = vsel %vm6710_vm2, 1, %v6853_v6 }
 0x2fa   : > { %v991_v47 = vsel %vm979_vm10, 1, %v6853_v6  ;;  %1072 = vrot.lane.b32.xlu1 %v1064_v0, %s3687_s26 }
 0x2fb   : > { %1014 = vperm.xlu0 %3588, %v991_v47  }
 0x2fe   : > { %1076 = vrot.lane.b32.xlu1 %v1066_v48, %s3687_s26 }
 0x2ff   : > { %1074 = vrot.lane.b32.xlu0 %v1065_v13, %s3687_s26 }
 0x302   : > { %1080 = vrot.lane.b32.xlu1 %v1068_v54, %s3687_s26 }
 0x303   : > { %1078 = vrot.lane.b32.xlu0 %v1067_v53, %s3687_s26 }
 0x306   : > { %1084 = vrot.lane.b32.xlu1 %v1070_v46, %s3687_s26 }
 0x307   : > { %1082 = vrot.lane.b32.xlu0 %v1069_v63, %s3687_s26 }
 0x30a   : > { %1104 = vrot.lane.b32.xlu1 %v1064_v0, %s3688_s27 }
 0x30b   : > { %1086 = vrot.lane.b32.xlu0 %v1071_v55, %s3687_s26 }
 0x30e   : > { %1108 = vrot.lane.b32.xlu1 %v1066_v48, %s3688_s27 }
 0x30f   : > { %1106 = vrot.lane.b32.xlu0 %v1065_v13, %s3688_s27 }
 0x312   : > { %1112 = vrot.lane.b32.xlu1 %v1068_v54, %s3688_s27 }
 0x313   : > { %1110 = vrot.lane.b32.xlu0 %v1067_v53, %s3688_s27 }
 0x316   : > { %1116 = vrot.lane.b32.xlu1 %v1070_v46, %s3688_s27 }
 0x317   : > { %1114 = vrot.lane.b32.xlu0 %v1069_v63, %s3688_s27 }
 0x31a   : > { %1136 = vrot.lane.b32.xlu1 %v1064_v0, %s3689_s28 }
 0x31b   : > { %1118 = vrot.lane.b32.xlu0 %v1071_v55, %s3688_s27 }
 0x31e   : > { %1140 = vrot.lane.b32.xlu1 %v1066_v48, %s3689_s28 }
 0x31f   : > { %1138 = vrot.lane.b32.xlu0 %v1065_v13, %s3689_s28 }
 0x322   : > { %1144 = vrot.lane.b32.xlu1 %v1068_v54, %s3689_s28 }
 0x323   : > { %1142 = vrot.lane.b32.xlu0 %v1067_v53, %s3689_s28 }
 0x326   : > { %1148 = vrot.lane.b32.xlu1 %v1070_v46, %s3689_s28 }
 0x327   : > { %1146 = vrot.lane.b32.xlu0 %v1069_v63, %s3689_s28 }
 0x32b   : > { %1150 = vrot.lane.b32.xlu0 %v1071_v55, %s3689_s28 }
 0x369   : > { %v4544_v47 = vpop.permute.xlu1 %993 }
 0x36d   : > { %v4546_v12 = vpop.permute.xlu1 %999 }
 0x36e   : > { %v4548_v0 = vpop.permute.xlu0 %996 }
 0x371   : > { %v4550_v11 = vpop.permute.xlu1 %1005 }
 0x372   : > { %v4552_v48 = vpop.permute.xlu0 %1002 }
 0x375   : > { %v4554_v13 = vpop.permute.xlu1 %1011 }
 0x376   : > { %v4556_v54 = vpop.permute.xlu0 %1008 }
 0x379   : > { %v1073_v53 = vpop.permute.xlu1 %1072 }
 0x37a   : > { %v4558_v46 = vpop.permute.xlu0 %1014  ;;  %vm1088_vm3 = vcmp.ne.s32.totalorder %v1073_v53, 0  ;;  %v6882_v53 = vmov 0 }
 0x37b   : > { %vm1096_vm14 = vmor %vm1056_vm15, %vm1088_vm3 }
 0x37d   : > { %v1077_v63 = vpop.permute.xlu1 %1076 }
 0x37e   : > { %v1075_v44 = vpop.permute.xlu0 %1074  ;;  %vm1090_vm4 = vcmp.ne.s32.totalorder %v1077_v63, 0  ;;  %v6886_v63 = vmov 0 }
 0x37f   : > { %vm1089_vm13 = vcmp.ne.s32.totalorder %v1075_v44, 0  ;;  %vm4566_vm6 = vmor %vm1058_vm5, %vm1090_vm4 }
 0x380   : > { %vm4572_vm10 = vmor %vm1057_vm7, %vm1089_vm13 }
 0x381   : > { %v1081_v55 = vpop.permute.xlu1 %1080  ;;  %v6883_v53 = vsel %vm4572_vm10, 4294967295, %v6882_v53 }
 0x382   : > { %v1079_v43 = vpop.permute.xlu0 %1078  ;;  %vm1092_vm12 = vcmp.ne.s32.totalorder %v1081_v55, 0 }
 0x383   : > { %vm1091_vm11 = vcmp.ne.s32.totalorder %v1079_v43, 0  ;;  %vm4578_vm15 = vmor %vm1060_vm9, %vm1092_vm12  ;;  %vm6888_vm9 = vcmp.eq.s32.totalorder %v4503_v9, 4 }
 0x384   : > { %vm4584_vm5 = vmor %vm1059_vm0, %vm1091_vm11  ;;  %vm6891_vm0 = vcmp.eq.s32.totalorder %v4507_v62, 4 }
 0x385   : > { %v1085_v40 = vpop.permute.xlu1 %1084  ;;  %v6887_v63 = vsel %vm4584_vm5, 4294967295, %v6886_v63 }
 0x386   : > { %v1083_v50 = vpop.permute.xlu0 %1082  ;;  %vm1094_vm3 = vcmp.ne.s32.totalorder %v1085_v40, 0 }
 0x387   : > { %vm1093_vm4 = vcmp.ne.s32.totalorder %v1083_v50, 0  ;;  %vm4590_vm12 = vmor %vm6888_vm9, %vm1094_vm3 }
 0x388   : > { %vm4597_vm11 = vmor %vm6891_vm0, %vm1093_vm4 }
 0x389   : > { %v1105_v39 = vpop.permute.xlu1 %1104 }
 0x38a   : > { %v4560_v8 = vpop.permute.xlu0 %1086  ;;  %vm1120_vm2 = vcmp.ne.s32.totalorder %v1105_v39, 0  ;;  %v6889_v39 = vmov 0 }
 0x38b   : > { %vm1128_vm7 = vmor %vm1096_vm14, %vm1120_vm2  ;;  %v6890_v39 = vsel %vm4590_vm12, 4294967295, %v6889_v39 }
 0x38d   : > { %v1109_v49 = vpop.permute.xlu1 %1108 }
 0x38e   : > { %v1107_v7 = vpop.permute.xlu0 %1106  ;;  %vm1122_vm13 = vcmp.ne.s32.totalorder %v1109_v49, 0 }
 0x38f   : > { %vm1121_vm1 = vcmp.ne.s32.totalorder %v1107_v7, 0  ;;  %vm1130_vm2 = vmor %vm4566_vm6, %vm1122_vm13  ;;  %vm6895_vm6 = vnez %v6887_v63 }
 0x391   : > { %v1113_v38 = vpop.permute.xlu1 %1112 }
 0x392   : > { %v1111_v37 = vpop.permute.xlu0 %1110  ;;  %vm1124_vm3 = vcmp.ne.s32.totalorder %v1113_v38, 0 }
 0x393   : > { %vm1123_vm9 = vcmp.ne.s32.totalorder %v1111_v37, 0  ;;  %vm1132_vm4 = vmor %vm4578_vm15, %vm1124_vm3 }
 0x394   : > { %vm1131_vm13 = vmor %vm6895_vm6, %vm1123_vm9  ;;  %vm1095_vm9 = vcmp.ne.s32.totalorder %v4560_v8, 0  ;;  %vm1244_vm6 = vcmp.eq.s32.totalorder %v4460_v52, 5 }
 0x395   : > { %v1117_v1 = vpop.permute.xlu1 %1116  ;;  %v1252_v8 = vsel %vm1244_vm6, 1, %v6853_v6 }
 0x396   : > { %v1115_v33 = vpop.permute.xlu0 %1114 }
 0x399   : > { %v1137_v43 = vpop.permute.xlu1 %1136 }
 0x39a   : > { %vm1152_vm8 = vcmp.ne.s32.totalorder %v1137_v43, 0  ;;  %v1119_v55 = vpop.permute.xlu0 %1118 }
 0x39b   : > { %vm1160_vm10 = vmor %vm1128_vm7, %vm1152_vm8  ;;  %vm6894_vm8 = vnez %v6883_v53 }
 0x39c   : > { %v1172_v35 = vsel %vm1160_vm10, 1, %v6853_v6  ;;  %vm1129_vm14 = vmor %vm6894_vm8, %vm1121_vm1  ;;  %vm1126_vm1 = vcmp.ne.s32.totalorder %v1117_v1, 0  ;;  %vm1125_vm8 = vcmp.ne.s32.totalorder %v1115_v33, 0 }
 0x39d   : > { %1181 = vperm.xlu1 %3589, %v1172_v35   ;;  %v1141_v7 = vpop.permute.xlu1 %1140 }
 0x39e   : > { %vm1154_vm7 = vcmp.ne.s32.totalorder %v1141_v7, 0  ;;  %v1139_v49 = vpop.permute.xlu0 %1138 }
 0x39f   : > { %vm1162_vm12 = vmor %vm1130_vm2, %vm1154_vm7  ;;  %vm1153_vm10 = vcmp.ne.s32.totalorder %v1139_v49, 0 }
 0x3a0   : > { %vm1161_vm5 = vmor %vm1129_vm14, %vm1153_vm10  ;;  %v1174_v50 = vsel %vm1162_vm12, 1, %v6853_v6  ;;  %vm6896_vm12 = vnez %v6890_v39 }
 0x3a1   : > { %1187 = vperm.xlu1 %3589, %v1174_v50   ;;  %v1145_v3 = vpop.permute.xlu1 %1144  ;;  %v1173_v35 = vsel %vm1161_vm5, 1, %v6853_v6  ;;  %vm1134_vm15 = vmor %vm6896_vm12, %vm1126_vm1  ;;  %vm6897_vm1 = vcmp.eq.s32.totalorder %v4519_v22, 4  ;;  %vm1245_vm12 = vcmp.eq.s32.totalorder %v4475_v10, 5 }
 0x3a2   : > { %vm1156_vm0 = vcmp.ne.s32.totalorder %v1145_v3, 0  ;;  %1184 = vperm.xlu0 %3588, %v1173_v35   ;;  %v1143_v38 = vpop.permute.xlu0 %1142  ;;  %vm1133_vm5 = vmor %vm4597_vm11, %vm1125_vm8  ;;  %v1253_v40 = vsel %vm1245_vm12, 1, %v6853_v6 }
 0x3a3   : > { %vm1164_vm2 = vmor %vm1132_vm4, %vm1156_vm0  ;;  %vm1155_vm7 = vcmp.ne.s32.totalorder %v1143_v38, 0 }
 0x3a4   : > { %vm1163_vm14 = vmor %vm1131_vm13, %vm1155_vm7  ;;  %v1176_v37 = vsel %vm1164_vm2, 1, %v6853_v6  ;;  %vm1127_vm13 = vcmp.ne.s32.totalorder %v1119_v55, 0  ;;  %vm1246_vm7 = vcmp.eq.s32.totalorder %v4471_v5, 5 }
 0x3a5   : > { %1193 = vperm.xlu1 %3589, %v1176_v37   ;;  %v1149_v53 = vpop.permute.xlu1 %1148  ;;  %v1175_v44 = vsel %vm1163_vm14, 1, %v6853_v6  ;;  %vm1103_vm2 = vmor %vm6897_vm1, %vm1095_vm9  ;;  %v1254_v39 = vsel %vm1246_vm7, 1, %v6853_v6  ;;  %vm6717_vm9 = vcmp.eq.s32.totalorder %v4507_v62, 5 }
 0x3a6   : > { %vm1158_vm3 = vcmp.ne.s32.totalorder %v1149_v53, 0  ;;  %1190 = vperm.xlu0 %3588, %v1175_v44   ;;  %v1147_v1 = vpop.permute.xlu0 %1146  ;;  %vm1135_vm11 = vmor %vm1103_vm2, %vm1127_vm13  ;;  %v1257_v3 = vsel %vm6717_vm9, 1, %v6853_v6 }
 0x3a7   : > { %vm1166_vm10 = vmor %vm1134_vm15, %vm1158_vm3  ;;  %vm1157_vm4 = vcmp.ne.s32.totalorder %v1147_v1, 0  ;;  %vm1248_vm15 = vcmp.eq.s32.totalorder %v4487_v45, 5  ;;  %vm6718_vm3 = vcmp.eq.s32.totalorder %v4503_v9, 5 }
 0x3a8   : > { %vm1165_vm0 = vmor %vm1133_vm5, %vm1157_vm4  ;;  %v1178_v33 = vsel %vm1166_vm10, 1, %v6853_v6  ;;  %vm1247_vm5 = vcmp.eq.s32.totalorder %v4491_v51, 5  ;;  %v1256_v7 = vsel %vm1248_vm15, 1, %v6853_v6  ;;  %v1258_v50 = vsel %vm6718_vm3, 1, %v6853_v6 }
 0x3a9   : > { %1199 = vperm.xlu1 %3589, %v1178_v33   ;;  %v1177_v63 = vsel %vm1165_vm0, 1, %v6853_v6  ;;  %v1255_v49 = vsel %vm1247_vm5, 1, %v6853_v6  ;;  %vm6716_vm10 = vcmp.eq.s32.totalorder %v4519_v22, 5 }
 0x3aa   : > { %1196 = vperm.xlu0 %3588, %v1177_v63   ;;  %v1151_v43 = vpop.permute.xlu0 %1150  ;;  %v1259_v35 = vsel %vm6716_vm10, 1, %v6853_v6 }
 0x3ab   : > { %vm1159_vm8 = vcmp.ne.s32.totalorder %v1151_v43, 0 }
 0x3ac   : > { %vm1167_vm14 = vmor %vm1135_vm11, %vm1159_vm8 }
 0x3ad   : > { %v1179_v55 = vsel %vm1167_vm14, 1, %v6853_v6  ;;  %1260 = vrot.lane.b32.xlu1 %v1252_v8, %s3687_s26 }
 0x3ae   : > { %1202 = vperm.xlu0 %3588, %v1179_v55  }
 0x3b1   : > { %1264 = vrot.lane.b32.xlu1 %v1254_v39, %s3687_s26 }
 0x3b2   : > { %1262 = vrot.lane.b32.xlu0 %v1253_v40, %s3687_s26 }
 0x3b5   : > { %1268 = vrot.lane.b32.xlu1 %v1256_v7, %s3687_s26 }
 0x3b6   : > { %1266 = vrot.lane.b32.xlu0 %v1255_v49, %s3687_s26 }
 0x3b9   : > { %1272 = vrot.lane.b32.xlu1 %v1258_v50, %s3687_s26 }
 0x3ba   : > { %1270 = vrot.lane.b32.xlu0 %v1257_v3, %s3687_s26 }
 0x3bd   : > { %1292 = vrot.lane.b32.xlu1 %v1252_v8, %s3688_s27 }
 0x3be   : > { %1274 = vrot.lane.b32.xlu0 %v1259_v35, %s3687_s26 }
 0x3c1   : > { %1296 = vrot.lane.b32.xlu1 %v1254_v39, %s3688_s27 }
 0x3c2   : > { %1294 = vrot.lane.b32.xlu0 %v1253_v40, %s3688_s27 }
 0x3c5   : > { %1300 = vrot.lane.b32.xlu1 %v1256_v7, %s3688_s27 }
 0x3c6   : > { %1298 = vrot.lane.b32.xlu0 %v1255_v49, %s3688_s27 }
 0x3c9   : > { %1304 = vrot.lane.b32.xlu1 %v1258_v50, %s3688_s27 }
 0x3ca   : > { %1302 = vrot.lane.b32.xlu0 %v1257_v3, %s3688_s27 }
 0x3cd   : > { %1324 = vrot.lane.b32.xlu1 %v1252_v8, %s3689_s28 }
 0x3ce   : > { %1306 = vrot.lane.b32.xlu0 %v1259_v35, %s3688_s27 }
 0x3d1   : > { %1328 = vrot.lane.b32.xlu1 %v1254_v39, %s3689_s28 }
 0x3d2   : > { %1326 = vrot.lane.b32.xlu0 %v1253_v40, %s3689_s28 }
 0x3d5   : > { %1332 = vrot.lane.b32.xlu1 %v1256_v7, %s3689_s28 }
 0x3d6   : > { %1330 = vrot.lane.b32.xlu0 %v1255_v49, %s3689_s28 }
 0x3d9   : > { %1336 = vrot.lane.b32.xlu1 %v1258_v50, %s3689_s28 }
 0x3da   : > { %1334 = vrot.lane.b32.xlu0 %v1257_v3, %s3689_s28 }
 0x3de   : > { %1338 = vrot.lane.b32.xlu0 %v1259_v35, %s3689_s28 }
 0x41c   : > { %v4679_v38 = vpop.permute.xlu1 %1181 }
 0x420   : > { %v4681_v37 = vpop.permute.xlu1 %1187 }
 0x421   : > { %v4683_v53 = vpop.permute.xlu0 %1184 }
 0x424   : > { %v4685_v44 = vpop.permute.xlu1 %1193 }
 0x425   : > { %v4687_v1 = vpop.permute.xlu0 %1190 }
 0x428   : > { %v4689_v33 = vpop.permute.xlu1 %1199 }
 0x429   : > { %v4691_v63 = vpop.permute.xlu0 %1196 }
 0x42a   : > { %6898 = vst [vmem:[#allocation37_spill] sm:$0xff] %v4691_v63 }
 0x42c   : > { %v1261_v43 = vpop.permute.xlu1 %1260 }
 0x42d   : > { %v4693_v8 = vpop.permute.xlu0 %1202  ;;  %vm1276_vm4 = vcmp.ne.s32.totalorder %v1261_v43, 0  ;;  %v6902_v43 = vmov 0 }
 0x42e   : > { %6899 = vst [vmem:[#allocation38_spill] sm:$0xff] %v4693_v8  ;;  %vm1284_vm1 = vmor %vm1244_vm6, %vm1276_vm4 }
 0x430   : > { %v1265_v55 = vpop.permute.xlu1 %1264 }
 0x431   : > { %v1263_v39 = vpop.permute.xlu0 %1262  ;;  %vm1278_vm13 = vcmp.ne.s32.totalorder %v1265_v55, 0 }
 0x432   : > { %vm1277_vm0 = vcmp.ne.s32.totalorder %v1263_v39, 0  ;;  %vm4701_vm11 = vmor %vm1246_vm7, %vm1278_vm13  ;;  %v6906_v39 = vmov 0 }
 0x433   : > { %vm4707_vm14 = vmor %vm1245_vm12, %vm1277_vm0 }
 0x434   : > { %v1269_v40 = vpop.permute.xlu1 %1268  ;;  %v6903_v43 = vsel %vm4707_vm14, 4294967295, %v6902_v43 }
 0x435   : > { %v1267_v7 = vpop.permute.xlu0 %1266  ;;  %vm1280_vm2 = vcmp.ne.s32.totalorder %v1269_v40, 0 }
 0x436   : > { %vm1279_vm8 = vcmp.ne.s32.totalorder %v1267_v7, 0  ;;  %vm4713_vm6 = vmor %vm1248_vm15, %vm1280_vm2  ;;  %vm6908_vm15 = vcmp.eq.s32.totalorder %v4503_v9, 5 }
 0x437   : > { %vm4719_vm7 = vmor %vm1247_vm5, %vm1279_vm8  ;;  %vm6911_vm5 = vcmp.eq.s32.totalorder %v4507_v62, 5 }
 0x438   : > { %v1273_v49 = vpop.permute.xlu1 %1272  ;;  %v6907_v39 = vsel %vm4719_vm7, 4294967295, %v6906_v39 }
 0x439   : > { %v1271_v50 = vpop.permute.xlu0 %1270  ;;  %vm1282_vm4 = vcmp.ne.s32.totalorder %v1273_v49, 0 }
 0x43a   : > { %vm1281_vm13 = vcmp.ne.s32.totalorder %v1271_v50, 0  ;;  %vm4725_vm2 = vmor %vm6908_vm15, %vm1282_vm4 }
 0x43b   : > { %vm4732_vm8 = vmor %vm6911_vm5, %vm1281_vm13 }
 0x43c   : > { %v1293_v3 = vpop.permute.xlu1 %1292 }
 0x43d   : > { %v4695_v35 = vpop.permute.xlu0 %1274  ;;  %vm1308_vm10 = vcmp.ne.s32.totalorder %v1293_v3, 0  ;;  %v6909_v3 = vmov 0 }
 0x43e   : > { %vm1316_vm12 = vmor %vm1284_vm1, %vm1308_vm10  ;;  %v6910_v3 = vsel %vm4725_vm2, 4294967295, %v6909_v3 }
 0x440   : > { %v1297_v42 = vpop.permute.xlu1 %1296 }
 0x441   : > { %v1295_v41 = vpop.permute.xlu0 %1294  ;;  %vm1310_vm0 = vcmp.ne.s32.totalorder %v1297_v42, 0 }
 0x442   : > { %vm1309_vm3 = vcmp.ne.s32.totalorder %v1295_v41, 0  ;;  %vm1318_vm10 = vmor %vm4701_vm11, %vm1310_vm0  ;;  %vm6915_vm11 = vnez %v6907_v39 }
 0x444   : > { %v1301_v2 = vpop.permute.xlu1 %1300 }
 0x445   : > { %v1299_v4 = vpop.permute.xlu0 %1298  ;;  %vm1312_vm4 = vcmp.ne.s32.totalorder %v1301_v2, 0 }
 0x446   : > { %vm1311_vm15 = vcmp.ne.s32.totalorder %v1299_v4, 0  ;;  %vm1320_vm13 = vmor %vm4713_vm6, %vm1312_vm4 }
 0x447   : > { %vm1319_vm0 = vmor %vm6915_vm11, %vm1311_vm15  ;;  %vm1283_vm15 = vcmp.ne.s32.totalorder %v4695_v35, 0  ;;  %vm1432_vm11 = vcmp.eq.s32.totalorder %v4460_v52, 6 }
 0x448   : > { %v1305_v34 = vpop.permute.xlu1 %1304  ;;  %v1440_v35 = vsel %vm1432_vm11, 1, %v6853_v6 }
 0x449   : > { %v1303_v8 = vpop.permute.xlu0 %1302 }
 0x44c   : > { %v1325_v40 = vpop.permute.xlu1 %1324 }
 0x44d   : > { %vm1340_vm9 = vcmp.ne.s32.totalorder %v1325_v40, 0  ;;  %v1307_v7 = vpop.permute.xlu0 %1306 }
 0x44e   : > { %vm1348_vm14 = vmor %vm1316_vm12, %vm1340_vm9  ;;  %vm6914_vm9 = vnez %v6903_v43 }
 0x44f   : > { %v1360_v63 = vsel %vm1348_vm14, 1, %v6853_v6  ;;  %vm1317_vm1 = vmor %vm6914_vm9, %vm1309_vm3  ;;  %vm1314_vm3 = vcmp.ne.s32.totalorder %v1305_v34, 0  ;;  %vm1313_vm9 = vcmp.ne.s32.totalorder %v1303_v8, 0 }
 0x450   : > { %1369 = vperm.xlu1 %3589, %v1360_v63   ;;  %v1329_v41 = vpop.permute.xlu1 %1328 }
 0x451   : > { %vm1342_vm12 = vcmp.ne.s32.totalorder %v1329_v41, 0  ;;  %v1327_v42 = vpop.permute.xlu0 %1326 }
 0x452   : > { %vm1350_vm2 = vmor %vm1318_vm10, %vm1342_vm12  ;;  %vm1341_vm14 = vcmp.ne.s32.totalorder %v1327_v42, 0 }
 0x453   : > { %vm1349_vm7 = vmor %vm1317_vm1, %vm1341_vm14  ;;  %v1362_v50 = vsel %vm1350_vm2, 1, %v6853_v6  ;;  %vm6916_vm2 = vnez %v6910_v3 }
 0x454   : > { %1375 = vperm.xlu1 %3589, %v1362_v50   ;;  %v1333_v36 = vpop.permute.xlu1 %1332  ;;  %v1361_v63 = vsel %vm1349_vm7, 1, %v6853_v6  ;;  %vm1322_vm6 = vmor %vm6916_vm2, %vm1314_vm3  ;;  %vm6917_vm3 = vcmp.eq.s32.totalorder %v4519_v22, 5  ;;  %vm1433_vm2 = vcmp.eq.s32.totalorder %v4475_v10, 6 }
 0x455   : > { %vm1344_vm5 = vcmp.ne.s32.totalorder %v1333_v36, 0  ;;  %1372 = vperm.xlu0 %3588, %v1361_v63   ;;  %v1331_v2 = vpop.permute.xlu0 %1330  ;;  %vm1321_vm7 = vmor %vm4732_vm8, %vm1313_vm9  ;;  %v1441_v49 = vsel %vm1433_vm2, 1, %v6853_v6 }
 0x456   : > { %vm1352_vm10 = vmor %vm1320_vm13, %vm1344_vm5  ;;  %vm1343_vm12 = vcmp.ne.s32.totalorder %v1331_v2, 0 }
 0x457   : > { %vm1351_vm1 = vmor %vm1319_vm0, %vm1343_vm12  ;;  %v1364_v4 = vsel %vm1352_vm10, 1, %v6853_v6  ;;  %vm1315_vm0 = vcmp.ne.s32.totalorder %v1307_v7, 0  ;;  %vm1434_vm12 = vcmp.eq.s32.totalorder %v4471_v5, 6 }
 0x458   : > { %1381 = vperm.xlu1 %3589, %v1364_v4   ;;  %v1337_v43 = vpop.permute.xlu1 %1336  ;;  %v1363_v55 = vsel %vm1351_vm1, 1, %v6853_v6  ;;  %vm1291_vm10 = vmor %vm6917_vm3, %vm1283_vm15  ;;  %v1442_v3 = vsel %vm1434_vm12, 1, %v6853_v6  ;;  %vm6720_vm15 = vcmp.eq.s32.totalorder %v4507_v62, 6 }
 0x459   : > { %vm1346_vm4 = vcmp.ne.s32.totalorder %v1337_v43, 0  ;;  %1378 = vperm.xlu0 %3588, %v1363_v55   ;;  %v1335_v34 = vpop.permute.xlu0 %1334  ;;  %vm1323_vm8 = vmor %vm1291_vm10, %vm1315_vm0  ;;  %v1445_v36 = vsel %vm6720_vm15, 1, %v6853_v6 }
 0x45a   : > { %vm1354_vm14 = vmor %vm1322_vm6, %vm1346_vm4  ;;  %vm1345_vm13 = vcmp.ne.s32.totalorder %v1335_v34, 0  ;;  %vm1436_vm6 = vcmp.eq.s32.totalorder %v4487_v45, 6  ;;  %vm6721_vm4 = vcmp.eq.s32.totalorder %v4503_v9, 6 }
 0x45b   : > { %vm1353_vm5 = vmor %vm1321_vm7, %vm1345_vm13  ;;  %v1366_v8 = vsel %vm1354_vm14, 1, %v6853_v6  ;;  %vm1435_vm7 = vcmp.eq.s32.totalorder %v4491_v51, 6  ;;  %v1444_v41 = vsel %vm1436_vm6, 1, %v6853_v6  ;;  %v1446_v50 = vsel %vm6721_vm4, 1, %v6853_v6 }
 0x45c   : > { %1387 = vperm.xlu1 %3589, %v1366_v8   ;;  %v1365_v39 = vsel %vm1353_vm5, 1, %v6853_v6  ;;  %v1443_v42 = vsel %vm1435_vm7, 1, %v6853_v6  ;;  %vm6719_vm14 = vcmp.eq.s32.totalorder %v4519_v22, 6 }
 0x45d   : > { %1384 = vperm.xlu0 %3588, %v1365_v39   ;;  %v1339_v40 = vpop.permute.xlu0 %1338  ;;  %v1447_v63 = vsel %vm6719_vm14, 1, %v6853_v6 }
 0x45e   : > { %vm1347_vm9 = vcmp.ne.s32.totalorder %v1339_v40, 0 }
 0x45f   : > { %vm1355_vm1 = vmor %vm1323_vm8, %vm1347_vm9 }
 0x460   : > { %v1367_v7 = vsel %vm1355_vm1, 1, %v6853_v6  ;;  %1448 = vrot.lane.b32.xlu1 %v1440_v35, %s3687_s26 }
 0x461   : > { %1390 = vperm.xlu0 %3588, %v1367_v7  }
 0x464   : > { %1452 = vrot.lane.b32.xlu1 %v1442_v3, %s3687_s26 }
 0x465   : > { %1450 = vrot.lane.b32.xlu0 %v1441_v49, %s3687_s26 }
 0x468   : > { %1456 = vrot.lane.b32.xlu1 %v1444_v41, %s3687_s26 }
 0x469   : > { %1454 = vrot.lane.b32.xlu0 %v1443_v42, %s3687_s26 }
 0x46c   : > { %1460 = vrot.lane.b32.xlu1 %v1446_v50, %s3687_s26 }
 0x46d   : > { %1458 = vrot.lane.b32.xlu0 %v1445_v36, %s3687_s26 }
 0x470   : > { %1480 = vrot.lane.b32.xlu1 %v1440_v35, %s3688_s27 }
 0x471   : > { %1462 = vrot.lane.b32.xlu0 %v1447_v63, %s3687_s26 }
 0x474   : > { %1484 = vrot.lane.b32.xlu1 %v1442_v3, %s3688_s27 }
 0x475   : > { %1482 = vrot.lane.b32.xlu0 %v1441_v49, %s3688_s27 }
 0x478   : > { %1488 = vrot.lane.b32.xlu1 %v1444_v41, %s3688_s27 }
 0x479   : > { %1486 = vrot.lane.b32.xlu0 %v1443_v42, %s3688_s27 }
 0x47c   : > { %1492 = vrot.lane.b32.xlu1 %v1446_v50, %s3688_s27 }
 0x47d   : > { %1490 = vrot.lane.b32.xlu0 %v1445_v36, %s3688_s27 }
 0x480   : > { %1512 = vrot.lane.b32.xlu1 %v1440_v35, %s3689_s28 }
 0x481   : > { %1494 = vrot.lane.b32.xlu0 %v1447_v63, %s3688_s27 }
 0x484   : > { %1516 = vrot.lane.b32.xlu1 %v1442_v3, %s3689_s28 }
 0x485   : > { %1514 = vrot.lane.b32.xlu0 %v1441_v49, %s3689_s28 }
 0x488   : > { %1520 = vrot.lane.b32.xlu1 %v1444_v41, %s3689_s28 }
 0x489   : > { %1518 = vrot.lane.b32.xlu0 %v1443_v42, %s3689_s28 }
 0x48c   : > { %1524 = vrot.lane.b32.xlu1 %v1446_v50, %s3689_s28 }
 0x48d   : > { %1522 = vrot.lane.b32.xlu0 %v1445_v36, %s3689_s28 }
 0x491   : > { %1526 = vrot.lane.b32.xlu0 %v1447_v63, %s3689_s28 }
 0x4cf   : > { %v4814_v2 = vpop.permute.xlu1 %1369 }
 0x4d0   : > { %6918 = vst [vmem:[#allocation39_spill] sm:$0xff] %v4814_v2 }
 0x4d3   : > { %v4816_v4 = vpop.permute.xlu1 %1375 }
 0x4d4   : > { %6919 = vst [vmem:[#allocation40_spill] sm:$0xff] %v4816_v4  ;;  %v4818_v43 = vpop.permute.xlu0 %1372 }
 0x4d5   : > { %6920 = vst [vmem:[#allocation41_spill] sm:$0xff] %v4818_v43 }
 0x4d7   : > { %v4820_v55 = vpop.permute.xlu1 %1381 }
 0x4d8   : > { %6921 = vst [vmem:[#allocation42_spill] sm:$0xff] %v4820_v55  ;;  %v4822_v34 = vpop.permute.xlu0 %1378 }
 0x4d9   : > { %6922 = vst [vmem:[#allocation43_spill] sm:$0xff] %v4822_v34 }
 0x4db   : > { %v4824_v8 = vpop.permute.xlu1 %1387 }
 0x4dc   : > { %6923 = vst [vmem:[#allocation44_spill] sm:$0xff] %v4824_v8  ;;  %v4826_v39 = vpop.permute.xlu0 %1384 }
 0x4dd   : > { %6924 = vst [vmem:[#allocation45_spill] sm:$0xff] %v4826_v39 }
 0x4df   : > { %v1449_v40 = vpop.permute.xlu1 %1448 }
 0x4e0   : > { %v4828_v35 = vpop.permute.xlu0 %1390  ;;  %vm1464_vm13 = vcmp.ne.s32.totalorder %v1449_v40, 0  ;;  %v6928_v40 = vmov 0 }
 0x4e1   : > { %6925 = vst [vmem:[#allocation46_spill] sm:$0xff] %v4828_v35  ;;  %vm1472_vm3 = vmor %vm1432_vm11, %vm1464_vm13 }
 0x4e3   : > { %v1453_v7 = vpop.permute.xlu1 %1452 }
 0x4e4   : > { %v1451_v3 = vpop.permute.xlu0 %1450  ;;  %vm1466_vm0 = vcmp.ne.s32.totalorder %v1453_v7, 0 }
 0x4e5   : > { %vm1465_vm5 = vcmp.ne.s32.totalorder %v1451_v3, 0  ;;  %vm4836_vm8 = vmor %vm1434_vm12, %vm1466_vm0  ;;  %v6932_v3 = vmov 0 }
 0x4e6   : > { %vm4842_vm1 = vmor %vm1433_vm2, %vm1465_vm5 }
 0x4e7   : > { %v1457_v49 = vpop.permute.xlu1 %1456  ;;  %v6929_v40 = vsel %vm4842_vm1, 4294967295, %v6928_v40 }
 0x4e8   : > { %v1455_v41 = vpop.permute.xlu0 %1454  ;;  %vm1468_vm10 = vcmp.ne.s32.totalorder %v1457_v49, 0 }
 0x4e9   : > { %vm1467_vm9 = vcmp.ne.s32.totalorder %v1455_v41, 0  ;;  %vm4848_vm11 = vmor %vm1436_vm6, %vm1468_vm10  ;;  %vm6934_vm6 = vcmp.eq.s32.totalorder %v4503_v9, 6 }
 0x4ea   : > { %vm4854_vm12 = vmor %vm1435_vm7, %vm1467_vm9  ;;  %vm6937_vm7 = vcmp.eq.s32.totalorder %v4507_v62, 6 }
 0x4eb   : > { %v1461_v42 = vpop.permute.xlu1 %1460  ;;  %v6933_v3 = vsel %vm4854_vm12, 4294967295, %v6932_v3 }
 0x4ec   : > { %v1459_v50 = vpop.permute.xlu0 %1458  ;;  %vm1470_vm13 = vcmp.ne.s32.totalorder %v1461_v42, 0 }
 0x4ed   : > { %vm1469_vm0 = vcmp.ne.s32.totalorder %v1459_v50, 0  ;;  %vm4860_vm10 = vmor %vm6934_vm6, %vm1470_vm13 }
 0x4ee   : > { %vm4867_vm9 = vmor %vm6937_vm7, %vm1469_vm0 }
 0x4ef   : > { %v1481_v36 = vpop.permute.xlu1 %1480 }
 0x4f0   : > { %v4830_v63 = vpop.permute.xlu0 %1462  ;;  %vm1496_vm14 = vcmp.ne.s32.totalorder %v1481_v36, 0  ;;  %v6935_v36 = vmov 0 }
 0x4f1   : > { %vm1504_vm2 = vmor %vm1472_vm3, %vm1496_vm14  ;;  %v6936_v36 = vsel %vm4860_vm10, 4294967295, %v6935_v36 }
 0x4f3   : > { %v1485_v43 = vpop.permute.xlu1 %1484 }
 0x4f4   : > { %v1483_v55 = vpop.permute.xlu0 %1482  ;;  %vm1498_vm5 = vcmp.ne.s32.totalorder %v1485_v43, 0 }
 0x4f5   : > { %vm1497_vm4 = vcmp.ne.s32.totalorder %v1483_v55, 0  ;;  %vm1506_vm14 = vmor %vm4836_vm8, %vm1498_vm5  ;;  %vm6941_vm8 = vnez %v6933_v3 }
 0x4f7   : > { %v1489_v4 = vpop.permute.xlu1 %1488 }
 0x4f8   : > { %v1487_v34 = vpop.permute.xlu0 %1486  ;;  %vm1500_vm13 = vcmp.ne.s32.totalorder %v1489_v4, 0 }
 0x4f9   : > { %vm1499_vm6 = vcmp.ne.s32.totalorder %v1487_v34, 0  ;;  %vm1508_vm0 = vmor %vm4848_vm11, %vm1500_vm13 }
 0x4fa   : > { %vm1507_vm5 = vmor %vm6941_vm8, %vm1499_vm6  ;;  %vm1471_vm6 = vcmp.ne.s32.totalorder %v4830_v63, 0  ;;  %vm1620_vm8 = vcmp.eq.s32.totalorder %v4460_v52, 7  ;;  %v5039_v52 = vld [vmem:[%s3767_s25 + $0x8] sm:$0xff] }
 0x4fb   : > { %v1493_v35 = vpop.permute.xlu1 %1492  ;;  %v1628_v63 = vsel %vm1620_vm8, 1, %v6853_v6 }
 0x4fc   : > { %v1491_v8 = vpop.permute.xlu0 %1490 }
 0x4ff   : > { %v1513_v49 = vpop.permute.xlu1 %1512 }
 0x500   : > { %vm1528_vm15 = vcmp.ne.s32.totalorder %v1513_v49, 0  ;;  %v1495_v41 = vpop.permute.xlu0 %1494 }
 0x501   : > { %vm1536_vm1 = vmor %vm1504_vm2, %vm1528_vm15  ;;  %vm6940_vm15 = vnez %v6929_v40 }
 0x502   : > { %v1548_v2 = vsel %vm1536_vm1, 1, %v6853_v6  ;;  %vm1505_vm3 = vmor %vm6940_vm15, %vm1497_vm4  ;;  %vm1502_vm4 = vcmp.ne.s32.totalorder %v1493_v35, 0  ;;  %vm1501_vm15 = vcmp.ne.s32.totalorder %v1491_v8, 0 }
 0x503   : > { %1557 = vperm.xlu1 %3589, %v1548_v2   ;;  %v1517_v43 = vpop.permute.xlu1 %1516 }
 0x504   : > { %vm1530_vm2 = vcmp.ne.s32.totalorder %v1517_v43, 0  ;;  %v1515_v55 = vpop.permute.xlu0 %1514 }
 0x505   : > { %vm1538_vm10 = vmor %vm1506_vm14, %vm1530_vm2  ;;  %vm1529_vm1 = vcmp.ne.s32.totalorder %v1515_v55, 0 }
 0x506   : > { %vm1537_vm12 = vmor %vm1505_vm3, %vm1529_vm1  ;;  %v1550_v50 = vsel %vm1538_vm10, 1, %v6853_v6  ;;  %vm6942_vm10 = vnez %v6936_v36 }
 0x507   : > { %1563 = vperm.xlu1 %3589, %v1550_v50   ;;  %v1521_v39 = vpop.permute.xlu1 %1520  ;;  %v1549_v2 = vsel %vm1537_vm12, 1, %v6853_v6  ;;  %vm1510_vm11 = vmor %vm6942_vm10, %vm1502_vm4  ;;  %vm6943_vm4 = vcmp.eq.s32.totalorder %v4519_v22, 6  ;;  %vm1621_vm10 = vcmp.eq.s32.totalorder %v4475_v10, 7 }
 0x508   : > { %vm1532_vm7 = vcmp.ne.s32.totalorder %v1521_v39, 0  ;;  %1560 = vperm.xlu0 %3588, %v1549_v2   ;;  %v1519_v4 = vpop.permute.xlu0 %1518  ;;  %vm1509_vm12 = vmor %vm4867_vm9, %vm1501_vm15  ;;  %v1629_v42 = vsel %vm1621_vm10, 1, %v6853_v6 }
 0x509   : > { %vm1540_vm14 = vmor %vm1508_vm0, %vm1532_vm7  ;;  %vm1531_vm2 = vcmp.ne.s32.totalorder %v1519_v4, 0 }
 0x50a   : > { %vm1539_vm3 = vmor %vm1507_vm5, %vm1531_vm2  ;;  %v1552_v34 = vsel %vm1540_vm14, 1, %v6853_v6  ;;  %vm1503_vm5 = vcmp.ne.s32.totalorder %v1495_v41, 0  ;;  %vm1622_vm2 = vcmp.eq.s32.totalorder %v4471_v5, 7  ;;  %v6958_v5 = vmov 0 }
 0x50b   : > { %1569 = vperm.xlu1 %3589, %v1552_v34   ;;  %v1525_v40 = vpop.permute.xlu1 %1524  ;;  %v1551_v7 = vsel %vm1539_vm3, 1, %v6853_v6  ;;  %vm1479_vm14 = vmor %vm6943_vm4, %vm1471_vm6  ;;  %v1630_v36 = vsel %vm1622_vm2, 1, %v6853_v6  ;;  %vm6723_vm6 = vcmp.eq.s32.totalorder %v4507_v62, 7 }
 0x50c   : > { %vm1534_vm13 = vcmp.ne.s32.totalorder %v1525_v40, 0  ;;  %1566 = vperm.xlu0 %3588, %v1551_v7   ;;  %v1523_v35 = vpop.permute.xlu0 %1522  ;;  %vm1511_vm9 = vmor %vm1479_vm14, %vm1503_vm5  ;;  %v1633_v39 = vsel %vm6723_vm6, 1, %v6853_v6 }
 0x50d   : > { %vm1542_vm1 = vmor %vm1510_vm11, %vm1534_vm13  ;;  %vm1533_vm0 = vcmp.ne.s32.totalorder %v1523_v35, 0  ;;  %vm1624_vm11 = vcmp.eq.s32.totalorder %v4487_v45, 7  ;;  %vm6724_vm13 = vcmp.eq.s32.totalorder %v4503_v9, 7  ;;  %v6961_v45 = vmov 0 }
 0x50e   : > { %vm1541_vm7 = vmor %vm1509_vm12, %vm1533_vm0  ;;  %v1554_v8 = vsel %vm1542_vm1, 1, %v6853_v6  ;;  %vm1623_vm12 = vcmp.eq.s32.totalorder %v4491_v51, 7  ;;  %v1632_v43 = vsel %vm1624_vm11, 1, %v6853_v6  ;;  %v1634_v50 = vsel %vm6724_vm13, 1, %v6853_v6 }
 0x50f   : > { %1575 = vperm.xlu1 %3589, %v1554_v8   ;;  %v1553_v3 = vsel %vm1541_vm7, 1, %v6853_v6  ;;  %v1631_v55 = vsel %vm1623_vm12, 1, %v6853_v6  ;;  %vm6722_vm1 = vcmp.eq.s32.totalorder %v4519_v22, 7 }
 0x510   : > { %1572 = vperm.xlu0 %3588, %v1553_v3   ;;  %v1527_v49 = vpop.permute.xlu0 %1526  ;;  %v1635_v2 = vsel %vm6722_vm1, 1, %v6853_v6 }
 0x511   : > { %vm1535_vm15 = vcmp.ne.s32.totalorder %v1527_v49, 0 }
 0x512   : > { %vm1543_vm3 = vmor %vm1511_vm9, %vm1535_vm15 }
 0x513   : > { %v1555_v41 = vsel %vm1543_vm3, 1, %v6853_v6  ;;  %1636 = vrot.lane.b32.xlu1 %v1628_v63, %s3687_s26 }
 0x514   : > { %1578 = vperm.xlu0 %3588, %v1555_v41  }
 0x517   : > { %1640 = vrot.lane.b32.xlu1 %v1630_v36, %s3687_s26 }
 0x518   : > { %1638 = vrot.lane.b32.xlu0 %v1629_v42, %s3687_s26 }
 0x51b   : > { %1644 = vrot.lane.b32.xlu1 %v1632_v43, %s3687_s26 }
 0x51c   : > { %1642 = vrot.lane.b32.xlu0 %v1631_v55, %s3687_s26 }
 0x51f   : > { %1648 = vrot.lane.b32.xlu1 %v1634_v50, %s3687_s26 }
 0x520   : > { %1646 = vrot.lane.b32.xlu0 %v1633_v39, %s3687_s26 }
 0x523   : > { %1668 = vrot.lane.b32.xlu1 %v1628_v63, %s3688_s27 }
 0x524   : > { %1650 = vrot.lane.b32.xlu0 %v1635_v2, %s3687_s26 }
 0x527   : > { %1672 = vrot.lane.b32.xlu1 %v1630_v36, %s3688_s27 }
 0x528   : > { %1670 = vrot.lane.b32.xlu0 %v1629_v42, %s3688_s27 }
 0x52b   : > { %1676 = vrot.lane.b32.xlu1 %v1632_v43, %s3688_s27 }
 0x52c   : > { %1674 = vrot.lane.b32.xlu0 %v1631_v55, %s3688_s27 }
 0x52f   : > { %1680 = vrot.lane.b32.xlu1 %v1634_v50, %s3688_s27 }
 0x530   : > { %1678 = vrot.lane.b32.xlu0 %v1633_v39, %s3688_s27 }
 0x533   : > { %1700 = vrot.lane.b32.xlu1 %v1628_v63, %s3689_s28 }
 0x534   : > { %1682 = vrot.lane.b32.xlu0 %v1635_v2, %s3688_s27 }
 0x537   : > { %1704 = vrot.lane.b32.xlu1 %v1630_v36, %s3689_s28 }
 0x538   : > { %1702 = vrot.lane.b32.xlu0 %v1629_v42, %s3689_s28 }
 0x53b   : > { %1708 = vrot.lane.b32.xlu1 %v1632_v43, %s3689_s28 }
 0x53c   : > { %1706 = vrot.lane.b32.xlu0 %v1631_v55, %s3689_s28 }
 0x53f   : > { %1712 = vrot.lane.b32.xlu1 %v1634_v50, %s3689_s28 }
 0x540   : > { %1710 = vrot.lane.b32.xlu0 %v1633_v39, %s3689_s28 }
 0x544   : > { %1714 = vrot.lane.b32.xlu0 %v1635_v2, %s3689_s28 }
 0x582   : > { %v4949_v4 = vpop.permute.xlu1 %1557 }
 0x583   : > { %6944 = vst [vmem:[#allocation47_spill] sm:$0xff] %v4949_v4 }
 0x586   : > { %v4951_v34 = vpop.permute.xlu1 %1563 }
 0x587   : > { %6945 = vst [vmem:[#allocation48_spill] sm:$0xff] %v4951_v34  ;;  %v4953_v40 = vpop.permute.xlu0 %1560 }
 0x588   : > { %6946 = vst [vmem:[#allocation49_spill] sm:$0xff] %v4953_v40 }
 0x58a   : > { %v4955_v7 = vpop.permute.xlu1 %1569 }
 0x58b   : > { %6947 = vst [vmem:[#allocation50_spill] sm:$0xff] %v4955_v7  ;;  %v4957_v35 = vpop.permute.xlu0 %1566 }
 0x58c   : > { %6948 = vst [vmem:[#allocation51_spill] sm:$0xff] %v4957_v35 }
 0x58e   : > { %v4959_v8 = vpop.permute.xlu1 %1575 }
 0x58f   : > { %6949 = vst [vmem:[#allocation52_spill] sm:$0xff] %v4959_v8  ;;  %v4961_v3 = vpop.permute.xlu0 %1572 }
 0x590   : > { %6950 = vst [vmem:[#allocation53_spill] sm:$0xff] %v4961_v3 }
 0x592   : > { %v1637_v49 = vpop.permute.xlu1 %1636 }
 0x593   : > { %v4963_v63 = vpop.permute.xlu0 %1578  ;;  %vm1652_vm0 = vcmp.ne.s32.totalorder %v1637_v49, 0  ;;  %v6954_v49 = vmov 0 }
 0x594   : > { %6951 = vst [vmem:[#allocation54_spill] sm:$0xff] %v4963_v63  ;;  %vm1660_vm4 = vmor %vm1620_vm8, %vm1652_vm0 }
 0x596   : > { %v1641_v41 = vpop.permute.xlu1 %1640 }
 0x597   : > { %v1639_v36 = vpop.permute.xlu0 %1638  ;;  %vm1654_vm5 = vcmp.ne.s32.totalorder %v1641_v41, 0 }
 0x598   : > { %vm1653_vm7 = vcmp.ne.s32.totalorder %v1639_v36, 0  ;;  %vm4971_vm9 = vmor %vm1622_vm2, %vm1654_vm5 }
 0x599   : > { %vm4977_vm3 = vmor %vm1621_vm10, %vm1653_vm7 }
 0x59a   : > { %v1645_v42 = vpop.permute.xlu1 %1644  ;;  %v6955_v49 = vsel %vm4977_vm3, 4294967295, %v6954_v49 }
 0x59b   : > { %v1643_v43 = vpop.permute.xlu0 %1642  ;;  %vm1656_vm14 = vcmp.ne.s32.totalorder %v1645_v42, 0 }
 0x59c   : > { %vm1655_vm15 = vcmp.ne.s32.totalorder %v1643_v43, 0  ;;  %vm4983_vm8 = vmor %vm1624_vm11, %vm1656_vm14  ;;  %vm6960_vm11 = vcmp.eq.s32.totalorder %v4503_v9, 7 }
 0x59d   : > { %vm4989_vm2 = vmor %vm1623_vm12, %vm1655_vm15  ;;  %vm6963_vm12 = vcmp.eq.s32.totalorder %v4507_v62, 7 }
 0x59e   : > { %v1649_v55 = vpop.permute.xlu1 %1648  ;;  %v6959_v5 = vsel %vm4989_vm2, 4294967295, %v6958_v5 }
 0x59f   : > { %v1647_v50 = vpop.permute.xlu0 %1646  ;;  %vm1658_vm0 = vcmp.ne.s32.totalorder %v1649_v55, 0 }
 0x5a0   : > { %vm1657_vm5 = vcmp.ne.s32.totalorder %v1647_v50, 0  ;;  %vm4995_vm14 = vmor %vm6960_vm11, %vm1658_vm0 }
 0x5a1   : > { %v6962_v45 = vsel %vm4995_vm14, 4294967295, %v6961_v45  ;;  %vm5002_vm15 = vmor %vm6963_vm12, %vm1657_vm5 }
 0x5a2   : > { %v1669_v39 = vpop.permute.xlu1 %1668 }
 0x5a3   : > { %v4965_v2 = vpop.permute.xlu0 %1650  ;;  %vm1684_vm1 = vcmp.ne.s32.totalorder %v1669_v39, 0 }
 0x5a4   : > { %vm1692_vm10 = vmor %vm1660_vm4, %vm1684_vm1 }
 0x5a6   : > { %v1673_v40 = vpop.permute.xlu1 %1672 }
 0x5a7   : > { %v1671_v7 = vpop.permute.xlu0 %1670  ;;  %vm1686_vm7 = vcmp.ne.s32.totalorder %v1673_v40, 0 }
 0x5a8   : > { %vm1685_vm13 = vcmp.ne.s32.totalorder %v1671_v7, 0  ;;  %vm1694_vm1 = vmor %vm4971_vm9, %vm1686_vm7  ;;  %vm6967_vm9 = vnez %v6959_v5 }
 0x5aa   : > { %v1677_v34 = vpop.permute.xlu1 %1676 }
 0x5ab   : > { %v1675_v35 = vpop.permute.xlu0 %1674  ;;  %vm1688_vm0 = vcmp.ne.s32.totalorder %v1677_v34, 0 }
 0x5ac   : > { %vm1687_vm11 = vcmp.ne.s32.totalorder %v1675_v35, 0  ;;  %vm1696_vm5 = vmor %vm4983_vm8, %vm1688_vm0  ;;  %vm6968_vm8 = vnez %v6962_v45  ;;  %v5055_v45 = vld [vmem:[%s3767_s25 + $0x18] sm:$0xff] }
 0x5ad   : > { %vm1695_vm7 = vmor %vm6967_vm9, %vm1687_vm11  ;;  %vm1659_vm11 = vcmp.ne.s32.totalorder %v4965_v2, 0 }
 0x5ae   : > { %v1681_v63 = vpop.permute.xlu1 %1680 }
 0x5af   : > { %v1679_v8 = vpop.permute.xlu0 %1678 }
 0x5b2   : > { %v1701_v41 = vpop.permute.xlu1 %1700 }
 0x5b3   : > { %vm1716_vm6 = vcmp.ne.s32.totalorder %v1701_v41, 0  ;;  %v1683_v10 = vpop.permute.xlu0 %1682 }
 0x5b4   : > { %vm1724_vm3 = vmor %vm1692_vm10, %vm1716_vm6  ;;  %vm6966_vm6 = vnez %v6955_v49  ;;  %v5035_v49 = vld [vmem:[%s3767_s25 + $0x10] sm:$0xff] }
 0x5b5   : > { %v1736_v51 = vsel %vm1724_vm3, 1, %v6853_v6  ;;  %vm1693_vm4 = vmor %vm6966_vm6, %vm1685_vm13  ;;  %vm1690_vm13 = vcmp.ne.s32.totalorder %v1681_v63, 0  ;;  %vm1689_vm6 = vcmp.ne.s32.totalorder %v1679_v8, 0  ;;  %v5024_v8 = vld [vmem:[%s3767_s25] sm:$0xff] }
 0x5b6   : > { %1745 = vperm.xlu1 %3589, %v1736_v51   ;;  %v1705_v40 = vpop.permute.xlu1 %1704  ;;  %vm1808_vm9 = vcmp.eq.s32.totalorder %v5024_v8, 8 }
 0x5b7   : > { %vm1718_vm10 = vcmp.ne.s32.totalorder %v1705_v40, 0  ;;  %v1703_v9 = vpop.permute.xlu0 %1702  ;;  %v1816_v2 = vsel %vm1808_vm9, 1, %v6853_v6  ;;  %v5067_v40 = vld [vmem:[%s3767_s25 + $0x30] sm:$0xff] }
 0x5b8   : > { %vm1726_vm14 = vmor %vm1694_vm1, %vm1718_vm10  ;;  %vm1717_vm3 = vcmp.ne.s32.totalorder %v1703_v9, 0  ;;  %v5071_v9 = vld [vmem:[%s3767_s25 + $0x28] sm:$0xff] }
 0x5b9   : > { %vm1725_vm2 = vmor %vm1693_vm4, %vm1717_vm3  ;;  %v1738_v62 = vsel %vm1726_vm14, 1, %v6853_v6 }
 0x5ba   : > { %1751 = vperm.xlu1 %3589, %v1738_v62   ;;  %v1709_v7 = vpop.permute.xlu1 %1708  ;;  %v1737_v3 = vsel %vm1725_vm2, 1, %v6853_v6  ;;  %vm1698_vm14 = vmor %vm6968_vm8, %vm1690_vm13  ;;  %vm1809_vm8 = vcmp.eq.s32.totalorder %v5039_v52, 8 }
 0x5bb   : > { %vm1720_vm12 = vcmp.ne.s32.totalorder %v1709_v7, 0  ;;  %1748 = vperm.xlu0 %3588, %v1737_v3   ;;  %v1707_v34 = vpop.permute.xlu0 %1706  ;;  %vm1697_vm2 = vmor %vm5002_vm15, %vm1689_vm6  ;;  %vm6969_vm15 = vcmp.eq.s32.totalorder %v4519_v22, 7  ;;  %v1817_v41 = vsel %vm1809_vm8, 1, %v6853_v6  ;;  %v5083_v3 = vld [vmem:[%s3767_s25 + $0x38] sm:$0xff] }
 0x5bc   : > { %vm1728_vm1 = vmor %vm1696_vm5, %vm1720_vm12  ;;  %vm1719_vm4 = vcmp.ne.s32.totalorder %v1707_v34, 0 }
 0x5bd   : > { %vm1727_vm10 = vmor %vm1695_vm7, %vm1719_vm4  ;;  %v1740_v35 = vsel %vm1728_vm1, 1, %v6853_v6  ;;  %vm1691_vm7 = vcmp.ne.s32.totalorder %v1683_v10, 0  ;;  %vm1810_vm4 = vcmp.eq.s32.totalorder %v5035_v49, 8  ;;  %v5051_v10 = vld [vmem:[%s3767_s25 + $0x20] sm:$0xff] }
 0x5be   : > { %1757 = vperm.xlu1 %3589, %v1740_v35   ;;  %v1713_v42 = vpop.permute.xlu1 %1712  ;;  %v1739_v43 = vsel %vm1727_vm10, 1, %v6853_v6  ;;  %vm1667_vm12 = vmor %vm6969_vm15, %vm1659_vm11  ;;  %v1818_v5 = vsel %vm1810_vm4, 1, %v6853_v6  ;;  %vm6726_vm11 = vcmp.eq.s32.totalorder %v5071_v9, 8 }
 0x5bf   : > { %vm1722_vm0 = vcmp.ne.s32.totalorder %v1713_v42, 0  ;;  %1754 = vperm.xlu0 %3588, %v1739_v43   ;;  %v1711_v63 = vpop.permute.xlu0 %1710  ;;  %vm1699_vm6 = vmor %vm1667_vm12, %vm1691_vm7  ;;  %v1821_v7 = vsel %vm6726_vm11, 1, %v6853_v6 }
 0x5c0   : > { %vm1730_vm3 = vmor %vm1698_vm14, %vm1722_vm0  ;;  %vm1721_vm5 = vcmp.ne.s32.totalorder %v1711_v63, 0  ;;  %vm1812_vm14 = vcmp.eq.s32.totalorder %v5051_v10, 8  ;;  %vm6727_vm0 = vcmp.eq.s32.totalorder %v5067_v40, 8 }
 0x5c1   : > { %vm1729_vm13 = vmor %vm1697_vm2, %vm1721_vm5  ;;  %v1742_v55 = vsel %vm1730_vm3, 1, %v6853_v6  ;;  %vm1811_vm2 = vcmp.eq.s32.totalorder %v5055_v45, 8  ;;  %v1820_v51 = vsel %vm1812_vm14, 1, %v6853_v6  ;;  %v1822_v62 = vsel %vm6727_vm0, 1, %v6853_v6 }
 0x5c2   : > { %1763 = vperm.xlu1 %3589, %v1742_v55   ;;  %v1741_v50 = vsel %vm1729_vm13, 1, %v6853_v6  ;;  %v1819_v36 = vsel %vm1811_vm2, 1, %v6853_v6  ;;  %vm6725_vm3 = vcmp.eq.s32.totalorder %v5083_v3, 8 }
 0x5c3   : > { %1760 = vperm.xlu0 %3588, %v1741_v50   ;;  %v1715_v39 = vpop.permute.xlu0 %1714  ;;  %v1823_v34 = vsel %vm6725_vm3, 1, %v6853_v6 }
 0x5c4   : > { %vm1723_vm1 = vcmp.ne.s32.totalorder %v1715_v39, 0 }
 0x5c5   : > { %vm1731_vm10 = vmor %vm1699_vm6, %vm1723_vm1 }
 0x5c6   : > { %v1743_v22 = vsel %vm1731_vm10, 1, %v6853_v6  ;;  %1824 = vrot.lane.b32.xlu1 %v1816_v2, %s3687_s26 }
 0x5c7   : > { %1766 = vperm.xlu0 %3588, %v1743_v22  }
 0x5ca   : > { %1828 = vrot.lane.b32.xlu1 %v1818_v5, %s3687_s26 }
 0x5cb   : > { %1826 = vrot.lane.b32.xlu0 %v1817_v41, %s3687_s26 }
 0x5ce   : > { %1832 = vrot.lane.b32.xlu1 %v1820_v51, %s3687_s26 }
 0x5cf   : > { %1830 = vrot.lane.b32.xlu0 %v1819_v36, %s3687_s26 }
 0x5d2   : > { %1836 = vrot.lane.b32.xlu1 %v1822_v62, %s3687_s26 }
 0x5d3   : > { %1834 = vrot.lane.b32.xlu0 %v1821_v7, %s3687_s26 }
 0x5d6   : > { %1856 = vrot.lane.b32.xlu1 %v1816_v2, %s3688_s27 }
 0x5d7   : > { %1838 = vrot.lane.b32.xlu0 %v1823_v34, %s3687_s26 }
 0x5da   : > { %1860 = vrot.lane.b32.xlu1 %v1818_v5, %s3688_s27 }
 0x5db   : > { %1858 = vrot.lane.b32.xlu0 %v1817_v41, %s3688_s27 }
 0x5de   : > { %1864 = vrot.lane.b32.xlu1 %v1820_v51, %s3688_s27 }
 0x5df   : > { %1862 = vrot.lane.b32.xlu0 %v1819_v36, %s3688_s27 }
 0x5e2   : > { %1868 = vrot.lane.b32.xlu1 %v1822_v62, %s3688_s27 }
 0x5e3   : > { %1866 = vrot.lane.b32.xlu0 %v1821_v7, %s3688_s27 }
 0x5e6   : > { %1888 = vrot.lane.b32.xlu1 %v1816_v2, %s3689_s28 }
 0x5e7   : > { %1870 = vrot.lane.b32.xlu0 %v1823_v34, %s3688_s27 }
 0x5ea   : > { %1892 = vrot.lane.b32.xlu1 %v1818_v5, %s3689_s28 }
 0x5eb   : > { %1890 = vrot.lane.b32.xlu0 %v1817_v41, %s3689_s28 }
 0x5ee   : > { %1896 = vrot.lane.b32.xlu1 %v1820_v51, %s3689_s28 }
 0x5ef   : > { %1894 = vrot.lane.b32.xlu0 %v1819_v36, %s3689_s28 }
 0x5f2   : > { %1900 = vrot.lane.b32.xlu1 %v1822_v62, %s3689_s28 }
 0x5f3   : > { %1898 = vrot.lane.b32.xlu0 %v1821_v7, %s3689_s28 }
 0x5f7   : > { %1902 = vrot.lane.b32.xlu0 %v1823_v34, %s3689_s28 }
 0x635   : > { %v5108_v35 = vpop.permute.xlu1 %1745 }
 0x636   : > { %6970 = vst [vmem:[#allocation55_spill] sm:$0xff] %v5108_v35 }
 0x639   : > { %v5110_v42 = vpop.permute.xlu1 %1751 }
 0x63a   : > { %6971 = vst [vmem:[#allocation56_spill] sm:$0xff] %v5110_v42  ;;  %v5112_v43 = vpop.permute.xlu0 %1748 }
 0x63b   : > { %6972 = vst [vmem:[#allocation57_spill] sm:$0xff] %v5112_v43 }
 0x63d   : > { %v5114_v63 = vpop.permute.xlu1 %1757 }
 0x63e   : > { %6973 = vst [vmem:[#allocation58_spill] sm:$0xff] %v5114_v63  ;;  %v5116_v55 = vpop.permute.xlu0 %1754 }
 0x63f   : > { %6974 = vst [vmem:[#allocation59_spill] sm:$0xff] %v5116_v55 }
 0x641   : > { %v5118_v50 = vpop.permute.xlu1 %1763 }
 0x642   : > { %6975 = vst [vmem:[#allocation60_spill] sm:$0xff] %v5118_v50  ;;  %v5120_v39 = vpop.permute.xlu0 %1760 }
 0x643   : > { %6976 = vst [vmem:[#allocation61_spill] sm:$0xff] %v5120_v39 }
 0x645   : > { %v1825_v2 = vpop.permute.xlu1 %1824 }
 0x646   : > { %v5122_v22 = vpop.permute.xlu0 %1766  ;;  %vm1840_vm5 = vcmp.ne.s32.totalorder %v1825_v2, 0  ;;  %v6980_v2 = vmov 0 }
 0x647   : > { %6977 = vst [vmem:[#allocation62_spill] sm:$0xff] %v5122_v22  ;;  %vm1848_vm15 = vmor %vm1808_vm9, %vm1840_vm5 }
 0x649   : > { %v1829_v5 = vpop.permute.xlu1 %1828 }
 0x64a   : > { %v1827_v41 = vpop.permute.xlu0 %1826  ;;  %vm1842_vm7 = vcmp.ne.s32.totalorder %v1829_v5, 0 }
 0x64b   : > { %vm1841_vm13 = vcmp.ne.s32.totalorder %v1827_v41, 0  ;;  %vm5130_vm6 = vmor %vm1810_vm4, %vm1842_vm7  ;;  %v6984_v41 = vmov 0 }
 0x64c   : > { %vm5136_vm10 = vmor %vm1809_vm8, %vm1841_vm13 }
 0x64d   : > { %v1833_v51 = vpop.permute.xlu1 %1832  ;;  %v6981_v2 = vsel %vm5136_vm10, 4294967295, %v6980_v2 }
 0x64e   : > { %v1831_v36 = vpop.permute.xlu0 %1830  ;;  %vm1844_vm12 = vcmp.ne.s32.totalorder %v1833_v51, 0 }
 0x64f   : > { %vm1843_vm1 = vcmp.ne.s32.totalorder %v1831_v36, 0  ;;  %vm5142_vm9 = vmor %vm1812_vm14, %vm1844_vm12  ;;  %vm6986_vm14 = vcmp.eq.s32.totalorder %v5067_v40, 8 }
 0x650   : > { %vm5148_vm4 = vmor %vm1811_vm2, %vm1843_vm1  ;;  %vm6989_vm2 = vcmp.eq.s32.totalorder %v5071_v9, 8 }
 0x651   : > { %v1837_v62 = vpop.permute.xlu1 %1836  ;;  %v6985_v41 = vsel %vm5148_vm4, 4294967295, %v6984_v41 }
 0x652   : > { %v1835_v7 = vpop.permute.xlu0 %1834  ;;  %vm1846_vm5 = vcmp.ne.s32.totalorder %v1837_v62, 0 }
 0x653   : > { %vm1845_vm7 = vcmp.ne.s32.totalorder %v1835_v7, 0  ;;  %vm5154_vm12 = vmor %vm6986_vm14, %vm1846_vm5 }
 0x654   : > { %vm5161_vm1 = vmor %vm6989_vm2, %vm1845_vm7 }
 0x655   : > { %v1857_v34 = vpop.permute.xlu1 %1856 }
 0x656   : > { %v5124_v42 = vpop.permute.xlu0 %1838  ;;  %vm1872_vm3 = vcmp.ne.s32.totalorder %v1857_v34, 0  ;;  %v6987_v34 = vmov 0 }
 0x657   : > { %vm1880_vm8 = vmor %vm1848_vm15, %vm1872_vm3  ;;  %v6988_v34 = vsel %vm5154_vm12, 4294967295, %v6987_v34 }
 0x659   : > { %v1861_v43 = vpop.permute.xlu1 %1860 }
 0x65a   : > { %v1859_v63 = vpop.permute.xlu0 %1858  ;;  %vm1874_vm13 = vcmp.ne.s32.totalorder %v1861_v43, 0 }
 0x65b   : > { %vm1873_vm0 = vcmp.ne.s32.totalorder %v1859_v63, 0  ;;  %vm1882_vm3 = vmor %vm5130_vm6, %vm1874_vm13  ;;  %vm6993_vm6 = vnez %v6985_v41 }
 0x65d   : > { %v1865_v35 = vpop.permute.xlu1 %1864 }
 0x65e   : > { %v1863_v55 = vpop.permute.xlu0 %1862  ;;  %vm1876_vm5 = vcmp.ne.s32.totalorder %v1865_v35, 0 }
 0x65f   : > { %vm1875_vm14 = vcmp.ne.s32.totalorder %v1863_v55, 0  ;;  %vm1884_vm7 = vmor %vm5142_vm9, %vm1876_vm5 }
 0x660   : > { %vm1883_vm13 = vmor %vm6993_vm6, %vm1875_vm14  ;;  %vm1847_vm14 = vcmp.ne.s32.totalorder %v5124_v42, 0  ;;  %vm1996_vm6 = vcmp.eq.s32.totalorder %v5024_v8, 9 }
 0x661   : > { %v1869_v22 = vpop.permute.xlu1 %1868  ;;  %v2004_v42 = vsel %vm1996_vm6, 1, %v6853_v6 }
 0x662   : > { %v1867_v50 = vpop.permute.xlu0 %1866 }
 0x665   : > { %v1889_v51 = vpop.permute.xlu1 %1888 }
 0x666   : > { %vm1904_vm11 = vcmp.ne.s32.totalorder %v1889_v51, 0  ;;  %v1871_v36 = vpop.permute.xlu0 %1870 }
 0x667   : > { %vm1912_vm10 = vmor %vm1880_vm8, %vm1904_vm11  ;;  %vm6992_vm11 = vnez %v6981_v2 }
 0x668   : > { %v1924_v4 = vsel %vm1912_vm10, 1, %v6853_v6  ;;  %vm1881_vm15 = vmor %vm6992_vm11, %vm1873_vm0  ;;  %vm1878_vm0 = vcmp.ne.s32.totalorder %v1869_v22, 0  ;;  %vm1877_vm11 = vcmp.ne.s32.totalorder %v1867_v50, 0 }
 0x669   : > { %1933 = vperm.xlu1 %3589, %v1924_v4   ;;  %v1893_v43 = vpop.permute.xlu1 %1892 }
 0x66a   : > { %vm1906_vm8 = vcmp.ne.s32.totalorder %v1893_v43, 0  ;;  %v1891_v63 = vpop.permute.xlu0 %1890 }
 0x66b   : > { %vm1914_vm12 = vmor %vm1882_vm3, %vm1906_vm8  ;;  %vm1905_vm10 = vcmp.ne.s32.totalorder %v1891_v63, 0 }
 0x66c   : > { %vm1913_vm4 = vmor %vm1881_vm15, %vm1905_vm10  ;;  %v1926_v7 = vsel %vm1914_vm12, 1, %v6853_v6  ;;  %vm6994_vm12 = vnez %v6988_v34 }
 0x66d   : > { %1939 = vperm.xlu1 %3589, %v1926_v7   ;;  %v1897_v39 = vpop.permute.xlu1 %1896  ;;  %v1925_v4 = vsel %vm1913_vm4, 1, %v6853_v6  ;;  %vm1886_vm9 = vmor %vm6994_vm12, %vm1878_vm0  ;;  %vm6995_vm0 = vcmp.eq.s32.totalorder %v5083_v3, 8  ;;  %vm1997_vm12 = vcmp.eq.s32.totalorder %v5039_v52, 9 }
 0x66e   : > { %vm1908_vm2 = vcmp.ne.s32.totalorder %v1897_v39, 0  ;;  %1936 = vperm.xlu0 %3588, %v1925_v4   ;;  %v1895_v35 = vpop.permute.xlu0 %1894  ;;  %vm1885_vm4 = vmor %vm5161_vm1, %vm1877_vm11  ;;  %v2005_v62 = vsel %vm1997_vm12, 1, %v6853_v6 }
 0x66f   : > { %vm1916_vm3 = vmor %vm1884_vm7, %vm1908_vm2  ;;  %vm1907_vm8 = vcmp.ne.s32.totalorder %v1895_v35, 0 }
 0x670   : > { %vm1915_vm15 = vmor %vm1883_vm13, %vm1907_vm8  ;;  %v1928_v55 = vsel %vm1916_vm3, 1, %v6853_v6  ;;  %vm1879_vm13 = vcmp.ne.s32.totalorder %v1871_v36, 0  ;;  %vm1998_vm8 = vcmp.eq.s32.totalorder %v5035_v49, 9 }
 0x671   : > { %1945 = vperm.xlu1 %3589, %v1928_v55   ;;  %v1901_v2 = vpop.permute.xlu1 %1900  ;;  %v1927_v5 = vsel %vm1915_vm15, 1, %v6853_v6  ;;  %vm1855_vm3 = vmor %vm6995_vm0, %vm1847_vm14  ;;  %v2006_v34 = vsel %vm1998_vm8, 1, %v6853_v6  ;;  %vm6729_vm14 = vcmp.eq.s32.totalorder %v5071_v9, 9 }
 0x672   : > { %vm1910_vm5 = vcmp.ne.s32.totalorder %v1901_v2, 0  ;;  %1942 = vperm.xlu0 %3588, %v1927_v5   ;;  %v1899_v22 = vpop.permute.xlu0 %1898  ;;  %vm1887_vm1 = vmor %vm1855_vm3, %vm1879_vm13  ;;  %v2009_v39 = vsel %vm6729_vm14, 1, %v6853_v6 }
 0x673   : > { %vm1918_vm10 = vmor %vm1886_vm9, %vm1910_vm5  ;;  %vm1909_vm7 = vcmp.ne.s32.totalorder %v1899_v22, 0  ;;  %vm2000_vm9 = vcmp.eq.s32.totalorder %v5051_v10, 9  ;;  %vm6730_vm5 = vcmp.eq.s32.totalorder %v5067_v40, 9 }
 0x674   : > { %vm1917_vm2 = vmor %vm1885_vm4, %vm1909_vm7  ;;  %v1930_v50 = vsel %vm1918_vm10, 1, %v6853_v6  ;;  %vm1999_vm4 = vcmp.eq.s32.totalorder %v5055_v45, 9  ;;  %v2008_v43 = vsel %vm2000_vm9, 1, %v6853_v6  ;;  %v2010_v7 = vsel %vm6730_vm5, 1, %v6853_v6 }
 0x675   : > { %1951 = vperm.xlu1 %3589, %v1930_v50   ;;  %v1929_v41 = vsel %vm1917_vm2, 1, %v6853_v6  ;;  %v2007_v63 = vsel %vm1999_vm4, 1, %v6853_v6  ;;  %vm6728_vm10 = vcmp.eq.s32.totalorder %v5083_v3, 9 }
 0x676   : > { %1948 = vperm.xlu0 %3588, %v1929_v41   ;;  %v1903_v51 = vpop.permute.xlu0 %1902  ;;  %v2011_v4 = vsel %vm6728_vm10, 1, %v6853_v6 }
 0x677   : > { %vm1911_vm11 = vcmp.ne.s32.totalorder %v1903_v51, 0 }
 0x678   : > { %vm1919_vm15 = vmor %vm1887_vm1, %vm1911_vm11 }
 0x679   : > { %v1931_v36 = vsel %vm1919_vm15, 1, %v6853_v6  ;;  %2012 = vrot.lane.b32.xlu1 %v2004_v42, %s3687_s26 }
 0x67a   : > { %1954 = vperm.xlu0 %3588, %v1931_v36  }
 0x67d   : > { %2016 = vrot.lane.b32.xlu1 %v2006_v34, %s3687_s26 }
 0x67e   : > { %2014 = vrot.lane.b32.xlu0 %v2005_v62, %s3687_s26 }
 0x681   : > { %2020 = vrot.lane.b32.xlu1 %v2008_v43, %s3687_s26 }
 0x682   : > { %2018 = vrot.lane.b32.xlu0 %v2007_v63, %s3687_s26 }
 0x685   : > { %2024 = vrot.lane.b32.xlu1 %v2010_v7, %s3687_s26 }
 0x686   : > { %2022 = vrot.lane.b32.xlu0 %v2009_v39, %s3687_s26 }
 0x689   : > { %2044 = vrot.lane.b32.xlu1 %v2004_v42, %s3688_s27 }
 0x68a   : > { %2026 = vrot.lane.b32.xlu0 %v2011_v4, %s3687_s26 }
 0x68d   : > { %2048 = vrot.lane.b32.xlu1 %v2006_v34, %s3688_s27 }
 0x68e   : > { %2046 = vrot.lane.b32.xlu0 %v2005_v62, %s3688_s27 }
 0x691   : > { %2052 = vrot.lane.b32.xlu1 %v2008_v43, %s3688_s27 }
 0x692   : > { %2050 = vrot.lane.b32.xlu0 %v2007_v63, %s3688_s27 }
 0x695   : > { %2056 = vrot.lane.b32.xlu1 %v2010_v7, %s3688_s27 }
 0x696   : > { %2054 = vrot.lane.b32.xlu0 %v2009_v39, %s3688_s27 }
 0x699   : > { %2076 = vrot.lane.b32.xlu1 %v2004_v42, %s3689_s28 }
 0x69a   : > { %2058 = vrot.lane.b32.xlu0 %v2011_v4, %s3688_s27 }
 0x69d   : > { %2080 = vrot.lane.b32.xlu1 %v2006_v34, %s3689_s28 }
 0x69e   : > { %2078 = vrot.lane.b32.xlu0 %v2005_v62, %s3689_s28 }
 0x6a1   : > { %2084 = vrot.lane.b32.xlu1 %v2008_v43, %s3689_s28 }
 0x6a2   : > { %2082 = vrot.lane.b32.xlu0 %v2007_v63, %s3689_s28 }
 0x6a5   : > { %2088 = vrot.lane.b32.xlu1 %v2010_v7, %s3689_s28 }
 0x6a6   : > { %2086 = vrot.lane.b32.xlu0 %v2009_v39, %s3689_s28 }
 0x6aa   : > { %2090 = vrot.lane.b32.xlu0 %v2011_v4, %s3689_s28 }
 0x6e8   : > { %v5243_v35 = vpop.permute.xlu1 %1933 }
 0x6e9   : > { %6996 = vst [vmem:[#allocation63_spill] sm:$0xff] %v5243_v35 }
 0x6ec   : > { %v5245_v55 = vpop.permute.xlu1 %1939 }
 0x6ed   : > { %6997 = vst [vmem:[#allocation64_spill] sm:$0xff] %v5245_v55  ;;  %v5247_v2 = vpop.permute.xlu0 %1936 }
 0x6ee   : > { %6998 = vst [vmem:[#allocation65_spill] sm:$0xff] %v5247_v2 }
 0x6f0   : > { %v5249_v5 = vpop.permute.xlu1 %1945 }
 0x6f1   : > { %6999 = vst [vmem:[#allocation66_spill] sm:$0xff] %v5249_v5  ;;  %v5251_v22 = vpop.permute.xlu0 %1942 }
 0x6f2   : > { %7000 = vst [vmem:[#allocation67_spill] sm:$0xff] %v5251_v22 }
 0x6f4   : > { %v5253_v50 = vpop.permute.xlu1 %1951 }
 0x6f5   : > { %7001 = vst [vmem:[#allocation68_spill] sm:$0xff] %v5253_v50  ;;  %v5255_v41 = vpop.permute.xlu0 %1948 }
 0x6f6   : > { %7002 = vst [vmem:[#allocation69_spill] sm:$0xff] %v5255_v41 }
 0x6f8   : > { %v2013_v51 = vpop.permute.xlu1 %2012 }
 0x6f9   : > { %v5257_v42 = vpop.permute.xlu0 %1954  ;;  %vm2028_vm7 = vcmp.ne.s32.totalorder %v2013_v51, 0  ;;  %v7006_v51 = vmov 0 }
 0x6fa   : > { %7003 = vst [vmem:[#allocation70_spill] sm:$0xff] %v5257_v42  ;;  %vm2036_vm0 = vmor %vm1996_vm6, %vm2028_vm7 }
 0x6fc   : > { %v2017_v36 = vpop.permute.xlu1 %2016 }
 0x6fd   : > { %v2015_v34 = vpop.permute.xlu0 %2014  ;;  %vm2030_vm13 = vcmp.ne.s32.totalorder %v2017_v36, 0 }
 0x6fe   : > { %vm2029_vm2 = vcmp.ne.s32.totalorder %v2015_v34, 0  ;;  %vm5265_vm1 = vmor %vm1998_vm8, %vm2030_vm13  ;;  %v7010_v34 = vmov 0 }
 0x6ff   : > { %vm5271_vm15 = vmor %vm1997_vm12, %vm2029_vm2 }
 0x700   : > { %v2021_v62 = vpop.permute.xlu1 %2020  ;;  %v7007_v51 = vsel %vm5271_vm15, 4294967295, %v7006_v51 }
 0x701   : > { %v2019_v43 = vpop.permute.xlu0 %2018  ;;  %vm2032_vm3 = vcmp.ne.s32.totalorder %v2021_v62, 0 }
 0x702   : > { %vm2031_vm11 = vcmp.ne.s32.totalorder %v2019_v43, 0  ;;  %vm5277_vm6 = vmor %vm2000_vm9, %vm2032_vm3  ;;  %vm7012_vm9 = vcmp.eq.s32.totalorder %v5067_v40, 9 }
 0x703   : > { %vm5283_vm8 = vmor %vm1999_vm4, %vm2031_vm11  ;;  %vm7015_vm4 = vcmp.eq.s32.totalorder %v5071_v9, 9 }
 0x704   : > { %v2025_v63 = vpop.permute.xlu1 %2024  ;;  %v7011_v34 = vsel %vm5283_vm8, 4294967295, %v7010_v34 }
 0x705   : > { %v2023_v7 = vpop.permute.xlu0 %2022  ;;  %vm2034_vm7 = vcmp.ne.s32.totalorder %v2025_v63, 0 }
 0x706   : > { %vm2033_vm13 = vcmp.ne.s32.totalorder %v2023_v7, 0  ;;  %vm5289_vm3 = vmor %vm7012_vm9, %vm2034_vm7 }
 0x707   : > { %vm5296_vm11 = vmor %vm7015_vm4, %vm2033_vm13 }
 0x708   : > { %v2045_v39 = vpop.permute.xlu1 %2044 }
 0x709   : > { %v5259_v4 = vpop.permute.xlu0 %2026  ;;  %vm2060_vm10 = vcmp.ne.s32.totalorder %v2045_v39, 0  ;;  %v7013_v39 = vmov 0 }
 0x70a   : > { %vm2068_vm12 = vmor %vm2036_vm0, %vm2060_vm10  ;;  %v7014_v39 = vsel %vm5289_vm3, 4294967295, %v7013_v39 }
 0x70c   : > { %v2049_v2 = vpop.permute.xlu1 %2048 }
 0x70d   : > { %v2047_v5 = vpop.permute.xlu0 %2046  ;;  %vm2062_vm2 = vcmp.ne.s32.totalorder %v2049_v2, 0 }
 0x70e   : > { %vm2061_vm5 = vcmp.ne.s32.totalorder %v2047_v5, 0  ;;  %vm2070_vm10 = vmor %vm5265_vm1, %vm2062_vm2  ;;  %vm7019_vm1 = vnez %v7011_v34 }
 0x710   : > { %v2053_v55 = vpop.permute.xlu1 %2052 }
 0x711   : > { %v2051_v22 = vpop.permute.xlu0 %2050  ;;  %vm2064_vm7 = vcmp.ne.s32.totalorder %v2053_v55, 0 }
 0x712   : > { %vm2063_vm9 = vcmp.ne.s32.totalorder %v2051_v22, 0  ;;  %vm2072_vm13 = vmor %vm5277_vm6, %vm2064_vm7 }
 0x713   : > { %vm2071_vm2 = vmor %vm7019_vm1, %vm2063_vm9  ;;  %vm2035_vm9 = vcmp.ne.s32.totalorder %v5259_v4, 0  ;;  %vm2184_vm1 = vcmp.eq.s32.totalorder %v5024_v8, 10 }
 0x714   : > { %v2057_v42 = vpop.permute.xlu1 %2056  ;;  %v2192_v4 = vsel %vm2184_vm1, 1, %v6853_v6 }
 0x715   : > { %v2055_v50 = vpop.permute.xlu0 %2054 }
 0x718   : > { %v2077_v62 = vpop.permute.xlu1 %2076 }
 0x719   : > { %vm2092_vm14 = vcmp.ne.s32.totalorder %v2077_v62, 0  ;;  %v2059_v43 = vpop.permute.xlu0 %2058 }
 0x71a   : > { %vm2100_vm15 = vmor %vm2068_vm12, %vm2092_vm14  ;;  %vm7018_vm14 = vnez %v7007_v51 }
 0x71b   : > { %v2112_v35 = vsel %vm2100_vm15, 1, %v6853_v6  ;;  %vm2069_vm0 = vmor %vm7018_vm14, %vm2061_vm5  ;;  %vm2066_vm5 = vcmp.ne.s32.totalorder %v2057_v42, 0  ;;  %vm2065_vm14 = vcmp.ne.s32.totalorder %v2055_v50, 0 }
 0x71c   : > { %2121 = vperm.xlu1 %3589, %v2112_v35   ;;  %v2081_v2 = vpop.permute.xlu1 %2080 }
 0x71d   : > { %vm2094_vm12 = vcmp.ne.s32.totalorder %v2081_v2, 0  ;;  %v2079_v5 = vpop.permute.xlu0 %2078 }
 0x71e   : > { %vm2102_vm3 = vmor %vm2070_vm10, %vm2094_vm12  ;;  %vm2093_vm15 = vcmp.ne.s32.totalorder %v2079_v5, 0 }
 0x71f   : > { %vm2101_vm8 = vmor %vm2069_vm0, %vm2093_vm15  ;;  %v2114_v7 = vsel %vm2102_vm3, 1, %v6853_v6  ;;  %vm7020_vm3 = vnez %v7014_v39 }
 0x720   : > { %2127 = vperm.xlu1 %3589, %v2114_v7   ;;  %v2085_v41 = vpop.permute.xlu1 %2084  ;;  %v2113_v35 = vsel %vm2101_vm8, 1, %v6853_v6  ;;  %vm2074_vm6 = vmor %vm7020_vm3, %vm2066_vm5  ;;  %vm7021_vm5 = vcmp.eq.s32.totalorder %v5083_v3, 9  ;;  %vm2185_vm3 = vcmp.eq.s32.totalorder %v5039_v52, 10 }
 0x721   : > { %vm2096_vm4 = vcmp.ne.s32.totalorder %v2085_v41, 0  ;;  %2124 = vperm.xlu0 %3588, %v2113_v35   ;;  %v2083_v55 = vpop.permute.xlu0 %2082  ;;  %vm2073_vm8 = vmor %vm5296_vm11, %vm2065_vm14  ;;  %v2193_v63 = vsel %vm2185_vm3, 1, %v6853_v6 }
 0x722   : > { %vm2104_vm10 = vmor %vm2072_vm13, %vm2096_vm4  ;;  %vm2095_vm12 = vcmp.ne.s32.totalorder %v2083_v55, 0 }
 0x723   : > { %vm2103_vm0 = vmor %vm2071_vm2, %vm2095_vm12  ;;  %v2116_v22 = vsel %vm2104_vm10, 1, %v6853_v6  ;;  %vm2067_vm2 = vcmp.ne.s32.totalorder %v2059_v43, 0  ;;  %vm2186_vm12 = vcmp.eq.s32.totalorder %v5035_v49, 10 }
 0x724   : > { %2133 = vperm.xlu1 %3589, %v2116_v22   ;;  %v2089_v51 = vpop.permute.xlu1 %2088  ;;  %v2115_v36 = vsel %vm2103_vm0, 1, %v6853_v6  ;;  %vm2043_vm10 = vmor %vm7021_vm5, %vm2035_vm9  ;;  %v2194_v39 = vsel %vm2186_vm12, 1, %v6853_v6  ;;  %vm6732_vm9 = vcmp.eq.s32.totalorder %v5071_v9, 10 }
 0x725   : > { %vm2098_vm7 = vcmp.ne.s32.totalorder %v2089_v51, 0  ;;  %2130 = vperm.xlu0 %3588, %v2115_v36   ;;  %v2087_v42 = vpop.permute.xlu0 %2086  ;;  %vm2075_vm11 = vmor %vm2043_vm10, %vm2067_vm2  ;;  %v2197_v41 = vsel %vm6732_vm9, 1, %v6853_v6 }
 0x726   : > { %vm2106_vm15 = vmor %vm2074_vm6, %vm2098_vm7  ;;  %vm2097_vm13 = vcmp.ne.s32.totalorder %v2087_v42, 0  ;;  %vm2188_vm6 = vcmp.eq.s32.totalorder %v5051_v10, 10  ;;  %vm6733_vm7 = vcmp.eq.s32.totalorder %v5067_v40, 10 }
 0x727   : > { %vm2105_vm4 = vmor %vm2073_vm8, %vm2097_vm13  ;;  %v2118_v50 = vsel %vm2106_vm15, 1, %v6853_v6  ;;  %vm2187_vm8 = vcmp.eq.s32.totalorder %v5055_v45, 10  ;;  %v2196_v2 = vsel %vm2188_vm6, 1, %v6853_v6  ;;  %v2198_v7 = vsel %vm6733_vm7, 1, %v6853_v6 }
 0x728   : > { %2139 = vperm.xlu1 %3589, %v2118_v50   ;;  %v2117_v34 = vsel %vm2105_vm4, 1, %v6853_v6  ;;  %v2195_v5 = vsel %vm2187_vm8, 1, %v6853_v6  ;;  %vm6731_vm15 = vcmp.eq.s32.totalorder %v5083_v3, 10 }
 0x729   : > { %2136 = vperm.xlu0 %3588, %v2117_v34   ;;  %v2091_v62 = vpop.permute.xlu0 %2090  ;;  %v2199_v35 = vsel %vm6731_vm15, 1, %v6853_v6 }
 0x72a   : > { %vm2099_vm14 = vcmp.ne.s32.totalorder %v2091_v62, 0 }
 0x72b   : > { %vm2107_vm0 = vmor %vm2075_vm11, %vm2099_vm14 }
 0x72c   : > { %v2119_v43 = vsel %vm2107_vm0, 1, %v6853_v6  ;;  %2200 = vrot.lane.b32.xlu1 %v2192_v4, %s3687_s26 }
 0x72d   : > { %2142 = vperm.xlu0 %3588, %v2119_v43  }
 0x730   : > { %2204 = vrot.lane.b32.xlu1 %v2194_v39, %s3687_s26 }
 0x731   : > { %2202 = vrot.lane.b32.xlu0 %v2193_v63, %s3687_s26 }
 0x734   : > { %2208 = vrot.lane.b32.xlu1 %v2196_v2, %s3687_s26 }
 0x735   : > { %2206 = vrot.lane.b32.xlu0 %v2195_v5, %s3687_s26 }
 0x738   : > { %2212 = vrot.lane.b32.xlu1 %v2198_v7, %s3687_s26 }
 0x739   : > { %2210 = vrot.lane.b32.xlu0 %v2197_v41, %s3687_s26 }
 0x73c   : > { %2232 = vrot.lane.b32.xlu1 %v2192_v4, %s3688_s27 }
 0x73d   : > { %2214 = vrot.lane.b32.xlu0 %v2199_v35, %s3687_s26 }
 0x740   : > { %2236 = vrot.lane.b32.xlu1 %v2194_v39, %s3688_s27 }
 0x741   : > { %2234 = vrot.lane.b32.xlu0 %v2193_v63, %s3688_s27 }
 0x744   : > { %2240 = vrot.lane.b32.xlu1 %v2196_v2, %s3688_s27 }
 0x745   : > { %2238 = vrot.lane.b32.xlu0 %v2195_v5, %s3688_s27 }
 0x748   : > { %2244 = vrot.lane.b32.xlu1 %v2198_v7, %s3688_s27 }
 0x749   : > { %2242 = vrot.lane.b32.xlu0 %v2197_v41, %s3688_s27 }
 0x74c   : > { %2264 = vrot.lane.b32.xlu1 %v2192_v4, %s3689_s28 }
 0x74d   : > { %2246 = vrot.lane.b32.xlu0 %v2199_v35, %s3688_s27 }
 0x750   : > { %2268 = vrot.lane.b32.xlu1 %v2194_v39, %s3689_s28 }
 0x751   : > { %2266 = vrot.lane.b32.xlu0 %v2193_v63, %s3689_s28 }
 0x754   : > { %2272 = vrot.lane.b32.xlu1 %v2196_v2, %s3689_s28 }
 0x755   : > { %2270 = vrot.lane.b32.xlu0 %v2195_v5, %s3689_s28 }
 0x758   : > { %2276 = vrot.lane.b32.xlu1 %v2198_v7, %s3689_s28 }
 0x759   : > { %2274 = vrot.lane.b32.xlu0 %v2197_v41, %s3689_s28 }
 0x75d   : > { %2278 = vrot.lane.b32.xlu0 %v2199_v35, %s3689_s28 }
 0x79b   : > { %v5378_v55 = vpop.permute.xlu1 %2121 }
 0x79c   : > { %7022 = vst [vmem:[#allocation71_spill] sm:$0xff] %v5378_v55 }
 0x79f   : > { %v5380_v22 = vpop.permute.xlu1 %2127 }
 0x7a0   : > { %7023 = vst [vmem:[#allocation72_spill] sm:$0xff] %v5380_v22  ;;  %v5382_v51 = vpop.permute.xlu0 %2124 }
 0x7a1   : > { %7024 = vst [vmem:[#allocation73_spill] sm:$0xff] %v5382_v51 }
 0x7a3   : > { %v5384_v36 = vpop.permute.xlu1 %2133 }
 0x7a4   : > { %7025 = vst [vmem:[#allocation74_spill] sm:$0xff] %v5384_v36  ;;  %v5386_v42 = vpop.permute.xlu0 %2130 }
 0x7a5   : > { %7026 = vst [vmem:[#allocation75_spill] sm:$0xff] %v5386_v42 }
 0x7a7   : > { %v5388_v50 = vpop.permute.xlu1 %2139 }
 0x7a8   : > { %7027 = vst [vmem:[#allocation76_spill] sm:$0xff] %v5388_v50  ;;  %v5390_v34 = vpop.permute.xlu0 %2136 }
 0x7a9   : > { %7028 = vst [vmem:[#allocation77_spill] sm:$0xff] %v5390_v34 }
 0x7ab   : > { %v2201_v62 = vpop.permute.xlu1 %2200 }
 0x7ac   : > { %v5392_v4 = vpop.permute.xlu0 %2142  ;;  %vm2216_vm13 = vcmp.ne.s32.totalorder %v2201_v62, 0  ;;  %v7032_v62 = vmov 0 }
 0x7ad   : > { %7029 = vst [vmem:[#allocation78_spill] sm:$0xff] %v5392_v4  ;;  %vm2224_vm5 = vmor %vm2184_vm1, %vm2216_vm13 }
 0x7af   : > { %v2205_v43 = vpop.permute.xlu1 %2204 }
 0x7b0   : > { %v2203_v39 = vpop.permute.xlu0 %2202  ;;  %vm2218_vm2 = vcmp.ne.s32.totalorder %v2205_v43, 0 }
 0x7b1   : > { %vm2217_vm4 = vcmp.ne.s32.totalorder %v2203_v39, 0  ;;  %vm5400_vm11 = vmor %vm2186_vm12, %vm2218_vm2  ;;  %v7036_v39 = vmov 0 }
 0x7b2   : > { %vm5406_vm0 = vmor %vm2185_vm3, %vm2217_vm4 }
 0x7b3   : > { %v2209_v63 = vpop.permute.xlu1 %2208  ;;  %v7033_v62 = vsel %vm5406_vm0, 4294967295, %v7032_v62 }
 0x7b4   : > { %v2207_v2 = vpop.permute.xlu0 %2206  ;;  %vm2220_vm10 = vcmp.ne.s32.totalorder %v2209_v63, 0 }
 0x7b5   : > { %vm2219_vm14 = vcmp.ne.s32.totalorder %v2207_v2, 0  ;;  %vm5412_vm1 = vmor %vm2188_vm6, %vm2220_vm10  ;;  %vm7038_vm6 = vcmp.eq.s32.totalorder %v5067_v40, 10 }
 0x7b6   : > { %vm5418_vm12 = vmor %vm2187_vm8, %vm2219_vm14  ;;  %vm7041_vm8 = vcmp.eq.s32.totalorder %v5071_v9, 10 }
 0x7b7   : > { %v2213_v5 = vpop.permute.xlu1 %2212  ;;  %v7037_v39 = vsel %vm5418_vm12, 4294967295, %v7036_v39 }
 0x7b8   : > { %v2211_v7 = vpop.permute.xlu0 %2210  ;;  %vm2222_vm13 = vcmp.ne.s32.totalorder %v2213_v5, 0 }
 0x7b9   : > { %vm2221_vm2 = vcmp.ne.s32.totalorder %v2211_v7, 0  ;;  %vm5424_vm10 = vmor %vm7038_vm6, %vm2222_vm13 }
 0x7ba   : > { %vm5431_vm14 = vmor %vm7041_vm8, %vm2221_vm2 }
 0x7bb   : > { %v2233_v41 = vpop.permute.xlu1 %2232 }
 0x7bc   : > { %v5394_v35 = vpop.permute.xlu0 %2214  ;;  %vm2248_vm15 = vcmp.ne.s32.totalorder %v2233_v41, 0  ;;  %v7039_v41 = vmov 0 }
 0x7bd   : > { %vm2256_vm3 = vmor %vm2224_vm5, %vm2248_vm15  ;;  %v7040_v41 = vsel %vm5424_vm10, 4294967295, %v7039_v41 }
 0x7bf   : > { %v2237_v51 = vpop.permute.xlu1 %2236 }
 0x7c0   : > { %v2235_v36 = vpop.permute.xlu0 %2234  ;;  %vm2250_vm4 = vcmp.ne.s32.totalorder %v2237_v51, 0 }
 0x7c1   : > { %vm2249_vm7 = vcmp.ne.s32.totalorder %v2235_v36, 0  ;;  %vm2258_vm15 = vmor %vm5400_vm11, %vm2250_vm4  ;;  %vm7045_vm11 = vnez %v7037_v39 }
 0x7c3   : > { %v2241_v22 = vpop.permute.xlu1 %2240 }
 0x7c4   : > { %v2239_v42 = vpop.permute.xlu0 %2238  ;;  %vm2252_vm13 = vcmp.ne.s32.totalorder %v2241_v22, 0 }
 0x7c5   : > { %vm2251_vm6 = vcmp.ne.s32.totalorder %v2239_v42, 0  ;;  %vm2260_vm2 = vmor %vm5412_vm1, %vm2252_vm13 }
 0x7c6   : > { %vm2259_vm4 = vmor %vm7045_vm11, %vm2251_vm6  ;;  %vm2223_vm6 = vcmp.ne.s32.totalorder %v5394_v35, 0  ;;  %vm2372_vm11 = vcmp.eq.s32.totalorder %v5024_v8, 11  ;;  %v5603_v8 = vld [vmem:[%s3767_s25 + $0x8] sm:$0xff] }
 0x7c7   : > { %v2245_v4 = vpop.permute.xlu1 %2244  ;;  %v2380_v35 = vsel %vm2372_vm11, 1, %v6853_v6 }
 0x7c8   : > { %v2243_v50 = vpop.permute.xlu0 %2242 }
 0x7cb   : > { %v2265_v63 = vpop.permute.xlu1 %2264 }
 0x7cc   : > { %vm2280_vm9 = vcmp.ne.s32.totalorder %v2265_v63, 0  ;;  %v2247_v2 = vpop.permute.xlu0 %2246 }
 0x7cd   : > { %vm2288_vm0 = vmor %vm2256_vm3, %vm2280_vm9  ;;  %vm7044_vm9 = vnez %v7033_v62 }
 0x7ce   : > { %v2300_v55 = vsel %vm2288_vm0, 1, %v6853_v6  ;;  %vm2257_vm5 = vmor %vm7044_vm9, %vm2249_vm7  ;;  %vm2254_vm7 = vcmp.ne.s32.totalorder %v2245_v4, 0  ;;  %vm2253_vm9 = vcmp.ne.s32.totalorder %v2243_v50, 0 }
 0x7cf   : > { %2309 = vperm.xlu1 %3589, %v2300_v55   ;;  %v2269_v51 = vpop.permute.xlu1 %2268 }
 0x7d0   : > { %vm2282_vm3 = vcmp.ne.s32.totalorder %v2269_v51, 0  ;;  %v2267_v36 = vpop.permute.xlu0 %2266 }
 0x7d1   : > { %vm2290_vm10 = vmor %vm2258_vm15, %vm2282_vm3  ;;  %vm2281_vm0 = vcmp.ne.s32.totalorder %v2267_v36, 0 }
 0x7d2   : > { %vm2289_vm12 = vmor %vm2257_vm5, %vm2281_vm0  ;;  %v2302_v7 = vsel %vm2290_vm10, 1, %v6853_v6  ;;  %vm7046_vm10 = vnez %v7040_v41 }
 0x7d3   : > { %2315 = vperm.xlu1 %3589, %v2302_v7   ;;  %v2273_v34 = vpop.permute.xlu1 %2272  ;;  %v2301_v55 = vsel %vm2289_vm12, 1, %v6853_v6  ;;  %vm2262_vm1 = vmor %vm7046_vm10, %vm2254_vm7  ;;  %vm7047_vm7 = vcmp.eq.s32.totalorder %v5083_v3, 10  ;;  %vm2373_vm10 = vcmp.eq.s32.totalorder %v5039_v52, 11 }
 0x7d4   : > { %vm2284_vm8 = vcmp.ne.s32.totalorder %v2273_v34, 0  ;;  %2312 = vperm.xlu0 %3588, %v2301_v55   ;;  %v2271_v22 = vpop.permute.xlu0 %2270  ;;  %vm2261_vm12 = vmor %vm5431_vm14, %vm2253_vm9  ;;  %v2381_v5 = vsel %vm2373_vm10, 1, %v6853_v6 }
 0x7d5   : > { %vm2292_vm15 = vmor %vm2260_vm2, %vm2284_vm8  ;;  %vm2283_vm3 = vcmp.ne.s32.totalorder %v2271_v22, 0 }
 0x7d6   : > { %vm2291_vm5 = vmor %vm2259_vm4, %vm2283_vm3  ;;  %v2304_v42 = vsel %vm2292_vm15, 1, %v6853_v6  ;;  %vm2255_vm4 = vcmp.ne.s32.totalorder %v2247_v2, 0  ;;  %vm2374_vm3 = vcmp.eq.s32.totalorder %v5035_v49, 11  ;;  %v7062_v49 = vmov 0 }
 0x7d7   : > { %2321 = vperm.xlu1 %3589, %v2304_v42   ;;  %v2277_v62 = vpop.permute.xlu1 %2276  ;;  %v2303_v43 = vsel %vm2291_vm5, 1, %v6853_v6  ;;  %vm2231_vm15 = vmor %vm7047_vm7, %vm2223_vm6  ;;  %v2382_v41 = vsel %vm2374_vm3, 1, %v6853_v6  ;;  %vm6735_vm6 = vcmp.eq.s32.totalorder %v5071_v9, 11 }
 0x7d8   : > { %vm2286_vm13 = vcmp.ne.s32.totalorder %v2277_v62, 0  ;;  %2318 = vperm.xlu0 %3588, %v2303_v43   ;;  %v2275_v4 = vpop.permute.xlu0 %2274  ;;  %vm2263_vm14 = vmor %vm2231_vm15, %vm2255_vm4  ;;  %v2385_v34 = vsel %vm6735_vm6, 1, %v6853_v6 }
 0x7d9   : > { %vm2294_vm0 = vmor %vm2262_vm1, %vm2286_vm13  ;;  %vm2285_vm2 = vcmp.ne.s32.totalorder %v2275_v4, 0  ;;  %vm2376_vm1 = vcmp.eq.s32.totalorder %v5051_v10, 11  ;;  %vm6736_vm13 = vcmp.eq.s32.totalorder %v5067_v40, 11  ;;  %v7065_v10 = vmov 0 }
 0x7da   : > { %vm2293_vm8 = vmor %vm2261_vm12, %vm2285_vm2  ;;  %v2306_v50 = vsel %vm2294_vm0, 1, %v6853_v6  ;;  %vm2375_vm12 = vcmp.eq.s32.totalorder %v5055_v45, 11  ;;  %v2384_v51 = vsel %vm2376_vm1, 1, %v6853_v6  ;;  %v2386_v7 = vsel %vm6736_vm13, 1, %v6853_v6 }
 0x7db   : > { %2327 = vperm.xlu1 %3589, %v2306_v50   ;;  %v2305_v39 = vsel %vm2293_vm8, 1, %v6853_v6  ;;  %v2383_v36 = vsel %vm2375_vm12, 1, %v6853_v6  ;;  %vm6734_vm0 = vcmp.eq.s32.totalorder %v5083_v3, 11 }
 0x7dc   : > { %2324 = vperm.xlu0 %3588, %v2305_v39   ;;  %v2279_v63 = vpop.permute.xlu0 %2278  ;;  %v2387_v55 = vsel %vm6734_vm0, 1, %v6853_v6 }
 0x7dd   : > { %vm2287_vm9 = vcmp.ne.s32.totalorder %v2279_v63, 0 }
 0x7de   : > { %vm2295_vm5 = vmor %vm2263_vm14, %vm2287_vm9 }
 0x7df   : > { %v2307_v2 = vsel %vm2295_vm5, 1, %v6853_v6  ;;  %2388 = vrot.lane.b32.xlu1 %v2380_v35, %s3687_s26 }
 0x7e0   : > { %2330 = vperm.xlu0 %3588, %v2307_v2  }
 0x7e3   : > { %2392 = vrot.lane.b32.xlu1 %v2382_v41, %s3687_s26 }
 0x7e4   : > { %2390 = vrot.lane.b32.xlu0 %v2381_v5, %s3687_s26 }
 0x7e7   : > { %2396 = vrot.lane.b32.xlu1 %v2384_v51, %s3687_s26 }
 0x7e8   : > { %2394 = vrot.lane.b32.xlu0 %v2383_v36, %s3687_s26 }
 0x7eb   : > { %2400 = vrot.lane.b32.xlu1 %v2386_v7, %s3687_s26 }
 0x7ec   : > { %2398 = vrot.lane.b32.xlu0 %v2385_v34, %s3687_s26 }
 0x7ef   : > { %2420 = vrot.lane.b32.xlu1 %v2380_v35, %s3688_s27 }
 0x7f0   : > { %2402 = vrot.lane.b32.xlu0 %v2387_v55, %s3687_s26 }
 0x7f3   : > { %2424 = vrot.lane.b32.xlu1 %v2382_v41, %s3688_s27 }
 0x7f4   : > { %2422 = vrot.lane.b32.xlu0 %v2381_v5, %s3688_s27 }
 0x7f7   : > { %2428 = vrot.lane.b32.xlu1 %v2384_v51, %s3688_s27 }
 0x7f8   : > { %2426 = vrot.lane.b32.xlu0 %v2383_v36, %s3688_s27 }
 0x7fb   : > { %2432 = vrot.lane.b32.xlu1 %v2386_v7, %s3688_s27 }
 0x7fc   : > { %2430 = vrot.lane.b32.xlu0 %v2385_v34, %s3688_s27 }
 0x7ff   : > { %2452 = vrot.lane.b32.xlu1 %v2380_v35, %s3689_s28 }
 0x800   : > { %2434 = vrot.lane.b32.xlu0 %v2387_v55, %s3688_s27 }
 0x803   : > { %2456 = vrot.lane.b32.xlu1 %v2382_v41, %s3689_s28 }
 0x804   : > { %2454 = vrot.lane.b32.xlu0 %v2381_v5, %s3689_s28 }
 0x807   : > { %2460 = vrot.lane.b32.xlu1 %v2384_v51, %s3689_s28 }
 0x808   : > { %2458 = vrot.lane.b32.xlu0 %v2383_v36, %s3689_s28 }
 0x80b   : > { %2464 = vrot.lane.b32.xlu1 %v2386_v7, %s3689_s28 }
 0x80c   : > { %2462 = vrot.lane.b32.xlu0 %v2385_v34, %s3689_s28 }
 0x810   : > { %2466 = vrot.lane.b32.xlu0 %v2387_v55, %s3689_s28 }
 0x84e   : > { %v5513_v22 = vpop.permute.xlu1 %2309 }
 0x84f   : > { %7048 = vst [vmem:[#allocation79_spill] sm:$0xff] %v5513_v22 }
 0x852   : > { %v5515_v42 = vpop.permute.xlu1 %2315 }
 0x853   : > { %7049 = vst [vmem:[#allocation80_spill] sm:$0xff] %v5515_v42  ;;  %v5517_v62 = vpop.permute.xlu0 %2312 }
 0x854   : > { %7050 = vst [vmem:[#allocation81_spill] sm:$0xff] %v5517_v62 }
 0x856   : > { %v5519_v43 = vpop.permute.xlu1 %2321 }
 0x857   : > { %7051 = vst [vmem:[#allocation82_spill] sm:$0xff] %v5519_v43  ;;  %v5521_v4 = vpop.permute.xlu0 %2318 }
 0x858   : > { %7052 = vst [vmem:[#allocation83_spill] sm:$0xff] %v5521_v4 }
 0x85a   : > { %v5523_v50 = vpop.permute.xlu1 %2327 }
 0x85b   : > { %7053 = vst [vmem:[#allocation84_spill] sm:$0xff] %v5523_v50  ;;  %v5525_v39 = vpop.permute.xlu0 %2324 }
 0x85c   : > { %7054 = vst [vmem:[#allocation85_spill] sm:$0xff] %v5525_v39 }
 0x85e   : > { %v2389_v63 = vpop.permute.xlu1 %2388 }
 0x85f   : > { %v5527_v35 = vpop.permute.xlu0 %2330  ;;  %vm2404_vm2 = vcmp.ne.s32.totalorder %v2389_v63, 0  ;;  %v7058_v63 = vmov 0 }
 0x860   : > { %7055 = vst [vmem:[#allocation86_spill] sm:$0xff] %v5527_v35  ;;  %vm2412_vm7 = vmor %vm2372_vm11, %vm2404_vm2 }
 0x862   : > { %v2393_v2 = vpop.permute.xlu1 %2392 }
 0x863   : > { %v2391_v41 = vpop.permute.xlu0 %2390  ;;  %vm2406_vm4 = vcmp.ne.s32.totalorder %v2393_v2, 0 }
 0x864   : > { %vm2405_vm8 = vcmp.ne.s32.totalorder %v2391_v41, 0  ;;  %vm5535_vm14 = vmor %vm2374_vm3, %vm2406_vm4 }
 0x865   : > { %vm5541_vm5 = vmor %vm2373_vm10, %vm2405_vm8 }
 0x866   : > { %v2397_v5 = vpop.permute.xlu1 %2396  ;;  %v7059_v63 = vsel %vm5541_vm5, 4294967295, %v7058_v63 }
 0x867   : > { %v2395_v51 = vpop.permute.xlu0 %2394  ;;  %vm2408_vm15 = vcmp.ne.s32.totalorder %v2397_v5, 0 }
 0x868   : > { %vm2407_vm9 = vcmp.ne.s32.totalorder %v2395_v51, 0  ;;  %vm5547_vm11 = vmor %vm2376_vm1, %vm2408_vm15  ;;  %vm7064_vm1 = vcmp.eq.s32.totalorder %v5067_v40, 11 }
 0x869   : > { %vm5553_vm3 = vmor %vm2375_vm12, %vm2407_vm9  ;;  %vm7067_vm12 = vcmp.eq.s32.totalorder %v5071_v9, 11 }
 0x86a   : > { %v2401_v36 = vpop.permute.xlu1 %2400  ;;  %v7063_v49 = vsel %vm5553_vm3, 4294967295, %v7062_v49 }
 0x86b   : > { %v2399_v7 = vpop.permute.xlu0 %2398  ;;  %vm2410_vm2 = vcmp.ne.s32.totalorder %v2401_v36, 0 }
 0x86c   : > { %vm2409_vm4 = vcmp.ne.s32.totalorder %v2399_v7, 0  ;;  %vm5559_vm15 = vmor %vm7064_vm1, %vm2410_vm2 }
 0x86d   : > { %v7066_v10 = vsel %vm5559_vm15, 4294967295, %v7065_v10  ;;  %vm5566_vm9 = vmor %vm7067_vm12, %vm2409_vm4 }
 0x86e   : > { %v2421_v34 = vpop.permute.xlu1 %2420 }
 0x86f   : > { %v5529_v55 = vpop.permute.xlu0 %2402  ;;  %vm2436_vm0 = vcmp.ne.s32.totalorder %v2421_v34, 0 }
 0x870   : > { %vm2444_vm10 = vmor %vm2412_vm7, %vm2436_vm0 }
 0x872   : > { %v2425_v62 = vpop.permute.xlu1 %2424 }
 0x873   : > { %v2423_v43 = vpop.permute.xlu0 %2422  ;;  %vm2438_vm8 = vcmp.ne.s32.totalorder %v2425_v62, 0 }
 0x874   : > { %vm2437_vm13 = vcmp.ne.s32.totalorder %v2423_v43, 0  ;;  %vm2446_vm0 = vmor %vm5535_vm14, %vm2438_vm8  ;;  %vm7071_vm14 = vnez %v7063_v49 }
 0x876   : > { %v2429_v42 = vpop.permute.xlu1 %2428 }
 0x877   : > { %v2427_v4 = vpop.permute.xlu0 %2426  ;;  %vm2440_vm2 = vcmp.ne.s32.totalorder %v2429_v42, 0 }
 0x878   : > { %vm2439_vm1 = vcmp.ne.s32.totalorder %v2427_v4, 0  ;;  %vm2448_vm4 = vmor %vm5547_vm11, %vm2440_vm2  ;;  %vm7072_vm11 = vnez %v7066_v10  ;;  %v5619_v10 = vld [vmem:[%s3767_s25 + $0x18] sm:$0xff] }
 0x879   : > { %vm2447_vm8 = vmor %vm7071_vm14, %vm2439_vm1  ;;  %vm2411_vm1 = vcmp.ne.s32.totalorder %v5529_v55, 0 }
 0x87a   : > { %v2433_v35 = vpop.permute.xlu1 %2432 }
 0x87b   : > { %v2431_v50 = vpop.permute.xlu0 %2430 }
 0x87e   : > { %v2453_v2 = vpop.permute.xlu1 %2452 }
 0x87f   : > { %vm2468_vm6 = vcmp.ne.s32.totalorder %v2453_v2, 0  ;;  %v2435_v52 = vpop.permute.xlu0 %2434 }
 0x880   : > { %vm2476_vm5 = vmor %vm2444_vm10, %vm2468_vm6  ;;  %vm7070_vm6 = vnez %v7059_v63  ;;  %v5599_v63 = vld [vmem:[%s3767_s25 + $0x10] sm:$0xff] }
 0x881   : > { %v2488_v45 = vsel %vm2476_vm5, 1, %v6853_v6  ;;  %vm2445_vm7 = vmor %vm7070_vm6, %vm2437_vm13  ;;  %vm2442_vm13 = vcmp.ne.s32.totalorder %v2433_v35, 0  ;;  %vm2441_vm6 = vcmp.ne.s32.totalorder %v2431_v50, 0  ;;  %v5588_v50 = vld [vmem:[%s3767_s25] sm:$0xff] }
 0x882   : > { %2497 = vperm.xlu1 %3589, %v2488_v45   ;;  %v2457_v62 = vpop.permute.xlu1 %2456  ;;  %vm2560_vm14 = vcmp.eq.s32.totalorder %v5588_v50, 12 }
 0x883   : > { %vm2470_vm10 = vcmp.ne.s32.totalorder %v2457_v62, 0  ;;  %v2455_v40 = vpop.permute.xlu0 %2454  ;;  %v2568_v55 = vsel %vm2560_vm14, 1, %v6853_v6  ;;  %v5631_v62 = vld [vmem:[%s3767_s25 + $0x30] sm:$0xff] }
 0x884   : > { %vm2478_vm15 = vmor %vm2446_vm0, %vm2470_vm10  ;;  %vm2469_vm5 = vcmp.ne.s32.totalorder %v2455_v40, 0  ;;  %7074 = vst [vmem:[#allocation87_spill] sm:$0xff] %v5631_v62  ;;  %v5635_v40 = vld [vmem:[%s3767_s25 + $0x28] sm:$0xff] }
 0x885   : > { %vm2477_vm3 = vmor %vm2445_vm7, %vm2469_vm5  ;;  %v2490_v9 = vsel %vm2478_vm15, 1, %v6853_v6  ;;  %7075 = vst [vmem:[#allocation88_spill] sm:$0xff] %v5635_v40 }
 0x886   : > { %2503 = vperm.xlu1 %3589, %v2490_v9   ;;  %v2461_v43 = vpop.permute.xlu1 %2460  ;;  %v2489_v39 = vsel %vm2477_vm3, 1, %v6853_v6  ;;  %vm2450_vm15 = vmor %vm7072_vm11, %vm2442_vm13  ;;  %vm2561_vm11 = vcmp.eq.s32.totalorder %v5603_v8, 12 }
 0x887   : > { %vm2472_vm12 = vcmp.ne.s32.totalorder %v2461_v43, 0  ;;  %2500 = vperm.xlu0 %3588, %v2489_v39   ;;  %v2459_v42 = vpop.permute.xlu0 %2458  ;;  %vm2449_vm3 = vmor %vm5566_vm9, %vm2441_vm6  ;;  %vm7073_vm9 = vcmp.eq.s32.totalorder %v5083_v3, 11  ;;  %v2569_v2 = vsel %vm2561_vm11, 1, %v6853_v6  ;;  %v5647_v39 = vld [vmem:[%s3767_s25 + $0x38] sm:$0xff] }
 0x888   : > { %vm2480_vm0 = vmor %vm2448_vm4, %vm2472_vm12  ;;  %vm2471_vm7 = vcmp.ne.s32.totalorder %v2459_v42, 0  ;;  %7076 = vst [vmem:[#allocation89_spill] sm:$0xff] %v5647_v39 }
 0x889   : > { %vm2479_vm10 = vmor %vm2447_vm8, %vm2471_vm7  ;;  %v2492_v4 = vsel %vm2480_vm0, 1, %v6853_v6  ;;  %vm2443_vm8 = vcmp.ne.s32.totalorder %v2435_v52, 0  ;;  %vm2562_vm7 = vcmp.eq.s32.totalorder %v5599_v63, 12  ;;  %v5615_v52 = vld [vmem:[%s3767_s25 + $0x20] sm:$0xff] }
 0x88a   : > { %2509 = vperm.xlu1 %3589, %v2492_v4   ;;  %v2465_v5 = vpop.permute.xlu1 %2464  ;;  %v2491_v51 = vsel %vm2479_vm10, 1, %v6853_v6  ;;  %vm2419_vm12 = vmor %vm7073_vm9, %vm2411_vm1  ;;  %v2570_v49 = vsel %vm2562_vm7, 1, %v6853_v6  ;;  %vm6741_vm1 = vcmp.eq.s32.totalorder %v5635_v40, 12 }
 0x88b   : > { %vm2474_vm2 = vcmp.ne.s32.totalorder %v2465_v5, 0  ;;  %2506 = vperm.xlu0 %3588, %v2491_v51   ;;  %v2463_v35 = vpop.permute.xlu0 %2462  ;;  %vm2451_vm6 = vmor %vm2419_vm12, %vm2443_vm8  ;;  %v2573_v43 = vsel %vm6741_vm1, 1, %v6853_v6 }
 0x88c   : > { %vm2482_vm5 = vmor %vm2450_vm15, %vm2474_vm2  ;;  %vm2473_vm4 = vcmp.ne.s32.totalorder %v2463_v35, 0  ;;  %vm2564_vm15 = vcmp.eq.s32.totalorder %v5615_v52, 12  ;;  %vm6742_vm2 = vcmp.eq.s32.totalorder %v5631_v62, 12 }
 0x88d   : > { %vm2481_vm13 = vmor %vm2449_vm3, %vm2473_vm4  ;;  %v2494_v36 = vsel %vm2482_vm5, 1, %v6853_v6  ;;  %vm2563_vm3 = vcmp.eq.s32.totalorder %v5619_v10, 12  ;;  %v2572_v45 = vsel %vm2564_vm15, 1, %v6853_v6  ;;  %v2574_v9 = vsel %vm6742_vm2, 1, %v6853_v6 }
 0x88e   : > { %2515 = vperm.xlu1 %3589, %v2494_v36   ;;  %v2493_v7 = vsel %vm2481_vm13, 1, %v6853_v6  ;;  %v2571_v41 = vsel %vm2563_vm3, 1, %v6853_v6  ;;  %vm6740_vm5 = vcmp.eq.s32.totalorder %v5647_v39, 12 }
 0x88f   : > { %2512 = vperm.xlu0 %3588, %v2493_v7   ;;  %v2467_v34 = vpop.permute.xlu0 %2466  ;;  %v2575_v42 = vsel %vm6740_vm5, 1, %v6853_v6 }
 0x890   : > { %vm2475_vm0 = vcmp.ne.s32.totalorder %v2467_v34, 0 }
 0x891   : > { %vm2483_vm10 = vmor %vm2451_vm6, %vm2475_vm0 }
 0x892   : > { %v2495_v3 = vsel %vm2483_vm10, 1, %v6853_v6  ;;  %2576 = vrot.lane.b32.xlu1 %v2568_v55, %s3687_s26 }
 0x893   : > { %2518 = vperm.xlu0 %3588, %v2495_v3  }
 0x896   : > { %2580 = vrot.lane.b32.xlu1 %v2570_v49, %s3687_s26 }
 0x897   : > { %2578 = vrot.lane.b32.xlu0 %v2569_v2, %s3687_s26 }
 0x89a   : > { %2584 = vrot.lane.b32.xlu1 %v2572_v45, %s3687_s26 }
 0x89b   : > { %2582 = vrot.lane.b32.xlu0 %v2571_v41, %s3687_s26 }
 0x89e   : > { %2588 = vrot.lane.b32.xlu1 %v2574_v9, %s3687_s26 }
 0x89f   : > { %2586 = vrot.lane.b32.xlu0 %v2573_v43, %s3687_s26 }
 0x8a2   : > { %2608 = vrot.lane.b32.xlu1 %v2568_v55, %s3688_s27 }
 0x8a3   : > { %2590 = vrot.lane.b32.xlu0 %v2575_v42, %s3687_s26 }
 0x8a6   : > { %2612 = vrot.lane.b32.xlu1 %v2570_v49, %s3688_s27 }
 0x8a7   : > { %2610 = vrot.lane.b32.xlu0 %v2569_v2, %s3688_s27 }
 0x8aa   : > { %2616 = vrot.lane.b32.xlu1 %v2572_v45, %s3688_s27 }
 0x8ab   : > { %2614 = vrot.lane.b32.xlu0 %v2571_v41, %s3688_s27 }
 0x8ae   : > { %2620 = vrot.lane.b32.xlu1 %v2574_v9, %s3688_s27 }
 0x8af   : > { %2618 = vrot.lane.b32.xlu0 %v2573_v43, %s3688_s27 }
 0x8b2   : > { %2640 = vrot.lane.b32.xlu1 %v2568_v55, %s3689_s28 }
 0x8b3   : > { %2622 = vrot.lane.b32.xlu0 %v2575_v42, %s3688_s27 }
 0x8b6   : > { %2644 = vrot.lane.b32.xlu1 %v2570_v49, %s3689_s28 }
 0x8b7   : > { %2642 = vrot.lane.b32.xlu0 %v2569_v2, %s3689_s28 }
 0x8ba   : > { %2648 = vrot.lane.b32.xlu1 %v2572_v45, %s3689_s28 }
 0x8bb   : > { %2646 = vrot.lane.b32.xlu0 %v2571_v41, %s3689_s28 }
 0x8be   : > { %2652 = vrot.lane.b32.xlu1 %v2574_v9, %s3689_s28 }
 0x8bf   : > { %2650 = vrot.lane.b32.xlu0 %v2573_v43, %s3689_s28 }
 0x8c3   : > { %2654 = vrot.lane.b32.xlu0 %v2575_v42, %s3689_s28 }
 0x901   : > { %v5672_v4 = vpop.permute.xlu1 %2497 }
 0x902   : > { %7077 = vst [vmem:[#allocation90_spill] sm:$0xff] %v5672_v4 }
 0x905   : > { %v5674_v5 = vpop.permute.xlu1 %2503 }
 0x906   : > { %7078 = vst [vmem:[#allocation91_spill] sm:$0xff] %v5674_v5  ;;  %v5676_v51 = vpop.permute.xlu0 %2500 }
 0x907   : > { %7079 = vst [vmem:[#allocation92_spill] sm:$0xff] %v5676_v51 }
 0x909   : > { %v5678_v35 = vpop.permute.xlu1 %2509 }
 0x90a   : > { %7080 = vst [vmem:[#allocation93_spill] sm:$0xff] %v5678_v35  ;;  %v5680_v36 = vpop.permute.xlu0 %2506 }
 0x90b   : > { %7081 = vst [vmem:[#allocation94_spill] sm:$0xff] %v5680_v36 }
 0x90d   : > { %v5682_v7 = vpop.permute.xlu1 %2515 }
 0x90e   : > { %7082 = vst [vmem:[#allocation95_spill] sm:$0xff] %v5682_v7  ;;  %v5684_v34 = vpop.permute.xlu0 %2512 }
 0x90f   : > { %7083 = vst [vmem:[#allocation96_spill] sm:$0xff] %v5684_v34 }
 0x911   : > { %v2577_v55 = vpop.permute.xlu1 %2576 }
 0x912   : > { %v5686_v3 = vpop.permute.xlu0 %2518  ;;  %vm2592_vm4 = vcmp.ne.s32.totalorder %v2577_v55, 0  ;;  %v7087_v55 = vmov 0 }
 0x913   : > { %7084 = vst [vmem:[#allocation97_spill] sm:$0xff] %v5686_v3  ;;  %vm2600_vm9 = vmor %vm2560_vm14, %vm2592_vm4 }
 0x915   : > { %v2581_v49 = vpop.permute.xlu1 %2580 }
 0x916   : > { %v2579_v2 = vpop.permute.xlu0 %2578  ;;  %vm2594_vm8 = vcmp.ne.s32.totalorder %v2581_v49, 0 }
 0x917   : > { %vm2593_vm13 = vcmp.ne.s32.totalorder %v2579_v2, 0  ;;  %vm5694_vm6 = vmor %vm2562_vm7, %vm2594_vm8  ;;  %v7091_v2 = vmov 0 }
 0x918   : > { %vm5700_vm10 = vmor %vm2561_vm11, %vm2593_vm13 }
 0x919   : > { %v2585_v45 = vpop.permute.xlu1 %2584  ;;  %v7088_v55 = vsel %vm5700_vm10, 4294967295, %v7087_v55 }
 0x91a   : > { %v2583_v41 = vpop.permute.xlu0 %2582  ;;  %vm2596_vm12 = vcmp.ne.s32.totalorder %v2585_v45, 0 }
 0x91b   : > { %vm2595_vm0 = vcmp.ne.s32.totalorder %v2583_v41, 0  ;;  %vm5706_vm14 = vmor %vm2564_vm15, %vm2596_vm12  ;;  %vm7093_vm15 = vcmp.eq.s32.totalorder %v5631_v62, 12 }
 0x91c   : > { %vm5712_vm7 = vmor %vm2563_vm3, %vm2595_vm0  ;;  %vm7096_vm3 = vcmp.eq.s32.totalorder %v5635_v40, 12 }
 0x91d   : > { %v2589_v9 = vpop.permute.xlu1 %2588  ;;  %v7092_v2 = vsel %vm5712_vm7, 4294967295, %v7091_v2 }
 0x91e   : > { %v2587_v43 = vpop.permute.xlu0 %2586  ;;  %vm2598_vm4 = vcmp.ne.s32.totalorder %v2589_v9, 0 }
 0x91f   : > { %vm2597_vm8 = vcmp.ne.s32.totalorder %v2587_v43, 0  ;;  %vm5718_vm12 = vmor %vm7093_vm15, %vm2598_vm4 }
 0x920   : > { %vm5725_vm0 = vmor %vm7096_vm3, %vm2597_vm8 }
 0x921   : > { %v2609_v42 = vpop.permute.xlu1 %2608 }
 0x922   : > { %v5688_v5 = vpop.permute.xlu0 %2590  ;;  %vm2624_vm5 = vcmp.ne.s32.totalorder %v2609_v42, 0  ;;  %v7094_v42 = vmov 0 }
 0x923   : > { %vm2632_vm11 = vmor %vm2600_vm9, %vm2624_vm5  ;;  %v7095_v42 = vsel %vm5718_vm12, 4294967295, %v7094_v42 }
 0x925   : > { %v2613_v51 = vpop.permute.xlu1 %2612 }
 0x926   : > { %v2611_v35 = vpop.permute.xlu0 %2610  ;;  %vm2626_vm13 = vcmp.ne.s32.totalorder %v2613_v51, 0 }
 0x927   : > { %vm2625_vm2 = vcmp.ne.s32.totalorder %v2611_v35, 0  ;;  %vm2634_vm5 = vmor %vm5694_vm6, %vm2626_vm13  ;;  %vm7100_vm6 = vnez %v7092_v2 }
 0x929   : > { %v2617_v4 = vpop.permute.xlu1 %2616 }
 0x92a   : > { %v2615_v36 = vpop.permute.xlu0 %2614  ;;  %vm2628_vm4 = vcmp.ne.s32.totalorder %v2617_v4, 0 }
 0x92b   : > { %vm2627_vm15 = vcmp.ne.s32.totalorder %v2615_v36, 0  ;;  %vm2636_vm8 = vmor %vm5706_vm14, %vm2628_vm4 }
 0x92c   : > { %vm2635_vm13 = vmor %vm7100_vm6, %vm2627_vm15  ;;  %vm2599_vm15 = vcmp.ne.s32.totalorder %v5688_v5, 0  ;;  %vm2748_vm6 = vcmp.eq.s32.totalorder %v5588_v50, 13 }
 0x92d   : > { %v2621_v3 = vpop.permute.xlu1 %2620  ;;  %v2756_v5 = vsel %vm2748_vm6, 1, %v6853_v6 }
 0x92e   : > { %v2619_v7 = vpop.permute.xlu0 %2618 }
 0x931   : > { %v2641_v45 = vpop.permute.xlu1 %2640 }
 0x932   : > { %vm2656_vm1 = vcmp.ne.s32.totalorder %v2641_v45, 0  ;;  %v2623_v41 = vpop.permute.xlu0 %2622 }
 0x933   : > { %vm2664_vm10 = vmor %vm2632_vm11, %vm2656_vm1  ;;  %vm7099_vm1 = vnez %v7088_v55 }
 0x934   : > { %v2676_v22 = vsel %vm2664_vm10, 1, %v6853_v6  ;;  %vm2633_vm9 = vmor %vm7099_vm1, %vm2625_vm2  ;;  %vm2630_vm2 = vcmp.ne.s32.totalorder %v2621_v3, 0  ;;  %vm2629_vm1 = vcmp.ne.s32.totalorder %v2619_v7, 0 }
 0x935   : > { %2685 = vperm.xlu1 %3589, %v2676_v22   ;;  %v2645_v51 = vpop.permute.xlu1 %2644 }
 0x936   : > { %vm2658_vm11 = vcmp.ne.s32.totalorder %v2645_v51, 0  ;;  %v2643_v35 = vpop.permute.xlu0 %2642 }
 0x937   : > { %vm2666_vm12 = vmor %vm2634_vm5, %vm2658_vm11  ;;  %vm2657_vm10 = vcmp.ne.s32.totalorder %v2643_v35, 0 }
 0x938   : > { %vm2665_vm7 = vmor %vm2633_vm9, %vm2657_vm10  ;;  %v2678_v43 = vsel %vm2666_vm12, 1, %v6853_v6  ;;  %vm7101_vm12 = vnez %v7095_v42 }
 0x939   : > { %2691 = vperm.xlu1 %3589, %v2678_v43   ;;  %v2649_v34 = vpop.permute.xlu1 %2648  ;;  %v2677_v22 = vsel %vm2665_vm7, 1, %v6853_v6  ;;  %vm2638_vm14 = vmor %vm7101_vm12, %vm2630_vm2  ;;  %vm7102_vm2 = vcmp.eq.s32.totalorder %v5647_v39, 12  ;;  %vm2749_vm12 = vcmp.eq.s32.totalorder %v5603_v8, 13 }
 0x93a   : > { %vm2660_vm3 = vcmp.ne.s32.totalorder %v2649_v34, 0  ;;  %2688 = vperm.xlu0 %3588, %v2677_v22   ;;  %v2647_v4 = vpop.permute.xlu0 %2646  ;;  %vm2637_vm7 = vmor %vm5725_vm0, %vm2629_vm1  ;;  %v2757_v9 = vsel %vm2749_vm12, 1, %v6853_v6 }
 0x93b   : > { %vm2668_vm5 = vmor %vm2636_vm8, %vm2660_vm3  ;;  %vm2659_vm11 = vcmp.ne.s32.totalorder %v2647_v4, 0 }
 0x93c   : > { %vm2667_vm9 = vmor %vm2635_vm13, %vm2659_vm11  ;;  %v2680_v36 = vsel %vm2668_vm5, 1, %v6853_v6  ;;  %vm2631_vm13 = vcmp.ne.s32.totalorder %v2623_v41, 0  ;;  %vm2750_vm11 = vcmp.eq.s32.totalorder %v5599_v63, 13 }
 0x93d   : > { %2697 = vperm.xlu1 %3589, %v2680_v36   ;;  %v2653_v55 = vpop.permute.xlu1 %2652  ;;  %v2679_v49 = vsel %vm2667_vm9, 1, %v6853_v6  ;;  %vm2607_vm5 = vmor %vm7102_vm2, %vm2599_vm15  ;;  %v2758_v42 = vsel %vm2750_vm11, 1, %v6853_v6  ;;  %vm6744_vm15 = vcmp.eq.s32.totalorder %v5635_v40, 13 }
 0x93e   : > { %vm2662_vm4 = vcmp.ne.s32.totalorder %v2653_v55, 0  ;;  %2694 = vperm.xlu0 %3588, %v2679_v49   ;;  %v2651_v3 = vpop.permute.xlu0 %2650  ;;  %vm2639_vm0 = vmor %vm2607_vm5, %vm2631_vm13  ;;  %v2761_v34 = vsel %vm6744_vm15, 1, %v6853_v6 }
 0x93f   : > { %vm2670_vm10 = vmor %vm2638_vm14, %vm2662_vm4  ;;  %vm2661_vm8 = vcmp.ne.s32.totalorder %v2651_v3, 0  ;;  %vm2752_vm14 = vcmp.eq.s32.totalorder %v5615_v52, 13  ;;  %vm6745_vm4 = vcmp.eq.s32.totalorder %v5631_v62, 13 }
 0x940   : > { %vm2669_vm3 = vmor %vm2637_vm7, %vm2661_vm8  ;;  %v2682_v7 = vsel %vm2670_vm10, 1, %v6853_v6  ;;  %vm2751_vm7 = vcmp.eq.s32.totalorder %v5619_v10, 13  ;;  %v2760_v51 = vsel %vm2752_vm14, 1, %v6853_v6  ;;  %v2762_v43 = vsel %vm6745_vm4, 1, %v6853_v6 }
 0x941   : > { %2703 = vperm.xlu1 %3589, %v2682_v7   ;;  %v2681_v2 = vsel %vm2669_vm3, 1, %v6853_v6  ;;  %v2759_v35 = vsel %vm2751_vm7, 1, %v6853_v6  ;;  %vm6743_vm10 = vcmp.eq.s32.totalorder %v5647_v39, 13 }
 0x942   : > { %2700 = vperm.xlu0 %3588, %v2681_v2   ;;  %v2655_v45 = vpop.permute.xlu0 %2654  ;;  %v2763_v22 = vsel %vm6743_vm10, 1, %v6853_v6 }
 0x943   : > { %vm2663_vm1 = vcmp.ne.s32.totalorder %v2655_v45, 0 }
 0x944   : > { %vm2671_vm9 = vmor %vm2639_vm0, %vm2663_vm1 }
 0x945   : > { %v2683_v41 = vsel %vm2671_vm9, 1, %v6853_v6  ;;  %2764 = vrot.lane.b32.xlu1 %v2756_v5, %s3687_s26 }
 0x946   : > { %2706 = vperm.xlu0 %3588, %v2683_v41  }
 0x949   : > { %2768 = vrot.lane.b32.xlu1 %v2758_v42, %s3687_s26 }
 0x94a   : > { %2766 = vrot.lane.b32.xlu0 %v2757_v9, %s3687_s26 }
 0x94d   : > { %2772 = vrot.lane.b32.xlu1 %v2760_v51, %s3687_s26 }
 0x94e   : > { %2770 = vrot.lane.b32.xlu0 %v2759_v35, %s3687_s26 }
 0x951   : > { %2776 = vrot.lane.b32.xlu1 %v2762_v43, %s3687_s26 }
 0x952   : > { %2774 = vrot.lane.b32.xlu0 %v2761_v34, %s3687_s26 }
 0x955   : > { %2796 = vrot.lane.b32.xlu1 %v2756_v5, %s3688_s27 }
 0x956   : > { %2778 = vrot.lane.b32.xlu0 %v2763_v22, %s3687_s26 }
 0x959   : > { %2800 = vrot.lane.b32.xlu1 %v2758_v42, %s3688_s27 }
 0x95a   : > { %2798 = vrot.lane.b32.xlu0 %v2757_v9, %s3688_s27 }
 0x95d   : > { %2804 = vrot.lane.b32.xlu1 %v2760_v51, %s3688_s27 }
 0x95e   : > { %2802 = vrot.lane.b32.xlu0 %v2759_v35, %s3688_s27 }
 0x961   : > { %2808 = vrot.lane.b32.xlu1 %v2762_v43, %s3688_s27 }
 0x962   : > { %2806 = vrot.lane.b32.xlu0 %v2761_v34, %s3688_s27 }
 0x965   : > { %2828 = vrot.lane.b32.xlu1 %v2756_v5, %s3689_s28 }
 0x966   : > { %2810 = vrot.lane.b32.xlu0 %v2763_v22, %s3688_s27 }
 0x969   : > { %2832 = vrot.lane.b32.xlu1 %v2758_v42, %s3689_s28 }
 0x96a   : > { %2830 = vrot.lane.b32.xlu0 %v2757_v9, %s3689_s28 }
 0x96d   : > { %2836 = vrot.lane.b32.xlu1 %v2760_v51, %s3689_s28 }
 0x96e   : > { %2834 = vrot.lane.b32.xlu0 %v2759_v35, %s3689_s28 }
 0x971   : > { %2840 = vrot.lane.b32.xlu1 %v2762_v43, %s3689_s28 }
 0x972   : > { %2838 = vrot.lane.b32.xlu0 %v2761_v34, %s3689_s28 }
 0x976   : > { %2842 = vrot.lane.b32.xlu0 %v2763_v22, %s3689_s28 }
 0x9b4   : > { %v5807_v4 = vpop.permute.xlu1 %2685 }
 0x9b8   : > { %v5809_v36 = vpop.permute.xlu1 %2691 }
 0x9b9   : > { %7103 = vst [vmem:[#allocation98_spill] sm:$0xff] %v5809_v36  ;;  %v5811_v55 = vpop.permute.xlu0 %2688 }
 0x9ba   : > { %7104 = vst [vmem:[#allocation99_spill] sm:$0xff] %v5811_v55 }
 0x9bc   : > { %v5813_v49 = vpop.permute.xlu1 %2697 }
 0x9bd   : > { %7105 = vst [vmem:[#allocation100_spill] sm:$0xff] %v5813_v49  ;;  %v5815_v3 = vpop.permute.xlu0 %2694 }
 0x9be   : > { %7106 = vst [vmem:[#allocation101_spill] sm:$0xff] %v5815_v3 }
 0x9c0   : > { %v5817_v7 = vpop.permute.xlu1 %2703 }
 0x9c1   : > { %7107 = vst [vmem:[#allocation102_spill] sm:$0xff] %v5817_v7  ;;  %v5819_v2 = vpop.permute.xlu0 %2700 }
 0x9c2   : > { %7108 = vst [vmem:[#allocation103_spill] sm:$0xff] %v5819_v2 }
 0x9c4   : > { %v2765_v45 = vpop.permute.xlu1 %2764 }
 0x9c5   : > { %v5821_v5 = vpop.permute.xlu0 %2706  ;;  %vm2780_vm8 = vcmp.ne.s32.totalorder %v2765_v45, 0  ;;  %v7112_v45 = vmov 0 }
 0x9c6   : > { %7109 = vst [vmem:[#allocation104_spill] sm:$0xff] %v5821_v5  ;;  %vm2788_vm5 = vmor %vm2748_vm6, %vm2780_vm8 }
 0x9c8   : > { %v2769_v41 = vpop.permute.xlu1 %2768 }
 0x9c9   : > { %v2767_v42 = vpop.permute.xlu0 %2766  ;;  %vm2782_vm13 = vcmp.ne.s32.totalorder %v2769_v41, 0 }
 0x9ca   : > { %vm2781_vm3 = vcmp.ne.s32.totalorder %v2767_v42, 0  ;;  %vm5829_vm1 = vmor %vm2750_vm11, %vm2782_vm13  ;;  %v7116_v42 = vmov 0 }
 0x9cb   : > { %vm5835_vm10 = vmor %vm2749_vm12, %vm2781_vm3 }
 0x9cc   : > { %v2773_v9 = vpop.permute.xlu1 %2772  ;;  %v7113_v45 = vsel %vm5835_vm10, 4294967295, %v7112_v45 }
 0x9cd   : > { %v2771_v51 = vpop.permute.xlu0 %2770  ;;  %vm2784_vm2 = vcmp.ne.s32.totalorder %v2773_v9, 0 }
 0x9ce   : > { %vm2783_vm0 = vcmp.ne.s32.totalorder %v2771_v51, 0  ;;  %vm5841_vm15 = vmor %vm2752_vm14, %vm2784_vm2  ;;  %vm7118_vm14 = vcmp.eq.s32.totalorder %v5631_v62, 13 }
 0x9cf   : > { %vm5847_vm11 = vmor %vm2751_vm7, %vm2783_vm0  ;;  %vm7121_vm0 = vcmp.eq.s32.totalorder %v5635_v40, 13 }
 0x9d0   : > { %v2777_v35 = vpop.permute.xlu1 %2776  ;;  %v7117_v42 = vsel %vm5847_vm11, 4294967295, %v7116_v42 }
 0x9d1   : > { %v2775_v43 = vpop.permute.xlu0 %2774  ;;  %vm2786_vm6 = vcmp.ne.s32.totalorder %v2777_v35, 0 }
 0x9d2   : > { %vm2785_vm8 = vcmp.ne.s32.totalorder %v2775_v43, 0  ;;  %vm5853_vm2 = vmor %vm7118_vm14, %vm2786_vm6  ;;  %v7122_v43 = vmov 0 }
 0x9d3   : > { %vm5862_vm11 = vmor %vm7121_vm0, %vm2785_vm8 }
 0x9d4   : > { %v2797_v34 = vpop.permute.xlu1 %2796  ;;  %v7123_v43 = vsel %vm5862_vm11, 4294967295, %v7122_v43 }
 0x9d5   : > { %v5823_v22 = vpop.permute.xlu0 %2778  ;;  %vm2812_vm9 = vcmp.ne.s32.totalorder %v2797_v34, 0 }
 0x9d6   : > { %vm2820_vm13 = vmor %vm2788_vm5, %vm2812_vm9  ;;  %vm7124_vm5 = vnez %v7113_v45 }
 0x9d8   : > { %v2801_v55 = vpop.permute.xlu1 %2800 }
 0x9d9   : > { %v2799_v49 = vpop.permute.xlu0 %2798  ;;  %vm2814_vm12 = vcmp.ne.s32.totalorder %v2801_v55, 0 }
 0x9da   : > { %vm2813_vm4 = vcmp.ne.s32.totalorder %v2799_v49, 0  ;;  %vm2822_vm7 = vmor %vm5829_vm1, %vm2814_vm12  ;;  %vm7125_vm12 = vnez %v7117_v42 }
 0x9db   : > { %vm2821_vm9 = vmor %vm7124_vm5, %vm2813_vm4 }
 0x9dc   : > { %v2805_v36 = vpop.permute.xlu1 %2804 }
 0x9dd   : > { %v2803_v3 = vpop.permute.xlu0 %2802  ;;  %vm2816_vm6 = vcmp.ne.s32.totalorder %v2805_v36, 0 }
 0x9de   : > { %vm2824_vm8 = vmor %vm5841_vm15, %vm2816_vm6  ;;  %vm7126_vm6 = vnez %v7123_v43 }
 0x9e0   : > { %v2809_v5 = vpop.permute.xlu1 %2808 }
 0x9e1   : > { %v2807_v7 = vpop.permute.xlu0 %2806  ;;  %vm2818_vm4 = vcmp.ne.s32.totalorder %v2809_v5, 0 }
 0x9e2   : > { %vm2817_vm11 = vcmp.ne.s32.totalorder %v2807_v7, 0  ;;  %vm2826_vm15 = vmor %vm5853_vm2, %vm2818_vm4  ;;  %vm7127_vm4 = vcmp.eq.s32.totalorder %v5647_v39, 13 }
 0x9e4   : > { %v2829_v9 = vpop.permute.xlu1 %2828 }
 0x9e5   : > { %vm2844_vm3 = vcmp.ne.s32.totalorder %v2829_v9, 0  ;;  %v2811_v51 = vpop.permute.xlu0 %2810 }
 0x9e6   : > { %vm2852_vm10 = vmor %vm2820_vm13, %vm2844_vm3  ;;  %vm2815_vm3 = vcmp.ne.s32.totalorder %v2803_v3, 0 }
 0x9e7   : > { %v2864_v35 = vsel %vm2852_vm10, 1, %v6853_v6  ;;  %vm2823_vm0 = vmor %vm7125_vm12, %vm2815_vm3  ;;  %vm2936_vm12 = vcmp.eq.s32.totalorder %v5588_v50, 14 }
 0x9e8   : > { %2873 = vperm.xlu1 %3589, %v2864_v35   ;;  %v2833_v55 = vpop.permute.xlu1 %2832  ;;  %vm2825_vm3 = vmor %vm7126_vm6, %vm2817_vm11  ;;  %vm2940_vm6 = vcmp.eq.s32.totalorder %v5615_v52, 14  ;;  %v7200_v52 = vmov 0 }
 0x9e9   : > { %vm2846_vm13 = vcmp.ne.s32.totalorder %v2833_v55, 0  ;;  %v2831_v49 = vpop.permute.xlu0 %2830 }
 0x9ea   : > { %vm2854_vm14 = vmor %vm2822_vm7, %vm2846_vm13  ;;  %vm2845_vm10 = vcmp.ne.s32.totalorder %v2831_v49, 0  ;;  %v2948_v49 = vsel %vm2940_vm6, 1, %v6853_v6 }
 0x9eb   : > { %v2866_v2 = vsel %vm2854_vm14, 1, %v6853_v6  ;;  %vm2853_vm1 = vmor %vm2821_vm9, %vm2845_vm10  ;;  %vm2787_vm10 = vcmp.ne.s32.totalorder %v5823_v22, 0  ;;  %v2944_v22 = vsel %vm2936_vm12, 1, %v6853_v6 }
 0x9ec   : > { %v2865_v9 = vsel %vm2853_vm1, 1, %v6853_v6  ;;  %2879 = vperm.xlu1 %3589, %v2866_v2   ;;  %v2837_v35 = vpop.permute.xlu1 %2836 }
 0x9ed   : > { %vm2848_vm5 = vcmp.ne.s32.totalorder %v2837_v35, 0  ;;  %2876 = vperm.xlu0 %3588, %v2865_v9   ;;  %v2835_v36 = vpop.permute.xlu0 %2834 }
 0x9ee   : > { %vm2856_vm7 = vmor %vm2824_vm8, %vm2848_vm5  ;;  %vm2847_vm13 = vcmp.ne.s32.totalorder %v2835_v36, 0 }
 0x9ef   : > { %v2868_v3 = vsel %vm2856_vm7, 1, %v6853_v6  ;;  %vm2855_vm9 = vmor %vm2823_vm0, %vm2847_vm13  ;;  %vm2819_vm0 = vcmp.ne.s32.totalorder %v2811_v51, 0  ;;  %vm2938_vm13 = vcmp.eq.s32.totalorder %v5599_v63, 14 }
 0x9f0   : > { %v2867_v45 = vsel %vm2855_vm9, 1, %v6853_v6  ;;  %2885 = vperm.xlu1 %3589, %v2868_v3   ;;  %v2841_v41 = vpop.permute.xlu1 %2840  ;;  %vm2795_vm5 = vmor %vm7127_vm4, %vm2787_vm10  ;;  %v2946_v43 = vsel %vm2938_vm13, 1, %v6853_v6  ;;  %vm6750_vm10 = vcmp.eq.s32.totalorder %v5635_v40, 14  ;;  %v3469_v3 = vld [vmem:[%s5942_s3] ss:$0 sm:$0xff]  ;;  %vm455_vm4 = vcmp.eq.s32.totalorder %v4123_v31, 1 }
 0x9f1   : > { %vm2850_vm14 = vcmp.ne.s32.totalorder %v2841_v41, 0  ;;  %2882 = vperm.xlu0 %3588, %v2867_v45   ;;  %v2839_v5 = vpop.permute.xlu0 %2838  ;;  %vm2827_vm11 = vmor %vm2795_vm5, %vm2819_vm0  ;;  %v2949_v35 = vsel %vm6750_vm10, 1, %v6853_v6  ;;  %vm452_vm0 = vcmp.eq.s32.totalorder %v4119_v23, 1  ;;  %v3470_v45 = vld [vmem:[%s5942_s3 + $0x10] ss:$0 sm:$0xff]  ;;  %v297_v41 = vld [vmem:[%s5942_s3 + $0x8] sm:$0xff] }
 0x9f2   : > { %vm2858_vm1 = vmor %vm2826_vm15, %vm2850_vm14  ;;  %vm2849_vm8 = vcmp.ne.s32.totalorder %v2839_v5, 0  ;;  %vm2937_vm15 = vcmp.eq.s32.totalorder %v5603_v8, 14  ;;  %vm6751_vm14 = vcmp.eq.s32.totalorder %v5631_v62, 14  ;;  %v296_v5 = vld [vmem:[%s5942_s3] sm:$0xff]  ;;  %vm456_vm5 = vcmp.eq.s32.totalorder %v4125_v24, 1  ;;  %v303_v62 = vld [vmem:[%s5942_s3 + $0x38] sm:$0xff] }
 0x9f3   : > { %v2870_v7 = vsel %vm2858_vm1, 1, %v6853_v6  ;;  %vm2857_vm2 = vmor %vm2825_vm3, %vm2849_vm8  ;;  %v2945_v55 = vsel %vm2937_vm15, 1, %v6853_v6  ;;  %vm6752_vm3 = vcmp.eq.s32.totalorder %v5619_v10, 14  ;;  %v2950_v9 = vsel %vm6751_vm14, 1, %v6853_v6  ;;  %v3475_v24 = vld [vmem:[%s5942_s3 + $0x21] ss:$0 sm:$0xff] }
 0x9f4   : > { %v2869_v42 = vsel %vm2857_vm2, 1, %v6853_v6  ;;  %2891 = vperm.xlu1 %3589, %v2870_v7   ;;  %v2947_v2 = vsel %vm6752_vm3, 1, %v6853_v6  ;;  %vm6749_vm1 = vcmp.eq.s32.totalorder %v5647_v39, 14  ;;  %vm453_vm8 = vcmp.eq.s32.totalorder %v4117_v29, 1  ;;  %v298_v29 = vld [vmem:[%s5942_s3 + $0x10] sm:$0xff]  ;;  %v6216_v8 = vld [vmem:[%s3767_s25] sm:$0xff] }
 0x9f5   : > { %2888 = vperm.xlu0 %3588, %v2869_v42   ;;  %v2843_v34 = vpop.permute.xlu0 %2842  ;;  %v2951_v36 = vsel %vm6749_vm1, 1, %v6853_v6  ;;  %vm454_vm2 = vcmp.eq.s32.totalorder %v4121_v30, 1  ;;  %v477_v7 = vsel %vm453_vm8, %v3469_v3, -inf  ;;  %v476_v42 = vsel %vm452_vm0, %v3469_v3, -inf  ;;  %v3472_v30 = vld [vmem:[%s5942_s3 + $0x30] ss:$0 sm:$0xff] }
 0x9f6   : > { %vm2851_vm7 = vcmp.ne.s32.totalorder %v2843_v34, 0  ;;  %v3471_v34 = vld [vmem:[%s5942_s3 + $0x20] ss:$0 sm:$0xff]  ;;  %v478_v23 = vsel %vm454_vm2, %v3470_v45, -inf  ;;  %vm640_vm8 = vcmp.eq.s32.totalorder %v4250_v25, 1  ;;  %v302_v3 = vld [vmem:[%s5942_s3 + $0x30] sm:$0xff] }
 0x9f7   : > { %vm2859_vm9 = vmor %vm2827_vm11, %vm2851_vm7  ;;  %vm457_vm11 = vcmp.eq.s32.totalorder %v4127_v32, 1  ;;  %vm458_vm7 = vcmp.eq.s32.totalorder %v4129_v57, 1  ;;  %v480_v57 = vsel %vm456_vm5, %v3471_v34, -inf  ;;  %v3474_v25 = vld [vmem:[%s5942_s3 + $0x11] ss:$0 sm:$0xff]  ;;  %vm642_vm0 = vcmp.eq.s32.totalorder %v4252_v26, 1 }
 0x9f8   : > { %v2871_v51 = vsel %vm2859_vm9, 1, %v6853_v6  ;;  %2952 = vrot.lane.b32.xlu1 %v2944_v22, %s3687_s26  ;;  %vm459_vm9 = vcmp.eq.s32.totalorder %v4131_v58, 1  ;;  %v481_v39 = vsel %vm457_vm11, %v3471_v34, -inf  ;;  %v482_v40 = vsel %vm458_vm7, %v3472_v30, -inf }
 0x9f9   : > { %2894 = vperm.xlu0 %3588, %v2871_v51   ;;  %v3473_v51 = vld [vmem:[%s5942_s3 + $0x1] ss:$0 sm:$0xff]  ;;  %v483_v31 = vsel %vm459_vm9, %v3472_v30, -inf  ;;  %vm641_vm2 = vcmp.eq.s32.totalorder %v4254_v18, 1  ;;  %vm643_vm5 = vcmp.eq.s32.totalorder %v4258_v27, 1  ;;  %vm646_vm11 = vcmp.eq.s32.totalorder %v4260_v20, 1 }
 0x9fa   : > { %v490_v58 = vmax.f32 %v302_v3, %v482_v40  ;;  %vm645_vm7 = vcmp.eq.s32.totalorder %v4262_v21, 1  ;;  %v491_v18 = vmax.f32 %v303_v62, %v483_v31  ;;  %vm647_vm9 = vcmp.eq.s32.totalorder %v4264_v59, 1  ;;  %v3479_v40 = vld [vmem:[%s5942_s3 + $0x22] ss:$0 sm:$0xff] }
 0x9fb   : > { %v669_v20 = vsel %vm645_vm7, %v3475_v24, -inf  ;;  %vm829_vm1 = vcmp.eq.s32.totalorder %v4389_v14, 1  ;;  %vm835_vm7 = vcmp.eq.s32.totalorder %v4399_v60, 1  ;;  %vm1016_vm10 = vcmp.eq.s32.totalorder %v4544_v47, 1 }
 0x9fc   : > { %2956 = vrot.lane.b32.xlu1 %v2946_v43, %s3687_s26 }
 0x9fd   : > { %2954 = vrot.lane.b32.xlu0 %v2945_v55, %s3687_s26 }
 0xa00   : > { %2960 = vrot.lane.b32.xlu1 %v2948_v49, %s3687_s26 }
 0xa01   : > { %2958 = vrot.lane.b32.xlu0 %v2947_v2, %s3687_s26 }
 0xa04   : > { %2964 = vrot.lane.b32.xlu1 %v2950_v9, %s3687_s26 }
 0xa05   : > { %2962 = vrot.lane.b32.xlu0 %v2949_v35, %s3687_s26 }
 0xa08   : > { %2984 = vrot.lane.b32.xlu1 %v2944_v22, %s3688_s27 }
 0xa09   : > { %2966 = vrot.lane.b32.xlu0 %v2951_v36, %s3687_s26 }
 0xa0c   : > { %2988 = vrot.lane.b32.xlu1 %v2946_v43, %s3688_s27 }
 0xa0d   : > { %2986 = vrot.lane.b32.xlu0 %v2945_v55, %s3688_s27 }
 0xa10   : > { %2992 = vrot.lane.b32.xlu1 %v2948_v49, %s3688_s27 }
 0xa11   : > { %2990 = vrot.lane.b32.xlu0 %v2947_v2, %s3688_s27 }
 0xa14   : > { %2996 = vrot.lane.b32.xlu1 %v2950_v9, %s3688_s27 }
 0xa15   : > { %2994 = vrot.lane.b32.xlu0 %v2949_v35, %s3688_s27 }
 0xa18   : > { %3016 = vrot.lane.b32.xlu1 %v2944_v22, %s3689_s28  ;;  %v299_v22 = vld [vmem:[%s5942_s3 + $0x18] sm:$0xff] }
 0xa19   : > { %2998 = vrot.lane.b32.xlu0 %v2951_v36, %s3688_s27 }
 0xa1c   : > { %3020 = vrot.lane.b32.xlu1 %v2946_v43, %s3689_s28  ;;  %v485_v43 = vmax.f32 %v297_v41, %v477_v7  ;;  %v666_v7 = vsel %vm642_vm0, %v3474_v25, -inf  ;;  %vm830_vm0 = vcmp.eq.s32.totalorder %v4387_v56, 1 }
 0xa1d   : > { %3018 = vrot.lane.b32.xlu0 %v2945_v55, %s3689_s28  ;;  %v484_v55 = vmax.f32 %v296_v5, %v476_v42  ;;  %v3476_v5 = vld [vmem:[%s5942_s3 + $0x31] ss:$0 sm:$0xff] }
 0xa20   : > { %3024 = vrot.lane.b32.xlu1 %v2948_v49, %s3689_s28  ;;  %v479_v49 = vsel %vm455_vm4, %v3470_v45, -inf  ;;  %v664_v45 = vsel %vm640_vm8, %v3473_v51, -inf  ;;  %vm644_vm4 = vcmp.eq.s32.totalorder %v4256_v19, 1  ;;  %v665_v19 = vsel %vm641_vm2, %v3473_v51, -inf }
 0xa21   : > { %3022 = vrot.lane.b32.xlu0 %v2947_v2, %s3689_s28  ;;  %v300_v2 = vld [vmem:[%s5942_s3 + $0x20] sm:$0xff]  ;;  %v487_v41 = vmax.f32 %v299_v22, %v479_v49  ;;  %v672_v42 = vmax.f32 %v484_v55, %v664_v45  ;;  %v668_v34 = vsel %vm644_vm4, %v3475_v24, -inf  ;;  %vm828_vm8 = vcmp.eq.s32.totalorder %v4385_v61, 1 }
 0xa22   : > { %v488_v32 = vmax.f32 %v300_v2, %v480_v57  ;;  %v673_v21 = vmax.f32 %v485_v43, %v665_v19  ;;  %vm832_vm2 = vcmp.eq.s32.totalorder %v4391_v15, 1  ;;  %vm831_vm4 = vcmp.eq.s32.totalorder %v4393_v28, 1  ;;  %v3480_v2 = vld [vmem:[%s5942_s3 + $0x32] ss:$0 sm:$0xff]  ;;  %v3481_v43 = vld [vmem:[%s5942_s3 + $0x3] ss:$0 sm:$0xff] }
 0xa23   : > { %v671_v61 = vsel %vm647_vm9, %v3476_v5, -inf  ;;  %v856_v56 = vsel %vm832_vm2, %v3479_v40, -inf  ;;  %v3482_v57 = vld [vmem:[%s5942_s3 + $0x13] ss:$0 sm:$0xff]  ;;  %vm1018_vm9 = vcmp.eq.s32.totalorder %v4546_v12, 1  ;;  %v859_v60 = vsel %vm835_vm7, %v3480_v2, -inf }
 0xa24   : > { %3028 = vrot.lane.b32.xlu1 %v2950_v9, %s3689_s28  ;;  %v301_v9 = vld [vmem:[%s5942_s3 + $0x28] sm:$0xff]  ;;  %v676_v62 = vmax.f32 %v488_v32, %v668_v34  ;;  %v679_v15 = vmax.f32 %v491_v18, %v671_v61  ;;  %v1040_v31 = vsel %vm1016_vm10, %v3481_v43, -inf  ;;  %v1042_v45 = vsel %vm1018_vm9, %v3482_v57, -inf  ;;  %v3483_v24 = vld [vmem:[%s5942_s3 + $0x23] ss:$0 sm:$0xff] }
 0xa25   : > { %3026 = vrot.lane.b32.xlu0 %v2949_v35, %s3689_s28  ;;  %v486_v35 = vmax.f32 %v298_v29, %v478_v23  ;;  %v489_v26 = vmax.f32 %v301_v9, %v481_v39  ;;  %v670_v29 = vsel %vm646_vm11, %v3476_v5, -inf  ;;  %v3477_v23 = vld [vmem:[%s5942_s3 + $0x2] ss:$0 sm:$0xff]  ;;  %v3478_v39 = vld [vmem:[%s5942_s3 + $0x12] ss:$0 sm:$0xff]  ;;  %vm833_vm11 = vcmp.eq.s32.totalorder %v4397_v17, 1 }
 0xa26   : > { %v678_v30 = vmax.f32 %v490_v58, %v670_v29  ;;  %v852_v22 = vsel %vm828_vm8, %v3477_v23, -inf  ;;  %v854_v55 = vsel %vm830_vm0, %v3478_v39, -inf  ;;  %v853_v49 = vsel %vm829_vm1, %v3477_v23, -inf  ;;  %v3485_v5 = vld [vmem:[%s5942_s3 + $0x4] ss:$0 sm:$0xff] }
 0xa27   : > { %v674_v27 = vmax.f32 %v486_v35, %v666_v7  ;;  %v677_v51 = vmax.f32 %v489_v26, %v669_v20  ;;  %v855_v14 = vsel %vm831_vm4, %v3478_v39, -inf  ;;  %v860_v28 = vmax.f32 %v672_v42, %v852_v22  ;;  %v3486_v19 = vld [vmem:[%s5942_s3 + $0x14] ss:$0 sm:$0xff]  ;;  %v3487_v34 = vld [vmem:[%s5942_s3 + $0x24] ss:$0 sm:$0xff]  ;;  %v7131_v22 = vld [vmem:[#allocation40_spill] sm:$0xff] }
 0xa28   : > { %v861_v3 = vmax.f32 %v673_v21, %v853_v49  ;;  %vm1017_vm1 = vcmp.eq.s32.totalorder %v4548_v0, 1  ;;  %v857_v17 = vsel %vm833_vm11, %v3479_v40, -inf  ;;  %vm1020_vm8 = vcmp.eq.s32.totalorder %v4550_v11, 1  ;;  %v7129_v40 = vld [vmem:[#allocation38_spill] sm:$0xff]  ;;  %v3490_v61 = vld [vmem:[%s5942_s3 + $0x15] ss:$0 sm:$0xff] }
 0xa29   : > { %3030 = vrot.lane.b32.xlu0 %v2951_v36, %s3689_s28  ;;  %v667_v36 = vsel %vm643_vm5, %v3474_v25, -inf  ;;  %vm834_vm5 = vcmp.eq.s32.totalorder %v4395_v16, 1  ;;  %v862_v9 = vmax.f32 %v674_v27, %v854_v55  ;;  %v864_v16 = vmax.f32 %v676_v62, %v856_v56  ;;  %v7133_v56 = vld [vmem:[#allocation42_spill] sm:$0xff] }
 0xa2a   : > { %v675_v59 = vmax.f32 %v487_v41, %v667_v36  ;;  %v858_v35 = vsel %vm834_vm5, %v3480_v2, -inf  ;;  %vm1019_vm0 = vcmp.eq.s32.totalorder %v4552_v48, 1  ;;  %v1041_v12 = vsel %vm1017_vm1, %v3481_v43, -inf  ;;  %v3484_v41 = vld [vmem:[%s5942_s3 + $0x33] ss:$0 sm:$0xff] }
 0xa2b   : > { %v866_v47 = vmax.f32 %v678_v30, %v858_v35  ;;  %vm1022_vm2 = vcmp.eq.s32.totalorder %v4554_v13, 1  ;;  %vm1021_vm4 = vcmp.eq.s32.totalorder %v4556_v54, 1  ;;  %v865_v0 = vmax.f32 %v677_v51, %v857_v17  ;;  %v3488_v36 = vld [vmem:[%s5942_s3 + $0x34] ss:$0 sm:$0xff]  ;;  %v7132_v51 = vld [vmem:[#allocation41_spill] sm:$0xff] }
 0xa2c   : > { %v863_v25 = vmax.f32 %v675_v59, %v855_v14  ;;  %v867_v32 = vmax.f32 %v679_v15, %v859_v60  ;;  %vm1023_vm5 = vcmp.eq.s32.totalorder %v4558_v46, 1  ;;  %vm1204_vm10 = vcmp.eq.s32.totalorder %v4679_v38, 1  ;;  %v3489_v59 = vld [vmem:[%s5942_s3 + $0x5] ss:$0 sm:$0xff]  ;;  %v7134_v14 = vld [vmem:[#allocation43_spill] sm:$0xff] }
 0xa2d   : > { %v1048_v26 = vmax.f32 %v860_v28, %v1040_v31  ;;  %v1050_v11 = vmax.f32 %v862_v9, %v1042_v45  ;;  %v1044_v48 = vsel %vm1020_vm8, %v3483_v24, -inf  ;;  %v1043_v58 = vsel %vm1019_vm0, %v3482_v57, -inf  ;;  %v3491_v2 = vld [vmem:[%s5942_s3 + $0x25] ss:$0 sm:$0xff]  ;;  %v7137_v45 = vld [vmem:[#allocation46_spill] sm:$0xff] }
 0xa2e   : > { %v1049_v7 = vmax.f32 %v861_v3, %v1041_v12  ;;  %v1046_v18 = vsel %vm1022_vm2, %v3484_v41, -inf  ;;  %v1045_v42 = vsel %vm1021_vm4, %v3483_v24, -inf  ;;  %vm1206_vm11 = vcmp.eq.s32.totalorder %v4681_v37, 1  ;;  %v7128_v37 = vld [vmem:[#allocation37_spill] sm:$0xff] }
 0xa2f   : > { %v1047_v13 = vsel %vm1023_vm5, %v3484_v41, -inf  ;;  %v1228_v54 = vsel %vm1204_vm10, %v3485_v5, -inf  ;;  %vm1205_vm7 = vcmp.eq.s32.totalorder %v4683_v53, 1  ;;  %vm1208_vm9 = vcmp.eq.s32.totalorder %v4685_v44, 1  ;;  %v7136_v31 = vld [vmem:[#allocation45_spill] sm:$0xff]  ;;  %v7138_v41 = vld [vmem:[#allocation47_spill] sm:$0xff] }
 0xa30   : > { %v1052_v46 = vmax.f32 %v864_v16, %v1044_v48  ;;  %v1051_v38 = vmax.f32 %v863_v25, %v1043_v58  ;;  %vm1207_vm1 = vcmp.eq.s32.totalorder %v4687_v1, 1  ;;  %vm1210_vm8 = vcmp.eq.s32.totalorder %v4689_v33, 1  ;;  %v7130_v1 = vld [vmem:[#allocation39_spill] sm:$0xff]  ;;  %v7135_v25 = vld [vmem:[#allocation44_spill] sm:$0xff]  ;;  %v3493_v12 = vld [vmem:[%s5942_s3 + $0x6] ss:$0 sm:$0xff] }
 0xa31   : > { %v1054_v29 = vmax.f32 %v866_v47, %v1046_v18  ;;  %v1053_v23 = vmax.f32 %v865_v0, %v1045_v42  ;;  %v1230_v27 = vsel %vm1206_vm11, %v3486_v19, -inf  ;;  %vm1209_vm0 = vcmp.eq.s32.totalorder %v7128_v37, 1  ;;  %v3492_v16 = vld [vmem:[%s5942_s3 + $0x35] ss:$0 sm:$0xff]  ;;  %v3494_v0 = vld [vmem:[%s5942_s3 + $0x16] ss:$0 sm:$0xff] }
 0xa32   : > { %v1055_v20 = vmax.f32 %v867_v32, %v1047_v13  ;;  %v1236_v53 = vmax.f32 %v1048_v26, %v1228_v54  ;;  %v1229_v39 = vsel %vm1205_vm7, %v3485_v5, -inf  ;;  %v1232_v21 = vsel %vm1208_vm9, %v3487_v34, -inf  ;;  %v7139_v32 = vld [vmem:[#allocation48_spill] sm:$0xff]  ;;  %v7140_v48 = vld [vmem:[#allocation49_spill] sm:$0xff] }
 0xa33   : > { %v1231_v44 = vsel %vm1207_vm1, %v3486_v19, -inf  ;;  %v1234_v62 = vsel %vm1210_vm8, %v3488_v36, -inf  ;;  %vm1211_vm2 = vcmp.eq.s32.totalorder %v7129_v40, 1  ;;  %vm1392_vm4 = vcmp.eq.s32.totalorder %v7130_v1, 1  ;;  %v3495_v54 = vld [vmem:[%s5942_s3 + $0x26] ss:$0 sm:$0xff] }
 0xa34   : > { %v1238_v30 = vmax.f32 %v1050_v11, %v1230_v27  ;;  %v1233_v33 = vsel %vm1209_vm0, %v3487_v34, -inf  ;;  %vm1394_vm5 = vcmp.eq.s32.totalorder %v7131_v22, 1  ;;  %vm1393_vm10 = vcmp.eq.s32.totalorder %v7132_v51, 1  ;;  %v7141_v34 = vld [vmem:[#allocation50_spill] sm:$0xff]  ;;  %v7144_v27 = vld [vmem:[#allocation53_spill] sm:$0xff]  ;;  %v7147_v22 = vld [vmem:[#allocation56_spill] sm:$0xff] }
 0xa35   : > { %v1237_v55 = vmax.f32 %v1049_v7, %v1229_v39  ;;  %v1240_v49 = vmax.f32 %v1052_v46, %v1232_v21  ;;  %vm1396_vm11 = vcmp.eq.s32.totalorder %v7133_v56, 1  ;;  %vm1395_vm7 = vcmp.eq.s32.totalorder %v7134_v14, 1  ;;  %v7142_v46 = vld [vmem:[#allocation51_spill] sm:$0xff]  ;;  %v3497_v39 = vld [vmem:[%s5942_s3 + $0x7] ss:$0 sm:$0xff]  ;;  %v7149_v56 = vld [vmem:[#allocation58_spill] sm:$0xff] }
 0xa36   : > { %v1239_v15 = vmax.f32 %v1051_v38, %v1231_v44  ;;  %v1242_v28 = vmax.f32 %v1054_v29, %v1234_v62  ;;  %v1235_v43 = vsel %vm1211_vm2, %v3488_v36, -inf  ;;  %v1416_v57 = vsel %vm1392_vm4, %v3489_v59, -inf  ;;  %v3496_v29 = vld [vmem:[%s5942_s3 + $0x36] ss:$0 sm:$0xff] }
 0xa37   : > { %v1241_v9 = vmax.f32 %v1053_v23, %v1233_v33  ;;  %v1418_v3 = vsel %vm1394_vm5, %v3490_v61, -inf  ;;  %v1417_v35 = vsel %vm1393_vm10, %v3489_v59, -inf  ;;  %vm1398_vm9 = vcmp.eq.s32.totalorder %v7135_v25, 1  ;;  %v7143_v23 = vld [vmem:[#allocation52_spill] sm:$0xff]  ;;  %v7146_v21 = vld [vmem:[#allocation55_spill] sm:$0xff] }
 0xa38   : > { %v1420_v17 = vsel %vm1396_vm11, %v3491_v2, -inf  ;;  %v1419_v60 = vsel %vm1395_vm7, %v3490_v61, -inf  ;;  %vm1397_vm1 = vcmp.eq.s32.totalorder %v7136_v31, 1  ;;  %vm1399_vm8 = vcmp.eq.s32.totalorder %v7137_v45, 1  ;;  %v3498_v61 = vld [vmem:[%s5942_s3 + $0x17] ss:$0 sm:$0xff] }
 0xa39   : > { %v1243_v24 = vmax.f32 %v1055_v20, %v1235_v43  ;;  %v1424_v47 = vmax.f32 %v1236_v53, %v1416_v57  ;;  %vm1580_vm0 = vcmp.eq.s32.totalorder %v7138_v41, 1  ;;  %vm1582_vm2 = vcmp.eq.s32.totalorder %v7139_v32, 1  ;;  %v7145_v53 = vld [vmem:[#allocation54_spill] sm:$0xff]  ;;  %v3500_v43 = vld [vmem:[%s5942_s3 + $0x37] ss:$0 sm:$0xff]  ;;  %v7151_v57 = vld [vmem:[#allocation60_spill] sm:$0xff] }
 0xa3a   : > { %v1426_v5 = vmax.f32 %v1238_v30, %v1418_v3  ;;  %v1425_v26 = vmax.f32 %v1237_v55, %v1417_v35  ;;  %v1422_v11 = vsel %vm1398_vm9, %v3492_v16, -inf  ;;  %vm1581_vm4 = vcmp.eq.s32.totalorder %v7140_v48, 1  ;;  %v7154_v41 = vld [vmem:[#allocation63_spill] sm:$0xff] }
 0xa3b   : > { %v1428_v58 = vmax.f32 %v1240_v49, %v1420_v17  ;;  %v1427_v7 = vmax.f32 %v1239_v15, %v1419_v60  ;;  %v1421_v18 = vsel %vm1397_vm1, %v3491_v2, -inf  ;;  %v1423_v42 = vsel %vm1399_vm8, %v3492_v16, -inf  ;;  %v7148_v49 = vld [vmem:[#allocation57_spill] sm:$0xff] }
 0xa3c   : > { %v1604_v19 = vsel %vm1580_vm0, %v3493_v12, -inf  ;;  %v1606_v13 = vsel %vm1582_vm2, %v3494_v0, -inf  ;;  %vm1584_vm5 = vcmp.eq.s32.totalorder %v7141_v34, 1  ;;  %vm1583_vm10 = vcmp.eq.s32.totalorder %v7142_v46, 1  ;;  %v3499_v2 = vld [vmem:[%s5942_s3 + $0x27] ss:$0 sm:$0xff] }
 0xa3d   : > { %v1430_v38 = vmax.f32 %v1242_v28, %v1422_v11  ;;  %v1605_v36 = vsel %vm1581_vm4, %v3493_v12, -inf  ;;  %vm1586_vm11 = vcmp.eq.s32.totalorder %v7143_v23, 1  ;;  %vm1585_vm7 = vcmp.eq.s32.totalorder %v7144_v27, 1  ;;  %v7150_v28 = vld [vmem:[#allocation59_spill] sm:$0xff]  ;;  %v7152_v16 = vld [vmem:[#allocation61_spill] sm:$0xff]  ;;  %v7159_v23 = vld [vmem:[#allocation68_spill] sm:$0xff] }
 0xa3e   : > { %v1429_v37 = vmax.f32 %v1241_v9, %v1421_v18  ;;  %v1431_v20 = vmax.f32 %v1243_v24, %v1423_v42  ;;  %vm1587_vm9 = vcmp.eq.s32.totalorder %v7145_v53, 1  ;;  %vm1768_vm1 = vcmp.eq.s32.totalorder %v7146_v21, 1  ;;  %v3501_v12 = vld [vmem:[%s5942_s3 + $0x8] ss:$0 sm:$0xff]  ;;  %v7156_v11 = vld [vmem:[#allocation65_spill] sm:$0xff]  ;;  %v7158_v42 = vld [vmem:[#allocation67_spill] sm:$0xff] }
 0xa3f   : > { %v1612_v44 = vmax.f32 %v1424_v47, %v1604_v19  ;;  %v1614_v62 = vmax.f32 %v1426_v5, %v1606_v13  ;;  %v1608_v40 = vsel %vm1584_vm5, %v3495_v54, -inf  ;;  %v1607_v59 = vsel %vm1583_vm10, %v3494_v0, -inf  ;;  %v7153_v47 = vld [vmem:[#allocation62_spill] sm:$0xff]  ;;  %v3502_v5 = vld [vmem:[%s5942_s3 + $0x18] ss:$0 sm:$0xff] }
 0xa40   : > { %v1613_v1 = vmax.f32 %v1425_v26, %v1605_v36  ;;  %v1610_v30 = vsel %vm1586_vm11, %v3496_v29, -inf  ;;  %v1609_v33 = vsel %vm1585_vm7, %v3495_v54, -inf  ;;  %vm1770_vm8 = vcmp.eq.s32.totalorder %v7147_v22, 1  ;;  %v7155_v26 = vld [vmem:[#allocation64_spill] sm:$0xff]  ;;  %v7157_v18 = vld [vmem:[#allocation66_spill] sm:$0xff] }
 0xa41   : > { %v1611_v51 = vsel %vm1587_vm9, %v3496_v29, -inf  ;;  %v1792_v55 = vsel %vm1768_vm1, %v3497_v39, -inf  ;;  %vm1769_vm0 = vcmp.eq.s32.totalorder %v7148_v49, 1  ;;  %vm1772_vm2 = vcmp.eq.s32.totalorder %v7149_v56, 1  ;;  %v3504_v29 = vld [vmem:[%s5942_s3 + $0x38] ss:$0 sm:$0xff] }
 0xa42   : > { %v1616_v14 = vmax.f32 %v1428_v58, %v1608_v40  ;;  %v1615_v15 = vmax.f32 %v1427_v7, %v1607_v59  ;;  %vm1771_vm4 = vcmp.eq.s32.totalorder %v7150_v28, 1  ;;  %vm1774_vm5 = vcmp.eq.s32.totalorder %v7151_v57, 1  ;;  %v3503_v7 = vld [vmem:[%s5942_s3 + $0x28] ss:$0 sm:$0xff]  ;;  %v3506_v40 = vld [vmem:[%s5942_s3 + $0x19] ss:$0 sm:$0xff] }
 0xa43   : > { %v1618_v9 = vmax.f32 %v1430_v38, %v1610_v30  ;;  %v1617_v3 = vmax.f32 %v1429_v37, %v1609_v33  ;;  %v1794_v35 = vsel %vm1770_vm8, %v3498_v61, -inf  ;;  %vm1773_vm10 = vcmp.eq.s32.totalorder %v7152_v16, 1  ;;  %v7161_v53 = vld [vmem:[#allocation70_spill] sm:$0xff]  ;;  %v7163_v59 = vld [vmem:[#allocation72_spill] sm:$0xff] }
 0xa44   : > { %v1619_v25 = vmax.f32 %v1431_v20, %v1611_v51  ;;  %v1800_v17 = vmax.f32 %v1612_v44, %v1792_v55  ;;  %v1793_v60 = vsel %vm1769_vm0, %v3497_v39, -inf  ;;  %v1796_v31 = vsel %vm1772_vm2, %v3499_v2, -inf  ;;  %v7160_v20 = vld [vmem:[#allocation69_spill] sm:$0xff]  ;;  %v3505_v44 = vld [vmem:[%s5942_s3 + $0x9] ss:$0 sm:$0xff] }
 0xa45   : > { %v1795_v45 = vsel %vm1771_vm4, %v3498_v61, -inf  ;;  %v1798_v24 = vsel %vm1774_vm5, %v3500_v43, -inf  ;;  %vm1775_vm11 = vcmp.eq.s32.totalorder %v7153_v47, 1  ;;  %vm1956_vm7 = vcmp.eq.s32.totalorder %v7154_v41, 1  ;;  %v7164_v61 = vld [vmem:[#allocation73_spill] sm:$0xff]  ;;  %v7165_v49 = vld [vmem:[#allocation74_spill] sm:$0xff] }
 0xa46   : > { %v1802_v0 = vmax.f32 %v1614_v62, %v1794_v35  ;;  %v1797_v32 = vsel %vm1773_vm10, %v3499_v2, -inf  ;;  %vm1958_vm9 = vcmp.eq.s32.totalorder %v7155_v26, 1  ;;  %vm1957_vm1 = vcmp.eq.s32.totalorder %v7156_v11, 1  ;;  %v7162_v62 = vld [vmem:[#allocation71_spill] sm:$0xff]  ;;  %v3507_v55 = vld [vmem:[%s5942_s3 + $0x29] ss:$0 sm:$0xff] }
 0xa47   : > { %v1801_v48 = vmax.f32 %v1613_v1, %v1793_v60  ;;  %v1804_v58 = vmax.f32 %v1616_v14, %v1796_v31  ;;  %vm1960_vm8 = vcmp.eq.s32.totalorder %v7157_v18, 1  ;;  %vm1959_vm0 = vcmp.eq.s32.totalorder %v7158_v42, 1  ;;  %v7166_v2 = vld [vmem:[#allocation75_spill] sm:$0xff]  ;;  %v7168_v35 = vld [vmem:[#allocation77_spill] sm:$0xff]  ;;  %v7170_v41 = vld [vmem:[#allocation80_spill] sm:$0xff] }
 0xa48   : > { %v1803_v19 = vmax.f32 %v1615_v15, %v1795_v45  ;;  %v1806_v13 = vmax.f32 %v1618_v9, %v1798_v24  ;;  %v1799_v54 = vsel %vm1775_vm11, %v3500_v43, -inf  ;;  %v1980_v34 = vsel %vm1956_vm7, %v3501_v12, -inf  ;;  %v3508_v9 = vld [vmem:[%s5942_s3 + $0x39] ss:$0 sm:$0xff]  ;;  %v3509_v24 = vld [vmem:[%s5942_s3 + $0xa] ss:$0 sm:$0xff] }
 0xa49   : > { %v1805_v46 = vmax.f32 %v1617_v3, %v1797_v32  ;;  %v1982_v38 = vsel %vm1958_vm9, %v3502_v5, -inf  ;;  %v1981_v36 = vsel %vm1957_vm1, %v3501_v12, -inf  ;;  %vm1962_vm2 = vcmp.eq.s32.totalorder %v7159_v23, 1  ;;  %v7167_v3 = vld [vmem:[#allocation76_spill] sm:$0xff]  ;;  %v7169_v47 = vld [vmem:[#allocation79_spill] sm:$0xff]  ;;  %v7171_v26 = vld [vmem:[#allocation81_spill] sm:$0xff] }
 0xa4a   : > { %v1984_v27 = vsel %vm1960_vm8, %v3503_v7, -inf  ;;  %v1983_v37 = vsel %vm1959_vm0, %v3502_v5, -inf  ;;  %vm1961_vm4 = vcmp.eq.s32.totalorder %v7160_v20, 1  ;;  %vm1963_vm5 = vcmp.eq.s32.totalorder %v7161_v53, 1  ;;  %v3510_v12 = vld [vmem:[%s5942_s3 + $0x1a] ss:$0 sm:$0xff] }
 0xa4b   : > { %v6073_v39 = vmax.f32 %v1619_v25, %v1799_v54  ;;  %v1988_v21 = vmax.f32 %v1800_v17, %v1980_v34  ;;  %vm2144_vm10 = vcmp.eq.s32.totalorder %v7162_v62, 1  ;;  %vm2146_vm11 = vcmp.eq.s32.totalorder %v7163_v59, 1  ;;  %v7173_v18 = vld [vmem:[#allocation82_spill] sm:$0xff]  ;;  %v7176_v23 = vld [vmem:[#allocation84_spill] sm:$0xff]  ;;  %v7177_v20 = vld [vmem:[#allocation85_spill] sm:$0xff] }
 0xa4c   : > { %v1990_v1 = vmax.f32 %v1802_v0, %v1982_v38  ;;  %v1989_v30 = vmax.f32 %v1801_v48, %v1981_v36  ;;  %v1986_v33 = vsel %vm1962_vm2, %v3504_v29, -inf  ;;  %vm2145_vm7 = vcmp.eq.s32.totalorder %v7164_v61, 1  ;;  %v3513_v54 = vld [vmem:[%s5942_s3 + $0xb] ss:$0 sm:$0xff]  ;;  %v3517_v53 = vld [vmem:[%s5942_s3 + $0xc] ss:$0 sm:$0xff] }
 0xa4d   : > { %v1985_v22 = vsel %vm1961_vm4, %v3503_v7, -inf  ;;  %v6080_v51 = vsel %vm1963_vm5, %v3504_v29, -inf  ;;  %vm2148_vm9 = vcmp.eq.s32.totalorder %v7165_v49, 1  ;;  %vm2147_vm1 = vcmp.eq.s32.totalorder %v7166_v2, 1  ;;  %v3511_v7 = vld [vmem:[%s5942_s3 + $0x2a] ss:$0 sm:$0xff] }
 0xa4e   : > { %v1992_v56 = vmax.f32 %v1804_v58, %v1984_v27  ;;  %v1991_v14 = vmax.f32 %v1803_v19, %v1983_v37  ;;  %v2168_v15 = vsel %vm2144_vm10, %v3505_v44, -inf  ;;  %v2170_v28 = vsel %vm2146_vm11, %v3506_v40, -inf  ;;  %v7172_v58 = vld [vmem:[#allocation78_spill] sm:$0xff]  ;;  %v3512_v29 = vld [vmem:[%s5942_s3 + $0x3a] ss:$0 sm:$0xff]  ;;  %v7180_v49 = vld [vmem:[#allocation93_spill] sm:$0xff] }
 0xa4f   : > { %v1994_v43 = vmax.f32 %v1806_v13, %v1986_v33  ;;  %v2169_v57 = vsel %vm2145_vm7, %v3505_v44, -inf  ;;  %vm2150_vm8 = vcmp.eq.s32.totalorder %v7167_v3, 1  ;;  %vm2149_vm0 = vcmp.eq.s32.totalorder %v7168_v35, 1  ;;  %v7174_v13 = vld [vmem:[#allocation83_spill] sm:$0xff]  ;;  %v7175_v34 = vld [vmem:[#allocation90_spill] sm:$0xff]  ;;  %v7179_v61 = vld [vmem:[#allocation92_spill] sm:$0xff] }
 0xa50   : > { %v1993_v16 = vmax.f32 %v1805_v46, %v1985_v22  ;;  %v1995_v25 = vmax.f32 %v6073_v39, %v6080_v51  ;;  %v2172_v17 = vsel %vm2148_vm9, %v3507_v55, -inf  ;;  %v2171_v60 = vsel %vm2147_vm1, %v3506_v40, -inf  ;;  %v7178_v33 = vld [vmem:[#allocation91_spill] sm:$0xff] }
 0xa51   : > { %v2176_v31 = vmax.f32 %v1988_v21, %v2168_v15  ;;  %v6090_v45 = vmax.f32 %v1990_v1, %v2170_v28  ;;  %vm2332_vm2 = vcmp.eq.s32.totalorder %v7169_v47, 1  ;;  %vm2334_vm4 = vcmp.eq.s32.totalorder %v7170_v41, 1  ;;  %v3518_v28 = vld [vmem:[%s5942_s3 + $0x1c] ss:$0 sm:$0xff] }
 0xa52   : > { %v6096_v0 = vmax.f32 %v1989_v30, %v2169_v57  ;;  %v2174_v32 = vsel %vm2150_vm8, %v3508_v9, -inf  ;;  %v2173_v5 = vsel %vm2149_vm0, %v3507_v55, -inf  ;;  %vm2333_vm5 = vcmp.eq.s32.totalorder %v7171_v26, 1  ;;  %v3514_v30 = vld [vmem:[%s5942_s3 + $0x1b] ss:$0 sm:$0xff] }
 0xa53   : > { %v2180_v11 = vmax.f32 %v1992_v56, %v2172_v17  ;;  %v6099_v48 = vmax.f32 %v1991_v14, %v2171_v60  ;;  %vm2151_vm10 = vcmp.eq.s32.totalorder %v7172_v58, 1  ;;  %vm2336_vm11 = vcmp.eq.s32.totalorder %v7173_v18, 1  ;;  %v7181_v14 = vld [vmem:[#allocation86_spill] sm:$0xff]  ;;  %v7185_v26 = vld [vmem:[#allocation100_spill] sm:$0xff] }
 0xa54   : > { %v2356_v42 = vsel %vm2332_vm2, %v3509_v24, -inf  ;;  %v2358_v19 = vsel %vm2334_vm4, %v3510_v12, -inf  ;;  %vm2335_vm7 = vcmp.eq.s32.totalorder %v7174_v13, 1  ;;  %vm2520_vm9 = vcmp.eq.s32.totalorder %v7175_v34, 1  ;;  %v3521_v57 = vld [vmem:[%s5942_s3 + $0xd] ss:$0 sm:$0xff] }
 0xa55   : > { %v6107_v46 = vmax.f32 %v1994_v43, %v2174_v32  ;;  %v6109_v38 = vmax.f32 %v1993_v16, %v2173_v5  ;;  %v2357_v36 = vsel %vm2333_vm5, %v3509_v24, -inf  ;;  %vm2338_vm1 = vcmp.eq.s32.totalorder %v7176_v23, 1  ;;  %v7182_v43 = vld [vmem:[#allocation98_spill] sm:$0xff]  ;;  %v7183_v16 = vld [vmem:[#allocation99_spill] sm:$0xff]  ;;  %v3516_v13 = vld [vmem:[%s5942_s3 + $0x3b] ss:$0 sm:$0xff] }
 0xa56   : > { %v6113_v27 = vsel %vm2151_vm10, %v3508_v9, -inf  ;;  %v2360_v37 = vsel %vm2336_vm11, %v3511_v7, -inf  ;;  %vm2337_vm8 = vcmp.eq.s32.totalorder %v7177_v20, 1  ;;  %vm2708_vm0 = vcmp.eq.s32.totalorder %v5807_v4, 1  ;;  %v3515_v4 = vld [vmem:[%s5942_s3 + $0x2b] ss:$0 sm:$0xff] }
 0xa57   : > { %v2364_v21 = vmax.f32 %v2176_v31, %v2356_v42  ;;  %v2366_v44 = vmax.f32 %v6090_v45, %v2358_v19  ;;  %v2359_v62 = vsel %vm2335_vm7, %v3510_v12, -inf  ;;  %v2544_v40 = vsel %vm2520_vm9, %v3513_v54, -inf  ;;  %v7184_v31 = vld [vmem:[#allocation94_spill] sm:$0xff]  ;;  %v7186_v42 = vld [vmem:[#allocation101_spill] sm:$0xff]  ;;  %v7188_v34 = vld [vmem:[#allocation96_spill] sm:$0xff] }
 0xa58   : > { %v2365_v59 = vmax.f32 %v6096_v0, %v2357_v36  ;;  %v6120_v1 = vsel %vm2338_vm1, %v3512_v29, -inf  ;;  %vm2522_vm2 = vcmp.eq.s32.totalorder %v7178_v33, 1  ;;  %vm2521_vm4 = vcmp.eq.s32.totalorder %v7179_v61, 1  ;;  %v3519_v5 = vld [vmem:[%s5942_s3 + $0x2c] ss:$0 sm:$0xff] }
 0xa59   : > { %v2368_v22 = vmax.f32 %v2180_v11, %v2360_v37  ;;  %v6125_v55 = vsel %vm2337_vm8, %v3511_v7, -inf  ;;  %vm2524_vm5 = vcmp.eq.s32.totalorder %v7180_v49, 1  ;;  %v2732_v2 = vsel %vm2708_vm0, %v3517_v53, -inf  ;;  %v3520_v23 = vld [vmem:[%s5942_s3 + $0x3c] ss:$0 sm:$0xff] }
 0xa5a   : > { %v2367_v56 = vmax.f32 %v6099_v48, %v2359_v62  ;;  %vm2339_vm10 = vcmp.eq.s32.totalorder %v7181_v14, 1  ;;  %v2552_v15 = vmax.f32 %v2364_v21, %v2544_v40  ;;  %vm2710_vm11 = vcmp.eq.s32.totalorder %v7182_v43, 1  ;;  %v3522_v48 = vld [vmem:[%s5942_s3 + $0x1d] ss:$0 sm:$0xff]  ;;  %v3523_v62 = vld [vmem:[%s5942_s3 + $0x2d] ss:$0 sm:$0xff] }
 0xa5b   : > { %v2370_v9 = vmax.f32 %v6107_v46, %v6120_v1  ;;  %v2546_v3 = vsel %vm2522_vm2, %v3514_v30, -inf  ;;  %v2545_v35 = vsel %vm2521_vm4, %v3513_v54, -inf  ;;  %vm2709_vm7 = vcmp.eq.s32.totalorder %v7183_v16, 1  ;;  %v7187_v54 = vld [vmem:[#allocation95_spill] sm:$0xff]  ;;  %v7192_v16 = vld [vmem:[#allocation104_spill] sm:$0xff] }
 0xa5c   : > { %v2548_v60 = vsel %vm2524_vm5, %v3515_v4, -inf  ;;  %vm2523_vm9 = vcmp.eq.s32.totalorder %v7184_v31, 1  ;;  %v2740_v45 = vmax.f32 %v2552_v15, %v2732_v2  ;;  %v2369_v24 = vmax.f32 %v6109_v38, %v6125_v55  ;;  %v7190_v1 = vld [vmem:[#allocation103_spill] sm:$0xff] }
 0xa5d   : > { %v6140_v47 = vsel %vm2339_vm10, %v3512_v29, -inf  ;;  %v2734_v12 = vsel %vm2710_vm11, %v3518_v28, -inf  ;;  %v2554_v0 = vmax.f32 %v2366_v44, %v2546_v3  ;;  %v2733_v32 = vsel %vm2709_vm7, %v3517_v53, -inf  ;;  %v7189_v53 = vld [vmem:[#allocation102_spill] sm:$0xff]  ;;  %v3524_v3 = vld [vmem:[%s5942_s3 + $0x3d] ss:$0 sm:$0xff] }
 0xa5e   : > { %vm2712_vm8 = vcmp.eq.s32.totalorder %v7185_v26, 1  ;;  %v2553_v58 = vmax.f32 %v2365_v59, %v2545_v35  ;;  %v2556_v7 = vmax.f32 %v2368_v22, %v2548_v60  ;;  %v2547_v18 = vsel %vm2523_vm9, %v3514_v30, -inf  ;;  %v7191_v22 = vld [vmem:[#allocation97_spill] sm:$0xff] }
 0xa5f   : > { %vm2711_vm0 = vcmp.eq.s32.totalorder %v7186_v42, 1  ;;  %vm2526_vm2 = vcmp.eq.s32.totalorder %v7187_v54, 1  ;;  %vm2525_vm4 = vcmp.eq.s32.totalorder %v7188_v34, 1  ;;  %v2742_v46 = vmax.f32 %v2554_v0, %v2734_v12 }
 0xa60   : > { %v2741_v36 = vmax.f32 %v2553_v58, %v2733_v32  ;;  %v2736_v29 = vsel %vm2712_vm8, %v3519_v5, -inf  ;;  %v2735_v20 = vsel %vm2711_vm0, %v3518_v28, -inf  ;;  %vm2714_vm11 = vcmp.eq.s32.totalorder %v7189_v53, 1 }
 0xa61   : > { %v2555_v40 = vmax.f32 %v2367_v56, %v2547_v18  ;;  %v2550_v59 = vsel %vm2526_vm2, %v3516_v13, -inf  ;;  %vm2713_vm7 = vcmp.eq.s32.totalorder %v7190_v1, 1  ;;  %v2549_v61 = vsel %vm2525_vm4, %v3515_v4, -inf }
 0xa62   : > { %vm2527_vm9 = vcmp.eq.s32.totalorder %v7191_v22, 1  ;;  %v2744_v55 = vmax.f32 %v2556_v7, %v2736_v29  ;;  %v2738_v14 = vsel %vm2714_vm11, %v3520_v23, -inf  ;;  %v2558_v15 = vmax.f32 %v2370_v9, %v2550_v59  ;;  %v6231_v22 = vld [vmem:[%s3767_s25 + $0x10] sm:$0xff] }
 0xa63   : > { %v2743_v2 = vmax.f32 %v2555_v40, %v2735_v20  ;;  %v2737_v28 = vsel %vm2713_vm7, %v3519_v5, -inf  ;;  %v2183_v4 = vmax.f32 %v1995_v25, %v6113_v27  ;;  %v2557_v35 = vmax.f32 %v2369_v24, %v2549_v61  ;;  %v6227_v61 = vld [vmem:[%s3767_s25 + $0x18] sm:$0xff] }
 0xa64   : > { %vm2715_vm0 = vcmp.eq.s32.totalorder %v7192_v16, 1  ;;  %v2551_v31 = vsel %vm2527_vm9, %v3516_v13, -inf  ;;  %v2746_v9 = vmax.f32 %v2558_v15, %v2738_v14  ;;  %v6247_v14 = vld [vmem:[%s3767_s25 + $0x20] sm:$0xff] }
 0xa65   : > { %v2371_v12 = vmax.f32 %v2183_v4, %v6140_v47  ;;  %v2739_v32 = vsel %vm2715_vm0, %v3520_v23, -inf }
 0xa67   : > { %v2874_v17 = vpop.permute.xlu1 %2873  ;;  %v2559_v25 = vmax.f32 %v2371_v12, %v2551_v31 }
 0xa68   : > { %vm2896_vm1 = vcmp.eq.s32.totalorder %v2874_v17, 1 }
 0xa69   : > { %v2920_v41 = vsel %vm2896_vm1, %v3521_v57, -inf  ;;  %v2747_v26 = vmax.f32 %v2559_v25, %v2739_v32  ;;  %v7203_v32 = vld [vmem:[#allocation89_spill] sm:$0xff] }
 0xa6a   : > { %v6144_v11 = vmax.f32 %v2740_v45, %v2920_v41  ;;  %v2745_v41 = vmax.f32 %v2557_v35, %v2737_v28  ;;  %v6259_v28 = vld [vmem:[%s3767_s25 + $0x38] sm:$0xff] }
 0xa6b   : > { %v2880_v19 = vpop.permute.xlu1 %2879 }
 0xa6c   : > { %vm2898_vm5 = vcmp.eq.s32.totalorder %v2880_v19, 1  ;;  %v2877_v38 = vpop.permute.xlu0 %2876 }
 0xa6d   : > { %v2922_v37 = vsel %vm2898_vm5, %v3522_v48, -inf  ;;  %vm2897_vm10 = vcmp.eq.s32.totalorder %v2877_v38, 1 }
 0xa6e   : > { %v6153_v21 = vmax.f32 %v2742_v46, %v2922_v37  ;;  %v2921_v44 = vsel %vm2897_vm10, %v3521_v57, -inf }
 0xa6f   : > { %v6159_v30 = vmax.f32 %v2741_v36, %v2921_v44  ;;  %v2886_v33 = vpop.permute.xlu1 %2885 }
 0xa70   : > { %vm2900_vm1 = vcmp.eq.s32.totalorder %v2886_v33, 1  ;;  %v2883_v49 = vpop.permute.xlu0 %2882 }
 0xa71   : > { %v2924_v56 = vsel %vm2900_vm1, %v3523_v62, -inf  ;;  %vm2899_vm8 = vcmp.eq.s32.totalorder %v2883_v49, 1 }
 0xa72   : > { %v6164_v43 = vmax.f32 %v2744_v55, %v2924_v56  ;;  %v2923_v57 = vsel %vm2899_vm8, %v3522_v48, -inf }
 0xa73   : > { %v6172_v17 = vmax.f32 %v2743_v2, %v2923_v57  ;;  %v2892_v60 = vpop.permute.xlu1 %2891  ;;  %v6243_v2 = vld [vmem:[%s3767_s25 + $0x28] sm:$0xff]  ;;  %v6263_v57 = vld [vmem:[%s3767_s25 + $0x30] sm:$0xff] }
 0xa74   : > { %vm2902_vm2 = vcmp.eq.s32.totalorder %v2892_v60, 1  ;;  %v2889_v45 = vpop.permute.xlu0 %2888  ;;  %v7194_v60 = vld [vmem:[#allocation87_spill] sm:$0xff] }
 0xa75   : > { %v2926_v0 = vsel %vm2902_vm2, %v3524_v3, -inf  ;;  %vm2901_vm4 = vcmp.eq.s32.totalorder %v2889_v45, 1 }
 0xa76   : > { %v6177_v39 = vmax.f32 %v2746_v9, %v2926_v0  ;;  %v2925_v51 = vsel %vm2901_vm4, %v3523_v62, -inf  ;;  %v6211_v62 = vld [vmem:[%s3767_s25 + $0x8] sm:$0xff]  ;;  %v7198_v9 = vld [vmem:[#allocation88_spill] sm:$0xff] }
 0xa77   : > { %v6179_v27 = vmax.f32 %v2745_v41, %v2925_v51  ;;  %v2953_v24 = vpop.permute.xlu1 %2952 }
 0xa78   : > { %v2895_v5 = vpop.permute.xlu0 %2894  ;;  %vm2968_vm10 = vcmp.ne.s32.totalorder %v2953_v24, 0 }
 0xa79   : > { %vm2903_vm5 = vcmp.eq.s32.totalorder %v2895_v5, 1  ;;  %vm2976_vm9 = vmor %vm2936_vm12, %vm2968_vm10  ;;  %v3525_v5 = vld [vmem:[%s5942_s3 + $0xe] ss:$0 sm:$0xff] }
 0xa7a   : > { %v2927_v48 = vsel %vm2903_vm5, %v3524_v3, -inf }
 0xa7b   : > { %v6181_v58 = vmax.f32 %v2747_v26, %v2927_v48  ;;  %v2957_v7 = vpop.permute.xlu1 %2956 }
 0xa7c   : > { %v2955_v18 = vpop.permute.xlu0 %2954  ;;  %vm2970_vm11 = vcmp.ne.s32.totalorder %v2957_v7, 0 }
 0xa7d   : > { %vm2978_vm1 = vmor %vm2938_vm13, %vm2970_vm11  ;;  %vm2969_vm8 = vcmp.ne.s32.totalorder %v2955_v18, 0  ;;  %v6335_v18 = vld [vmem:[%s5942_s3 + $0x1e] ss:$0 sm:$0xff] }
 0xa7e   : > { %vm2977_vm3 = vmor %vm2937_vm15, %vm2969_vm8  ;;  %vm6759_vm15 = vcmp.eq.s32.totalorder %v6216_v8, 15  ;;  %vm6755_vm8 = vcmp.eq.s32.totalorder %v6247_v14, 15 }
 0xa7f   : > { %v6183_v47 = vpop.permute.xlu1 %2960  ;;  %v3132_v33 = vsel %vm6759_vm15, 1, %v6853_v6  ;;  %v3136_v15 = vsel %vm6755_vm8, 1, %v6853_v6 }
 0xa80   : > { %v6185_v42 = vpop.permute.xlu0 %2958 }
 0xa83   : > { %v6187_v19 = vpop.permute.xlu1 %2964 }
 0xa84   : > { %v6189_v13 = vpop.permute.xlu0 %2962 }
 0xa87   : > { %v2985_v54 = vpop.permute.xlu1 %2984 }
 0xa88   : > { %v6191_v34 = vpop.permute.xlu0 %2966  ;;  %vm3000_vm7 = vcmp.ne.s32.totalorder %v2985_v54, 0 }
 0xa89   : > { %vm3008_vm0 = vmor %vm2976_vm9, %vm3000_vm7  ;;  %vm6760_vm9 = vcmp.eq.s32.totalorder %v6211_v62, 15 }
 0xa8a   : > { %v3133_v1 = vsel %vm6760_vm9, 1, %v6853_v6 }
 0xa8b   : > { %v2989_v46 = vpop.permute.xlu1 %2988 }
 0xa8c   : > { %v2987_v38 = vpop.permute.xlu0 %2986  ;;  %vm3002_vm2 = vcmp.ne.s32.totalorder %v2989_v46, 0 }
 0xa8d   : > { %vm3001_vm5 = vcmp.ne.s32.totalorder %v2987_v38, 0  ;;  %vm3010_vm12 = vmor %vm2978_vm1, %vm3002_vm2  ;;  %vm6756_vm1 = vcmp.eq.s32.totalorder %v6243_v2, 15  ;;  %vm6754_vm2 = vcmp.eq.s32.totalorder %v6259_v28, 15 }
 0xa8e   : > { %vm3009_vm13 = vmor %vm2977_vm3, %vm3001_vm5  ;;  %vm6758_vm3 = vcmp.eq.s32.totalorder %v6227_v61, 15  ;;  %v3137_v56 = vsel %vm6756_vm1, 1, %v6853_v6  ;;  %v3139_v3 = vsel %vm6754_vm2, 1, %v6853_v6  ;;  %vm2972_vm5 = vcmp.ne.s32.totalorder %v6183_v47, 0 }
 0xa8f   : > { %v6193_v36 = vpop.permute.xlu1 %2992  ;;  %v3135_v55 = vsel %vm6758_vm3, 1, %v6853_v6  ;;  %vm7195_vm2 = vcmp.eq.s32.totalorder %v7194_v60, 14  ;;  %v7228_v60 = vmov 0 }
 0xa90   : > { %v6195_v29 = vpop.permute.xlu0 %2990 }
 0xa91   : > { %vm3003_vm1 = vcmp.ne.s32.totalorder %v6195_v29, 0 }
 0xa93   : > { %v6197_v23 = vpop.permute.xlu1 %2996 }
 0xa94   : > { %v6199_v37 = vpop.permute.xlu0 %2994 }
 0xa95   : > { %vm3005_vm3 = vcmp.ne.s32.totalorder %v6199_v37, 0 }
 0xa97   : > { %v3017_v20 = vpop.permute.xlu1 %3016 }
 0xa98   : > { %vm3032_vm4 = vcmp.ne.s32.totalorder %v3017_v20, 0  ;;  %v6205_v53 = vpop.permute.xlu0 %2998 }
 0xa99   : > { %vm3040_vm14 = vmor %vm3008_vm0, %vm3032_vm4  ;;  %vm6753_vm4 = vcmp.eq.s32.totalorder %v6263_v57, 15 }
 0xa9a   : > { %v3052_v50 = vsel %vm3040_vm14, 1, %v6853_v6  ;;  %vm6757_vm14 = vcmp.eq.s32.totalorder %v6231_v22, 15  ;;  %v3138_v4 = vsel %vm6753_vm4, 1, %v6853_v6  ;;  %vm3004_vm4 = vcmp.ne.s32.totalorder %v6193_v36, 0 }
 0xa9b   : > { %3061 = vperm.xlu1 %3589, %v3052_v50   ;;  %v3021_v63 = vpop.permute.xlu1 %3020  ;;  %v3134_v49 = vsel %vm6757_vm14, 1, %v6853_v6  ;;  %vm7199_vm14 = vcmp.eq.s32.totalorder %v7198_v9, 14 }
 0xa9c   : > { %vm3034_vm10 = vcmp.ne.s32.totalorder %v3021_v63, 0  ;;  %v3019_v44 = vpop.permute.xlu0 %3018 }
 0xa9d   : > { %vm3042_vm11 = vmor %vm3010_vm12, %vm3034_vm10  ;;  %vm3033_vm7 = vcmp.ne.s32.totalorder %v3019_v44, 0  ;;  %vm2971_vm12 = vcmp.ne.s32.totalorder %v6185_v42, 0 }
 0xa9e   : > { %v3054_v40 = vsel %vm3042_vm11, 1, %v6853_v6  ;;  %vm3041_vm0 = vmor %vm3009_vm13, %vm3033_vm7  ;;  %vm2974_vm13 = vcmp.ne.s32.totalorder %v6187_v19, 0  ;;  %vm2973_vm11 = vcmp.ne.s32.totalorder %v6189_v13, 0  ;;  %vm7193_vm7 = vcmp.eq.s32.totalorder %v5619_v10, 14 }
 0xa9f   : > { %v3053_v59 = vsel %vm3041_vm0, 1, %v6853_v6  ;;  %3067 = vperm.xlu1 %3589, %v3054_v40   ;;  %v3025_v16 = vpop.permute.xlu1 %3024  ;;  %vm2980_vm10 = vmor %vm2940_vm6, %vm2972_vm5 }
 0xaa0   : > { %3064 = vperm.xlu0 %3588, %v3053_v59   ;;  %v3023_v35 = vpop.permute.xlu0 %3022  ;;  %vm2979_vm0 = vmor %vm7193_vm7, %vm2971_vm12  ;;  %vm3036_vm5 = vcmp.ne.s32.totalorder %v3025_v16, 0  ;;  %v7225_v16 = vmov 0 }
 0xaa1   : > { %vm6299_vm8 = vmor %vm7195_vm2, %vm2974_vm13  ;;  %vm3035_vm7 = vcmp.ne.s32.totalorder %v3023_v35, 0  ;;  %vm3006_vm13 = vcmp.ne.s32.totalorder %v6197_v23, 0  ;;  %v7221_v35 = vmov 0 }
 0xaa2   : > { %vm6307_vm6 = vmor %vm7199_vm14, %vm2973_vm11 }
 0xaa3   : > { %3142 = vrot.lane.b32.xlu1 %v3133_v1, %s3687_s26  ;;  %v7201_v52 = vsel %vm6307_vm6, 4294967295, %v7200_v52  ;;  %vm3012_vm12 = vmor %vm2980_vm10, %vm3004_vm4  ;;  %v3029_v45 = vpop.permute.xlu1 %3028 }
 0xaa4   : > { %3140 = vrot.lane.b32.xlu0 %v3132_v33, %s3687_s26  ;;  %v3027_v10 = vpop.permute.xlu0 %3026  ;;  %vm3011_vm2 = vmor %vm2979_vm0, %vm3003_vm1  ;;  %vm3038_vm14 = vcmp.ne.s32.totalorder %v3029_v45, 0  ;;  %vm7202_vm4 = vnez %v7201_v52  ;;  %vm2975_vm1 = vcmp.ne.s32.totalorder %v6191_v34, 0  ;;  %v7237_v52 = vld [vmem:[#allocation21_spill] sm:$0xff] }
 0xaa5   : > { %vm3044_vm15 = vmor %vm3012_vm12, %vm3036_vm5  ;;  %vm3037_vm6 = vcmp.ne.s32.totalorder %v3027_v10, 0  ;;  %vm3007_vm5 = vcmp.ne.s32.totalorder %v6205_v53, 0  ;;  %v7239_v10 = vmov 0 }
 0xaa6   : > { %vm3043_vm9 = vmor %vm3011_vm2, %vm3035_vm7  ;;  %v3056_v12 = vsel %vm3044_vm15, 1, %v6853_v6  ;;  %vm7204_vm7 = vcmp.eq.s32.totalorder %v7203_v32, 14 }
 0xaa7   : > { %3146 = vrot.lane.b32.xlu1 %v3135_v55, %s3687_s26  ;;  %vm3014_vm11 = vmor %vm6299_vm8, %vm3006_vm13  ;;  %v3055_v0 = vsel %vm3043_vm9, 1, %v6853_v6 }
 0xaa8   : > { %3144 = vrot.lane.b32.xlu0 %v3134_v49, %s3687_s26  ;;  %vm3013_vm10 = vmor %vm7202_vm4, %vm3005_vm3  ;;  %v3031_v41 = vpop.permute.xlu0 %3030 }
 0xaa9   : > { %vm3046_vm0 = vmor %vm3014_vm11, %vm3038_vm14  ;;  %vm3039_vm8 = vcmp.ne.s32.totalorder %v3031_v41, 0  ;;  %v7244_v41 = vld [vmem:[#allocation15_spill] sm:$0xff] }
 0xaaa   : > { %vm3045_vm12 = vmor %vm3013_vm10, %vm3037_vm6  ;;  %v3058_v51 = vsel %vm3046_vm0, 1, %v6853_v6 }
 0xaab   : > { %3150 = vrot.lane.b32.xlu1 %v3137_v56, %s3687_s26  ;;  %vm2983_vm2 = vmor %vm7204_vm7, %vm2975_vm1  ;;  %v3057_v25 = vsel %vm3045_vm12, 1, %v6853_v6  ;;  %vm7206_vm1 = vcmp.eq.s32.totalorder %v6211_v62, 15  ;;  %v7214_v62 = vmov 0 }
 0xaac   : > { %3148 = vrot.lane.b32.xlu0 %v3136_v15, %s3687_s26  ;;  %vm3015_vm15 = vmor %vm2983_vm2, %vm3007_vm5 }
 0xaad   : > { %vm3047_vm3 = vmor %vm3015_vm15, %vm3039_vm8  ;;  %vm7210_vm8 = vcmp.eq.s32.totalorder %v6216_v8, 15  ;;  %vm7213_vm15 = vcmp.eq.s32.totalorder %v6227_v61, 15  ;;  %v7218_v8 = vmov 0  ;;  %v7223_v61 = vld [vmem:[#allocation6_spill] sm:$0xff] }
 0xaae   : > { %v3059_v24 = vsel %vm3047_vm3, 1, %v6853_v6 }
 0xaaf   : > { %3154 = vrot.lane.b32.xlu1 %v3139_v3, %s3687_s26 }
 0xab0   : > { %3152 = vrot.lane.b32.xlu0 %v3138_v4, %s3687_s26 }
 0xab3   : > { %3174 = vrot.lane.b32.xlu1 %v3133_v1, %s3688_s27 }
 0xab4   : > { %3172 = vrot.lane.b32.xlu0 %v3132_v33, %s3688_s27 }
 0xab7   : > { %3178 = vrot.lane.b32.xlu1 %v3135_v55, %s3688_s27 }
 0xab8   : > { %3176 = vrot.lane.b32.xlu0 %v3134_v49, %s3688_s27 }
 0xabb   : > { %3182 = vrot.lane.b32.xlu1 %v3137_v56, %s3688_s27 }
 0xabc   : > { %3180 = vrot.lane.b32.xlu0 %v3136_v15, %s3688_s27 }
 0xabf   : > { %3186 = vrot.lane.b32.xlu1 %v3139_v3, %s3688_s27 }
 0xac0   : > { %3184 = vrot.lane.b32.xlu0 %v3138_v4, %s3688_s27 }
 0xac3   : > { %3206 = vrot.lane.b32.xlu1 %v3133_v1, %s3689_s28 }
 0xac4   : > { %3204 = vrot.lane.b32.xlu0 %v3132_v33, %s3689_s28  ;;  %v7205_v33 = vld [vmem:[#allocation16_spill] sm:$0xff] }
 0xac5   : > { %vm216_vm10 = vcmp.ne.s32.totalorder %v7205_v33, 0  ;;  %v7277_v33 = vld [vmem:[#allocation30_spill] sm:$0xff] }
 0xac7   : > { %3210 = vrot.lane.b32.xlu1 %v3135_v55, %s3689_s28  ;;  %v7278_v55 = vld [vmem:[#allocation20_spill] sm:$0xff] }
 0xac8   : > { %3208 = vrot.lane.b32.xlu0 %v3134_v49, %s3689_s28  ;;  %v7209_v49 = vld [vmem:[#allocation14_spill] sm:$0xff] }
 0xac9   : > { %vm215_vm12 = vcmp.ne.s32.totalorder %v7209_v49, 0  ;;  %v7279_v49 = vld [vmem:[#allocation23_spill] sm:$0xff] }
 0xacb   : > { %3214 = vrot.lane.b32.xlu1 %v3137_v56, %s3689_s28  ;;  %v7211_v56 = vmov 0 }
 0xacc   : > { %3212 = vrot.lane.b32.xlu0 %v3136_v15, %s3689_s28 }
 0xacf   : > { %3218 = vrot.lane.b32.xlu1 %v3139_v3, %s3689_s28 }
 0xad0   : > { %3216 = vrot.lane.b32.xlu0 %v3138_v4, %s3689_s28  ;;  %v7216_v4 = vld [vmem:[#allocation8_spill] sm:$0xff] }
 0xad3   : > { %3073 = vperm.xlu1 %3589, %v3056_v12   ;;  %v7242_v12 = vld [vmem:[#allocation22_spill] sm:$0xff] }
 0xad4   : > { %3070 = vperm.xlu0 %3588, %v3055_v0   ;;  %v7245_v0 = vld [vmem:[#allocation13_spill] sm:$0xff] }
 0xad7   : > { %3079 = vperm.xlu1 %3589, %v3058_v51  }
 0xad8   : > { %3076 = vperm.xlu0 %3588, %v3057_v25   ;;  %v7251_v25 = vmov 0 }
 0xadc   : > { %3082 = vperm.xlu0 %3588, %v3059_v24  }
 0xb1a   : > { %v3062_v26 = vpop.permute.xlu1 %3061 }
 0xb1b   : > { %vm3084_vm9 = vcmp.eq.s32.totalorder %v3062_v26, 1  ;;  %v7254_v26 = vld [vmem:[#allocation7_spill] sm:$0xff] }
 0xb1c   : > { %v6330_v48 = vsel %vm3084_vm9, %v3525_v5, -inf }
 0xb1d   : > { %v3116_v7 = vmax.f32 %v6144_v11, %v6330_v48 }
 0xb1e   : > { %v3068_v47 = vpop.permute.xlu1 %3067 }
 0xb1f   : > { %vm3086_vm6 = vcmp.eq.s32.totalorder %v3068_v47, 1  ;;  %v3065_v42 = vpop.permute.xlu0 %3064  ;;  %v7256_v47 = vmov 0 }
 0xb20   : > { %v6338_v19 = vsel %vm3086_vm6, %v6335_v18, -inf  ;;  %vm3085_vm13 = vcmp.eq.s32.totalorder %v3065_v42, 1 }
 0xb21   : > { %v3118_v13 = vmax.f32 %v6153_v21, %v6338_v19  ;;  %v6342_v54 = vsel %vm3085_vm13, %v3525_v5, -inf  ;;  %vm7217_vm13 = vcmp.ne.s32.totalorder %v7216_v4, 4294967295 }
 0xb22   : > { %v3117_v34 = vmax.f32 %v6159_v30, %v6342_v54  ;;  %v3143_v46 = vpop.permute.xlu1 %3142 }
 0xb23   : > { %v3141_v38 = vpop.permute.xlu0 %3140  ;;  %vm3157_vm14 = vcmp.ne.s32.totalorder %v3143_v46, 0  ;;  %v7259_v46 = vld [vmem:[#allocation5_spill] sm:$0xff] }
 0xb24   : > { %vm3156_vm11 = vcmp.ne.s32.totalorder %v3141_v38, 0  ;;  %vm6349_vm0 = vmor %vm7206_vm1, %vm3157_vm14  ;;  %v7309_v38 = vld [vmem:[#allocation28_spill] sm:$0xff] }
 0xb25   : > { %vm6356_vm7 = vmor %vm7210_vm8, %vm3156_vm11  ;;  %vm7220_vm11 = vcmp.eq.s32.totalorder %v6231_v22, 15  ;;  %vm7224_vm8 = vcmp.ne.s32.totalorder %v7223_v61, 4294967295  ;;  %v7231_v22 = vmov 0  ;;  %v3532_v61 = vld [vmem:[%s5942_s3 + $0x3f] ss:$0 sm:$0xff] }
 0xb26   : > { %v3147_v36 = vpop.permute.xlu1 %3146  ;;  %v7212_v56 = vsel %vm6356_vm7, 4294967295, %v7211_v56  ;;  %vm6372_vm14 = vmor %vm7217_vm13, %vm216_vm10  ;;  %vm7230_vm10 = vcmp.eq.s32.totalorder %v6247_v14, 15  ;;  %v7235_v14 = vmov 0 }
 0xb27   : > { %v3145_v29 = vpop.permute.xlu0 %3144  ;;  %vm3159_vm4 = vcmp.ne.s32.totalorder %v3147_v36, 0  ;;  %v7219_v8 = vsel %vm6372_vm14, 4294967295, %v7218_v8  ;;  %v7263_v36 = vld [vmem:[#allocation17_spill] sm:$0xff] }
 0xb28   : > { %vm3158_vm5 = vcmp.ne.s32.totalorder %v3145_v29, 0  ;;  %vm6364_vm3 = vmor %vm7213_vm15, %vm3159_vm4  ;;  %v7264_v29 = vld [vmem:[#allocation18_spill] sm:$0xff] }
 0xb29   : > { %v7215_v62 = vsel %vm6364_vm3, 4294967295, %v7214_v62  ;;  %vm6378_vm1 = vmor %vm7220_vm11, %vm3158_vm5  ;;  %vm7227_vm3 = vcmp.eq.s32.totalorder %v6243_v2, 15 }
 0xb2a   : > { %v3151_v23 = vpop.permute.xlu1 %3150  ;;  %v7222_v35 = vsel %vm6378_vm1, 4294967295, %v7221_v35  ;;  %vm6384_vm15 = vmor %vm7224_vm8, %vm215_vm12  ;;  %vm7233_vm8 = vnez %v7212_v56 }
 0xb2b   : > { %v3149_v37 = vpop.permute.xlu0 %3148  ;;  %vm3161_vm2 = vcmp.ne.s32.totalorder %v3151_v23, 0  ;;  %v7226_v16 = vsel %vm6384_vm15, 4294967295, %v7225_v16 }
 0xb2c   : > { %vm3160_vm9 = vcmp.ne.s32.totalorder %v3149_v37, 0  ;;  %vm6390_vm7 = vmor %vm7227_vm3, %vm3161_vm2 }
 0xb2d   : > { %v7229_v60 = vsel %vm6390_vm7, 4294967295, %v7228_v60  ;;  %vm6396_vm13 = vmor %vm7230_vm10, %vm3160_vm9  ;;  %vm7234_vm9 = vcmp.eq.s32.totalorder %v6259_v28, 15 }
 0xb2e   : > { %v3155_v20 = vpop.permute.xlu1 %3154  ;;  %v7232_v22 = vsel %vm6396_vm13, 4294967295, %v7231_v22  ;;  %vm7238_vm13 = vcmp.eq.s32.totalorder %v6263_v57, 15 }
 0xb2f   : > { %v3153_v53 = vpop.permute.xlu0 %3152  ;;  %vm3163_vm5 = vcmp.ne.s32.totalorder %v3155_v20, 0 }
 0xb30   : > { %vm3162_vm12 = vcmp.ne.s32.totalorder %v3153_v53, 0  ;;  %vm6406_vm10 = vmor %vm7234_vm9, %vm3163_vm5  ;;  %vm247_vm5 = vcmp.ne.s32.totalorder %v7242_v12, 0  ;;  %v7266_v53 = vld [vmem:[#allocation9_spill] sm:$0xff] }
 0xb31   : > { %v7236_v14 = vsel %vm6406_vm10, 4294967295, %v7235_v14 }
 0xb32   : > { %v3175_v50 = vpop.permute.xlu1 %3174 }
 0xb33   : > { %v3173_v63 = vpop.permute.xlu0 %3172  ;;  %vm3189_vm6 = vcmp.ne.s32.totalorder %v3175_v50, 0  ;;  %v7268_v50 = vmov 0 }
 0xb34   : > { %vm3188_vm4 = vcmp.ne.s32.totalorder %v3173_v63, 0  ;;  %vm3197_vm11 = vmor %vm6349_vm0, %vm3189_vm6  ;;  %v7270_v63 = vld [vmem:[#allocation29_spill] sm:$0xff] }
 0xb35   : > { %vm3196_vm15 = vmor %vm7233_vm8, %vm3188_vm4 }
 0xb36   : > { %v3179_v44 = vpop.permute.xlu1 %3178  ;;  %vm6414_vm4 = vmor %vm7238_vm13, %vm3162_vm12  ;;  %vm218_vm13 = vcmp.ne.s32.totalorder %v7244_v41, 0 }
 0xb37   : > { %v3177_v40 = vpop.permute.xlu0 %3176  ;;  %vm3191_vm14 = vcmp.ne.s32.totalorder %v3179_v44, 0  ;;  %v7240_v10 = vsel %vm6414_vm4, 4294967295, %v7239_v10 }
 0xb38   : > { %vm3190_vm3 = vcmp.ne.s32.totalorder %v3177_v40, 0  ;;  %v7272_v40 = vld [vmem:[#allocation10_spill] sm:$0xff] }
 0xb3a   : > { %v3183_v59 = vpop.permute.xlu1 %3182 }
 0xb3b   : > { %v3181_v1 = vpop.permute.xlu0 %3180 }
 0xb3c   : > { %vm3192_vm12 = vcmp.ne.s32.totalorder %v3181_v1, 0  ;;  %v7276_v1 = vld [vmem:[#allocation19_spill] sm:$0xff] }
 0xb3e   : > { %v6360_v15 = vpop.permute.xlu1 %3186 }
 0xb3f   : > { %v6368_v3 = vpop.permute.xlu0 %3184 }
 0xb42   : > { %v3207_v31 = vpop.permute.xlu1 %3206 }
 0xb43   : > { %vm3221_vm2 = vcmp.ne.s32.totalorder %v3207_v31, 0  ;;  %v3205_v2 = vpop.permute.xlu0 %3204  ;;  %v7292_v31 = vld [vmem:[#allocation12_spill] sm:$0xff] }
 0xb44   : > { %vm3229_vm7 = vmor %vm3197_vm11, %vm3221_vm2  ;;  %vm3220_vm1 = vcmp.ne.s32.totalorder %v3205_v2, 0  ;;  %vm7241_vm11 = vnez %v7215_v62  ;;  %v7280_v62 = vld [vmem:[#allocation24_spill] sm:$0xff] }
 0xb45   : > { %v3241_v9 = vsel %vm3229_vm7, 1, %v6853_v6  ;;  %vm3228_vm0 = vmor %vm3196_vm15, %vm3220_vm1  ;;  %vm7243_vm7 = vnez %v7222_v35  ;;  %vm3193_vm15 = vcmp.ne.s32.totalorder %v3183_v59, 0  ;;  %v7284_v35 = vld [vmem:[#allocation11_spill] sm:$0xff]  ;;  %v3529_v59 = vld [vmem:[%s5942_s3 + $0xf] ss:$0 sm:$0xff] }
 0xb46   : > { %vm3199_vm8 = vmor %vm7241_vm11, %vm3191_vm14  ;;  %v3240_v28 = vsel %vm3228_vm0, 1, %v6853_v6  ;;  %v3211_v45 = vpop.permute.xlu1 %3210  ;;  %3252 = vperm.xlu0 %3588, %v3241_v9   ;;  %vm217_vm14 = vcmp.ne.s32.totalorder %v7245_v0, 0  ;;  %vm7246_vm0 = vcmp.ne.s32.totalorder %v7237_v52, 0  ;;  %vm7247_vm11 = vnez %v7219_v8  ;;  %v7298_v52 = vld [vmem:[#allocation25_spill] sm:$0xff] }
 0xb47   : > { %vm3198_vm1 = vmor %vm7243_vm7, %vm3190_vm3  ;;  %vm3223_vm2 = vcmp.ne.s32.totalorder %v3211_v45, 0  ;;  %3249 = vperm.xlu1 %3589, %v3240_v28   ;;  %v3209_v57 = vpop.permute.xlu0 %3208  ;;  %vm7250_vm7 = vnez %v7226_v16  ;;  %v3528_v45 = vld [vmem:[%s5942_s3 + $0x3e] ss:$0 sm:$0xff] }
 0xb48   : > { %vm3231_vm9 = vmor %vm3199_vm8, %vm3223_vm2  ;;  %vm3222_vm6 = vcmp.ne.s32.totalorder %v3209_v57, 0  ;;  %vm7253_vm8 = vnez %v7229_v60  ;;  %v7291_v60 = vld [vmem:[#allocation31_spill] sm:$0xff]  ;;  %v7299_v57 = vld [vmem:[#allocation26_spill] sm:$0xff] }
 0xb49   : > { %vm6430_vm4 = vmor %vm7247_vm11, %vm7246_vm0  ;;  %v3243_v51 = vsel %vm3231_vm9, 1, %v6853_v6  ;;  %vm7255_vm0 = vcmp.ne.s32.totalorder %v7254_v26, 4294967295  ;;  %v7308_v26 = vld [vmem:[#allocation27_spill] sm:$0xff] }
 0xb4a   : > { %vm3230_vm3 = vmor %vm3198_vm1, %vm3222_vm6  ;;  %v3215_v5 = vpop.permute.xlu1 %3214  ;;  %3258 = vperm.xlu0 %3588, %v3243_v51   ;;  %vm7258_vm6 = vnez %v7232_v22 }
 0xb4b   : > { %vm6437_vm10 = vmor %vm7250_vm7, %vm247_vm5  ;;  %v3242_v24 = vsel %vm3230_vm3, 1, %v6853_v6  ;;  %vm3195_vm5 = vcmp.ne.s32.totalorder %v6360_v15, 0  ;;  %vm3225_vm9 = vcmp.ne.s32.totalorder %v3215_v5, 0  ;;  %v3213_v42 = vpop.permute.xlu0 %3212  ;;  %vm3194_vm7 = vcmp.ne.s32.totalorder %v6368_v3, 0  ;;  %v3527_v15 = vld [vmem:[%s5942_s3 + $0x2e] ss:$0 sm:$0xff] }
 0xb4c   : > { %v7252_v25 = vsel %vm6437_vm10, 4294967295, %v7251_v25  ;;  %vm3201_vm2 = vmor %vm7253_vm8, %vm3193_vm15  ;;  %3255 = vperm.xlu1 %3589, %v3242_v24   ;;  %vm7260_vm15 = vcmp.ne.s32.totalorder %v7259_v46, 4294967295 }
 0xb4d   : > { %vm6446_vm11 = vmor %vm7255_vm0, %vm218_vm13  ;;  %vm220_vm13 = vcmp.ne.s32.totalorder %v7263_v36, 0  ;;  %vm3224_vm0 = vcmp.ne.s32.totalorder %v3213_v42, 0 }
 0xb4e   : > { %v7257_v47 = vsel %vm6446_vm11, 4294967295, %v7256_v47  ;;  %vm3200_vm1 = vmor %vm7258_vm6, %vm3192_vm12  ;;  %vm219_vm12 = vcmp.ne.s32.totalorder %v7264_v29, 0  ;;  %vm7265_vm11 = vnez %v7236_v14  ;;  %v3219_v20 = vpop.permute.xlu1 %3218  ;;  %v7297_v14 = vld [vmem:[#allocation32_spill] sm:$0xff] }
 0xb4f   : > { %vm6457_vm3 = vmor %vm7260_vm15, %vm217_vm14  ;;  %vm7267_vm14 = vcmp.ne.s32.totalorder %v7266_v53, 4294967295  ;;  %v3217_v44 = vpop.permute.xlu0 %3216 }
 0xb50   : > { %vm3233_vm8 = vmor %vm3201_vm2, %vm3225_vm9  ;;  %vm7271_vm9 = vnez %v7240_v10  ;;  %vm221_vm2 = vcmp.ne.s32.totalorder %v7278_v55, 0 }
 0xb51   : > { %v3245_v23 = vsel %vm3233_vm8, 1, %v6853_v6  ;;  %vm3232_vm6 = vmor %vm3200_vm1, %vm3224_vm0  ;;  %vm3227_vm1 = vcmp.ne.s32.totalorder %v3219_v20, 0  ;;  %vm222_vm0 = vcmp.ne.s32.totalorder %v7276_v1, 0  ;;  %v7311_v20 = vld [vmem:[#allocation36_spill] sm:$0xff] }
 0xb52   : > { %vm3203_vm10 = vmor %vm7265_vm11, %vm3195_vm5  ;;  %v3244_v37 = vsel %vm3232_vm6, 1, %v6853_v6  ;;  %3264 = vperm.xlu0 %3588, %v3245_v23   ;;  %vm7273_vm11 = vcmp.ne.s32.totalorder %v7272_v40, 4294967295  ;;  %v3074_v8 = vpop.permute.xlu1 %3073  ;;  %v7310_v23 = vld [vmem:[#allocation35_spill] sm:$0xff] }
 0xb53   : > { %vm6470_vm15 = vmor %vm7267_vm14, %vm220_vm13  ;;  %3261 = vperm.xlu1 %3589, %v3244_v37   ;;  %vm279_vm13 = vcmp.ne.s32.totalorder %v7277_v33, 0  ;;  %vm3226_vm14 = vcmp.ne.s32.totalorder %v3217_v44, 0  ;;  %v3071_v22 = vpop.permute.xlu0 %3070 }
 0xb54   : > { %v7269_v50 = vsel %vm6470_vm15, 4294967295, %v7268_v50  ;;  %vm3202_vm8 = vmor %vm7271_vm9, %vm3194_vm7  ;;  %vm250_vm15 = vcmp.ne.s32.totalorder %v7279_v49, 0  ;;  %vm249_vm9 = vcmp.ne.s32.totalorder %v7280_v62, 0 }
 0xb55   : > { %vm6479_vm5 = vmor %vm7273_vm11, %vm219_vm12  ;;  %vm7281_vm12 = vcmp.ne.s32.totalorder %v7270_v63, 0 }
 0xb56   : > { %vm3235_vm6 = vmor %vm3203_vm10, %vm3227_vm1  ;;  %vm7285_vm10 = vcmp.ne.s32.totalorder %v7284_v35, 4294967295  ;;  %v3080_v32 = vpop.permute.xlu1 %3079  ;;  %v3531_v35 = vld [vmem:[%s5942_s3 + $0x2f] ss:$0 sm:$0xff] }
 0xb57   : > { %v3247_v56 = vsel %vm3235_vm6, 1, %v6853_v6  ;;  %vm3234_vm7 = vmor %vm3202_vm8, %vm3226_vm14  ;;  %vm7288_vm8 = vnez %v7252_v25  ;;  %vm3088_vm14 = vcmp.eq.s32.totalorder %v3074_v8, 1  ;;  %v7305_v25 = vld [vmem:[#allocation33_spill] sm:$0xff]  ;;  %v3077_v24 = vpop.permute.xlu0 %3076 }
 0xb58   : > { %vm6494_vm11 = vmor %vm6430_vm4, %vm7281_vm12  ;;  %v3246_v4 = vsel %vm3234_vm7, 1, %v6853_v6  ;;  %3270 = vperm.xlu0 %3588, %v3247_v56   ;;  %vm7293_vm7 = vcmp.ne.s32.totalorder %v7292_v31, 4294967295  ;;  %v6525_v9 = vsel %vm3088_vm14, %v3527_v15, -inf  ;;  %vm7300_vm14 = vcmp.ne.s32.totalorder %v7291_v60, 0  ;;  %v3530_v56 = vld [vmem:[%s5942_s3 + $0x1f] ss:$0 sm:$0xff] }
 0xb59   : > { %vm6501_vm1 = vmor %vm7285_vm10, %vm222_vm0  ;;  %3267 = vperm.xlu1 %3589, %v3246_v4   ;;  %vm7296_vm0 = vnez %v7257_v47  ;;  %vm281_vm10 = vcmp.ne.s32.totalorder %v7297_v14, 0  ;;  %v3120_v10 = vmax.f32 %v6164_v43, %v6525_v9  ;;  %v3313_v12 = vsel %vm6494_vm11, 1, %v6853_v6 }
 0xb5a   : > { %vm6507_vm6 = vmor %vm7288_vm8, %vm279_vm13  ;;  %vm3087_vm8 = vcmp.eq.s32.totalorder %v3071_v22, 1  ;;  %vm3090_vm11 = vcmp.eq.s32.totalorder %v3080_v32, 1 }
 0xb5b   : > { %vm6516_vm12 = vmor %vm7293_vm7, %vm221_vm2  ;;  %vm252_vm2 = vcmp.ne.s32.totalorder %v7298_v52, 0  ;;  %v6535_v28 = vsel %vm3087_vm8, %v6335_v18, -inf  ;;  %v3312_v18 = vsel %vm6507_vm6, 1, %v6853_v6  ;;  %v6565_v5 = vsel %vm3090_vm11, %v3528_v45, -inf  ;;  %v3083_v37 = vpop.permute.xlu0 %3082 }
 0xb5c   : > { %vm258_vm13 = vmor %vm7296_vm0, %vm250_vm15  ;;  %vm251_vm15 = vcmp.ne.s32.totalorder %v7299_v57, 0  ;;  %v3119_v0 = vmax.f32 %v6172_v17, %v6535_v28  ;;  %3324 = vperm.xlu0 %3588, %v3313_v12   ;;  %vm7306_vm0 = vnez %v7269_v50  ;;  %v7307_v17 = vld [vmem:[#allocation34_spill] sm:$0xff]  ;;  %vm3089_vm6 = vcmp.eq.s32.totalorder %v3077_v24, 1 }
 0xb5d   : > { %vm257_vm4 = vmor %vm6457_vm3, %vm249_vm9  ;;  %vm284_vm9 = vcmp.ne.s32.totalorder %v7305_v25, 0  ;;  %3321 = vperm.xlu1 %3589, %v3312_v18   ;;  %vm283_vm8 = vcmp.ne.s32.totalorder %v7307_v17, 0  ;;  %v3122_v47 = vmax.f32 %v6177_v39, %v6565_v5  ;;  %v3113_v42 = vsel %vm3089_vm6, %v3527_v15, -inf }
 0xb5e   : > { %vm6544_vm7 = vmor %vm258_vm13, %vm7300_vm14  ;;  %v3121_v36 = vmax.f32 %v6179_v27, %v3113_v42 }
 0xb5f   : > { %vm6555_vm3 = vmor %vm257_vm4, %vm281_vm10  ;;  %vm254_vm10 = vcmp.ne.s32.totalorder %v7308_v26, 0  ;;  %v3315_v46 = vsel %vm6544_vm7, 1, %v6853_v6  ;;  %vm285_vm7 = vcmp.ne.s32.totalorder %v7311_v20, 0 }
 0xb60   : > { %vm260_vm13 = vmor %vm7306_vm0, %vm252_vm2  ;;  %vm253_vm2 = vcmp.ne.s32.totalorder %v7309_v38, 0  ;;  %3330 = vperm.xlu0 %3588, %v3315_v46   ;;  %v3314_v29 = vsel %vm6555_vm3, 1, %v6853_v6  ;;  %vm3091_vm0 = vcmp.eq.s32.totalorder %v3083_v37, 1 }
 0xb61   : > { %vm259_vm4 = vmor %vm6479_vm5, %vm251_vm15  ;;  %vm286_vm15 = vcmp.ne.s32.totalorder %v7310_v23, 0  ;;  %3327 = vperm.xlu1 %3589, %v3314_v29   ;;  %v3115_v27 = vsel %vm3091_vm0, %v3528_v45, -inf }
 0xb62   : > { %vm292_vm14 = vmor %vm260_vm13, %vm284_vm9  ;;  %v3123_v50 = vmax.f32 %v6181_v58, %v3115_v27 }
 0xb63   : > { %vm291_vm5 = vmor %vm259_vm4, %vm283_vm8  ;;  %v3317_v53 = vsel %vm292_vm14, 1, %v6853_v6 }
 0xb64   : > { %vm262_vm11 = vmor %vm6501_vm1, %vm254_vm10  ;;  %3336 = vperm.xlu0 %3588, %v3317_v53   ;;  %v3316_v63 = vsel %vm291_vm5, 1, %v6853_v6 }
 0xb65   : > { %vm261_vm9 = vmor %vm6516_vm12, %vm253_vm2  ;;  %3333 = vperm.xlu1 %3589, %v3316_v63  }
 0xb66   : > { %vm294_vm13 = vmor %vm262_vm11, %vm286_vm15 }
 0xb67   : > { %vm293_vm3 = vmor %vm261_vm9, %vm285_vm7  ;;  %v3319_v44 = vsel %vm294_vm13, 1, %v6853_v6 }
 0xb68   : > { %3342 = vperm.xlu0 %3588, %v3319_v44   ;;  %v3318_v40 = vsel %vm293_vm3, 1, %v6853_v6 }
 0xb69   : > { %3339 = vperm.xlu1 %3589, %v3318_v40  }
 0xbc5   : > { %v3253_v1 = vpop.permute.xlu0 %3252 }
 0xbc6   : > { %v3250_v33 = vpop.permute.xlu1 %3249  ;;  %vm3273_vm1 = vcmp.eq.s32.totalorder %v3253_v1, 1 }
 0xbc7   : > { %vm3272_vm12 = vcmp.eq.s32.totalorder %v3250_v33, 1  ;;  %v3297_v55 = vsel %vm3273_vm1, %v3529_v59, -inf }
 0xbc8   : > { %v3296_v58 = vsel %vm3272_vm12, %v3529_v59, -inf  ;;  %v3305_v49 = vmax.f32 %v3117_v34, %v3297_v55 }
 0xbc9   : > { %v3304_v15 = vmax.f32 %v3116_v7, %v3296_v58  ;;  %v3259_v6 = vpop.permute.xlu0 %3258 }
 0xbca   : > { %vm3275_vm8 = vcmp.eq.s32.totalorder %v3259_v6, 1 }
 0xbcb   : > { %v3256_v62 = vpop.permute.xlu1 %3255  ;;  %v3299_v3 = vsel %vm3275_vm8, %v3530_v56, -inf }
 0xbcc   : > { %vm3274_vm6 = vcmp.eq.s32.totalorder %v3256_v62, 1  ;;  %v3307_v8 = vmax.f32 %v3119_v0, %v3299_v3 }
 0xbcd   : > { %v3298_v4 = vsel %vm3274_vm6, %v3530_v56, -inf }
 0xbce   : > { %v3306_v30 = vmax.f32 %v3118_v13, %v3298_v4 }
 0xbd1   : > { %v3265_v54 = vpop.permute.xlu0 %3264 }
 0xbd2   : > { %v3262_v34 = vpop.permute.xlu1 %3261  ;;  %vm3277_vm4 = vcmp.eq.s32.totalorder %v3265_v54, 1 }
 0xbd3   : > { %vm3276_vm10 = vcmp.eq.s32.totalorder %v3262_v34, 1  ;;  %v3301_v11 = vsel %vm3277_vm4, %v3531_v35, -inf }
 0xbd4   : > { %v3300_v48 = vsel %vm3276_vm10, %v3531_v35, -inf  ;;  %v3309_v7 = vmax.f32 %v3121_v36, %v3301_v11 }
 0xbd5   : > { %v3308_v16 = vmax.f32 %v3120_v10, %v3300_v48 }
 0xbd7   : > { %v3271_v60 = vpop.permute.xlu0 %3270 }
 0xbd8   : > { %v3268_v22 = vpop.permute.xlu1 %3267  ;;  %vm3279_vm2 = vcmp.eq.s32.totalorder %v3271_v60, 1 }
 0xbd9   : > { %vm3278_vm14 = vcmp.eq.s32.totalorder %v3268_v22, 1  ;;  %v3303_v21 = vsel %vm3279_vm2, %v3532_v61, -inf }
 0xbda   : > { %v3302_v19 = vsel %vm3278_vm14, %v3532_v61, -inf  ;;  %v3311_v13 = vmax.f32 %v3123_v50, %v3303_v21 }
 0xbdb   : > { %v3310_v31 = vmax.f32 %v3122_v47, %v3302_v19  ;;  %v3325_v2 = vpop.permute.xlu0 %3324 }
 0xbdc   : > { %v3322_v14 = vpop.permute.xlu1 %3321  ;;  %vm3345_vm5 = vcmp.eq.s32.totalorder %v3325_v2, 1 }
 0xbdd   : > { %vm3344_vm15 = vcmp.eq.s32.totalorder %v3322_v14, 1  ;;  %v3353_v52 = vsel %vm3345_vm5, %v3305_v49, 0.0 }
 0xbde   : > { %v3352_v43 = vsel %vm3344_vm15, %v3304_v15, 0.0  ;;  %3362 = vst [vmem:[%s157_s6 + $0x8] sm:$0xff] %v3353_v52 }
 0xbdf   : > { %3361 = vst [vmem:[%s157_s6] sm:$0xff] %v3352_v43  ;;  %v3331_v9 = vpop.permute.xlu0 %3330 }
 0xbe0   : > { %v3328_v10 = vpop.permute.xlu1 %3327  ;;  %vm3347_vm11 = vcmp.eq.s32.totalorder %v3331_v9, 1 }
 0xbe1   : > { %vm3346_vm7 = vcmp.eq.s32.totalorder %v3328_v10, 1  ;;  %v3355_v28 = vsel %vm3347_vm11, %v3307_v8, 0.0 }
 0xbe2   : > { %v3354_v45 = vsel %vm3346_vm7, %v3306_v30, 0.0  ;;  %3364 = vst [vmem:[%s157_s6 + $0x18] sm:$0xff] %v3355_v28 }
 0xbe3   : > { %3363 = vst [vmem:[%s157_s6 + $0x10] sm:$0xff] %v3354_v45  ;;  %v3337_v39 = vpop.permute.xlu0 %3336 }
 0xbe4   : > { %v3334_v12 = vpop.permute.xlu1 %3333  ;;  %vm3349_vm0 = vcmp.eq.s32.totalorder %v3337_v39, 1 }
 0xbe5   : > { %vm3348_vm9 = vcmp.eq.s32.totalorder %v3334_v12, 1  ;;  %v3357_v57 = vsel %vm3349_vm0, %v3309_v7, 0.0 }
 0xbe6   : > { %v3356_v41 = vsel %vm3348_vm9, %v3308_v16, 0.0  ;;  %3366 = vst [vmem:[%s157_s6 + $0x28] sm:$0xff] %v3357_v57 }
 0xbe7   : > { %3365 = vst [vmem:[%s157_s6 + $0x20] sm:$0xff] %v3356_v41  ;;  %v3343_v0 = vpop.permute.xlu0 %3342 }
 0xbe8   : > { %v3340_v32 = vpop.permute.xlu1 %3339  ;;  %vm3351_vm13 = vcmp.eq.s32.totalorder %v3343_v0, 1 }
 0xbe9   : > { %vm3350_vm3 = vcmp.eq.s32.totalorder %v3340_v32, 1  ;;  %v3359_v18 = vsel %vm3351_vm13, %v3311_v13, 0.0 }
 0xbea   : > { %v3358_v51 = vsel %vm3350_vm3, %v3310_v31, 0.0  ;;  %3368 = vst [vmem:[%s157_s6 + $0x38] sm:$0xff] %v3359_v18 }
 0xbeb   : > { %3367 = vst [vmem:[%s157_s6 + $0x30] sm:$0xff] %v3358_v51 }
 0xbec   : > { %3635 = shalt.err (!%p3632_p3)
}
 0xbed   : > { %s3636_s25 = scalar_lea.hbm %s6619_s17, 1024  ;;  %s3640_s28 = scalar_lea.hbm %s6668_s2, 2048 }
 0xbee   : > { %p3637_p4 = scmp.ne.s32.totalorder %s6619_s17, %s3636_s25  ;;  %p3641_p9 = scmp.lt.u32.totalorder %s6619_s17, %s6668_s2 }
 0xbef   : > { %p3642_p10 = scmp.lt.u32.totalorder %s3640_s28, %s3636_s25  ;;  %p3644_p12 = scmp.lt.u32.totalorder %s3636_s25, %s6619_s17 }
 0xbf0   : > { %p3638_p7 = pnand %p3637_p4, %p3746_p5 }
 0xbf1   : > { %p3643_p11 = por %p3642_p10, %p3641_p9 }
 0xbf2   : > { %p3639_p8 = pneg %p3638_p7 }
 0xbf3   : > { %p3645_p13 = por %p3644_p12, %p3643_p11 }
 0xbf5   : > { %p3646_p0 = pnand %p3645_p13, %p3639_p8 }
 0xbf7   : > { %3649 = shalt.err (!%p3646_p0)
}
 0xbf8   : > { %s3691_s3 = smov 128   ;;  %s3692_s4 = smov 8  }
 0xbf9   : > { %3543 = dma.vmem_to_hbm [thread:$0]  (%p3746_p5), %s6621_s8, 1024, %s6619_s17, %s6625_s13, %s3691_s3, %s3691_s3, %s3692_s4  }
 0xbfa PF: > { %p3549_p1 = scmp.ge.s32.totalorder %s3684_s12, 2  ;;  %s3399_s5 = sand.u32 1, %s3672_s9  }
 0xbfb   : > { %s3400_s6 = scalar_lea.sflag [#allocation3], %s3399_s5 }
 0xbfc   : > { %p3546_p2 = pnand %p3549_p1, %p3750_p6 }
 0xbfe   : > { %3667 = dma.done.wait (!%p3546_p2), %s3400_s6, 1024  }
 0xbff   : > { %3669 = vsyncadd (!%p3546_p2), %s3400_s6, 4294966272  ;;  %p12_p3 = scmp.ge.s32.totalorder %s3733_s15, 4   ;;  %s7312_s9 = smov %s3676_s10 }
 0xc00   : > { %s7313_s10 = smov %s3680_s11  ;;  %s7314_s11 = smov %s3744_s18 }
 0xc01   : > { %s7315_s12 = smov %s3733_s15  ;;  %14 = sbr.rel (!%p12_p3) target bundleno = 3 (0x3), region = 69 }
 0xc08   :  { %3405 = vsyncpa [#allocation3], 1 }
 0xc09   :  { %3407 = vsyncpa [#allocation3 + $0x1], 1 }

</bundles_post_ra>
